<compile_context>
chip_gen: v6e
topology: v6e:2x2x1
jax: 0.10.0
libtpu: 0.0.40
codegen_flags: <defaults>
</compile_context>

<pallas_src>
import jax
import jax.numpy as jnp
from jax.experimental import pallas as pl
from jax.experimental.pallas import tpu as pltpu

IN_DIM = 28 * 28          # 784
HID = 1024
OUT_DIM = 10
OUT_PAD = 128             # lane-dense output slab


def _round_up(x, m):
    return ((x + m - 1) // m) * m


def _tpu_generation():
    """Best-effort TPU generation sniff ('v5' / 'v6' / 'v7' / None)."""
    try:
        kind = jax.devices()[0].device_kind.lower()
    except Exception:
        return None
    for g in ("v7", "v6", "v5"):
        if g in kind:
            return g
    return None


def _k_pad_for_gen(gen):
    # v5e MXU is 128-wide in K -> 896 is already 7 full passes; v6e/v7x are
    # 256-wide -> pad to 1024 for 4 clean passes (same pass count, no masking).
    return 896 if gen == "v5" else 1024


def _tile_and_vmem(B, gen):
    """Pick batch-tile TB and scoped VMEM limit per TPU generation."""
    if B <= 16:
        tb = _round_up(max(B, 1), 16)                 # single tiny tile
    elif gen in ("v5", "v6"):
        # one TensorCore: amortize ~0.35 us/step overhead with big tiles
        tb = min(1024, _round_up(B, 16))
    else:
        # v7x (or unknown): keep >= 2 grid steps so the "parallel" batch axis
        # can be sharded across the 2 TensorCores; cap tile for 64 MiB VMEM/TC
        tb = min(512, _round_up(-(-B // 2), 16))
    vmem_limit = (64 << 20) if gen in ("v5", "v6") else (32 << 20)
    return tb, vmem_limit


# ---------------------------------------------------------------------------
# One-time parameter preparation (hoisted out of the forward path).
# ---------------------------------------------------------------------------
def prepare_params(w1, b1, w2, b2, w3, b3, k_pad):
    """Pad + cast weights once; returns device-resident bf16 weights / f32 biases."""
    w1_p = jnp.pad(w1, ((0, k_pad - IN_DIM), (0, 0))).astype(jnp.bfloat16)
    w2_p = w2.astype(jnp.bfloat16)
    w3_p = jnp.pad(w3, ((0, 0), (0, OUT_PAD - OUT_DIM))).astype(jnp.bfloat16)
    b1_p = b1.reshape(1, HID).astype(jnp.float32)
    b2_p = b2.reshape(1, HID).astype(jnp.float32)
    b3_p = jnp.pad(b3.reshape(1, OUT_DIM),
                   ((0, 0), (0, OUT_PAD - OUT_DIM))).astype(jnp.float32)
    return (w1_p, b1_p, w2_p, b2_p, w3_p, b3_p)


# ---------------------------------------------------------------------------
# Kernel: one batch tile through the whole 3-layer MLP.
# ---------------------------------------------------------------------------
def mlp_kernel(x_ref, w1_ref, b1_ref, w2_ref, b2_ref, w3_ref, b3_ref, o_ref):
    # x_ref: [TB, K_PAD] bf16        w1: [K_PAD, HID] bf16   b1: [1, HID] f32
    # w2: [HID, HID] bf16            b2: [1, HID] f32
    # w3: [HID, OUT_PAD] bf16        b3: [1, OUT_PAD] f32
    # o_ref: [TB, OUT_PAD] f32
    x = x_ref[...]

    h1 = jnp.dot(x, w1_ref[...], preferred_element_type=jnp.float32) + b1_ref[...]
    h1 = jnp.maximum(h1, 0.0).astype(jnp.bfloat16)        # ReLU, bf16 for next MXU

    h2 = jnp.dot(h1, w2_ref[...], preferred_element_type=jnp.float32) + b2_ref[...]
    h2 = jnp.maximum(h2, 0.0).astype(jnp.bfloat16)

    o_ref[...] = jnp.dot(h2, w3_ref[...], preferred_element_type=jnp.float32) + b3_ref[...]


# ---------------------------------------------------------------------------
# Forward wrapper: only activation prep + pallas_call per invocation.
# ---------------------------------------------------------------------------
def mlp_forward(x_nchw, params):
    """x_nchw: [B, 1, 28, 28] float32, params from prepare_params -> [B, 10] f32."""
    w1_p, b1_p, w2_p, b2_p, w3_p, b3_p = params
    k_pad = w1_p.shape[0]

    B = x_nchw.shape[0]
    x_flat = x_nchw.reshape(B, IN_DIM)                     # nn.Flatten()

    gen = _tpu_generation()
    tb, vmem_limit = _tile_and_vmem(B, gen)
    b_pad = _round_up(B, tb)
    grid = (b_pad // tb,)

    # Fused pad + cast: single pass over the activations.
    x_p = jnp.pad(x_flat, ((0, b_pad - B), (0, k_pad - IN_DIM))).astype(jnp.bfloat16)

    # --- block specs ---------------------------------------------------------
    x_spec = pl.BlockSpec((tb, k_pad), lambda i: (i, 0))          # streamed per step
    w1_spec = pl.BlockSpec((k_pad, HID), lambda i: (0, 0))        # resident
    b1_spec = pl.BlockSpec((1, HID), lambda i: (0, 0))
    w2_spec = pl.BlockSpec((HID, HID), lambda i: (0, 0))
    b2_spec = pl.BlockSpec((1, HID), lambda i: (0, 0))
    w3_spec = pl.BlockSpec((HID, OUT_PAD), lambda i: (0, 0))
    b3_spec = pl.BlockSpec((1, OUT_PAD), lambda i: (0, 0))
    out_spec = pl.BlockSpec((tb, OUT_PAD), lambda i: (i, 0))      # lane-dense slab

    out_padded = pl.pallas_call(
        mlp_kernel,
        out_shape=jax.ShapeDtypeStruct((b_pad, OUT_PAD), jnp.float32),
        grid=grid,
        in_specs=[x_spec, w1_spec, b1_spec, w2_spec, b2_spec, w3_spec, b3_spec],
        out_specs=out_spec,
        compiler_params=pltpu.CompilerParams(
            dimension_semantics=("parallel",),             # shard batch over v7x's 2 TCs
            vmem_limit_bytes=vmem_limit,
        ),
    )(x_p, w1_p, b1_p, w2_p, b2_p, w3_p, b3_p)

    return out_padded[:B, :OUT_DIM]


# ---------------------------------------------------------------------------
# Deterministic parameter init matching nn.Linear shapes (stored as [in, out]).
# ---------------------------------------------------------------------------
def init_params(key):
    k1, k2, k3, k4, k5, k6 = jax.random.split(key, 6)

    def lin(kw, kb, fan_in, fan_out):
        bound = 1.0 / jnp.sqrt(fan_in)
        w = jax.random.uniform(kw, (fan_in, fan_out), jnp.float32, -bound, bound)
        b = jax.random.uniform(kb, (fan_out,), jnp.float32, -bound, bound)
        return w, b

    w1, b1 = lin(k1, k2, IN_DIM, HID)
    w2, b2 = lin(k3, k4, HID, HID)
    w3, b3 = lin(k5, k6, HID, OUT_DIM)
    return w1, b1, w2, b2, w3, b3


if __name__ == "__main__":
    key = jax.random.PRNGKey(0)
    kx, kp = jax.random.split(key)

    B = 2
    x = jax.random.normal(kx, (B, 1, 28, 28), dtype=jnp.float32)  # NCHW, like MNIST
    w1, b1, w2, b2, w3, b3 = init_params(kp)

    # One-time (model-load-time) weight padding / casting.
    k_pad = _k_pad_for_gen(_tpu_generation())
    params = prepare_params(w1, b1, w2, b2, w3, b3, k_pad)
    params = jax.block_until_ready(params)

    logits = mlp_forward(x, params)
    logits = jax.block_until_ready(logits)

    # Reference check in plain JAX using the same bf16 matmul / f32-accumulate path.
    x_flat = x.reshape(B, IN_DIM)
    h1 = jnp.maximum(
        jnp.dot(x_flat.astype(jnp.bfloat16), w1.astype(jnp.bfloat16),
                preferred_element_type=jnp.float32) + b1, 0.0).astype(jnp.bfloat16)
    h2 = jnp.maximum(
        jnp.dot(h1, w2.astype(jnp.bfloat16),
                preferred_element_type=jnp.float32) + b2, 0.0).astype(jnp.bfloat16)
    ref_bf16 = jnp.dot(h2, w3.astype(jnp.bfloat16),
                       preferred_element_type=jnp.float32) + b3

    # Full-f32 reference (PyTorch math) for a looser sanity check.
    h1f = jnp.maximum(x_flat @ w1 + b1, 0.0)
    h2f = jnp.maximum(h1f @ w2 + b2, 0.0)
    ref_f32 = h2f @ w3 + b3

    assert logits.shape == (B, OUT_DIM)
    assert jnp.allclose(logits, ref_bf16, atol=1e-3, rtol=1e-3)
    assert jnp.allclose(logits, ref_f32, atol=5e-2, rtol=5e-2)

    print("KERNEL_OK")
</pallas_src>

<mosaic_0001>
module attributes {stable_mosaic.version = 11 : i64} {
  func.func @mlp_kernel(%arg0: i32, %arg1: memref<16x1024xbf16, #tpu.memory_space<vmem>>, %arg2: memref<1024x1024xbf16, #tpu.memory_space<vmem>>, %arg3: memref<1x1024xf32, #tpu.memory_space<vmem>>, %arg4: memref<1024x1024xbf16, #tpu.memory_space<vmem>>, %arg5: memref<1x1024xf32, #tpu.memory_space<vmem>>, %arg6: memref<1024x128xbf16, #tpu.memory_space<vmem>>, %arg7: memref<1x128xf32, #tpu.memory_space<vmem>>, %arg8: memref<16x128xf32, #tpu.memory_space<vmem>>) attributes {dimension_semantics = [#tpu.dimension_semantics<parallel>], iteration_bounds = array<i64: 1>, scalar_prefetch = 0 : i64, scratch_operands = 0 : i64, tpu.core_type = #tpu.core_type<tc>, window_params = [{transform_indices = @transform_0, window_bounds = array<i64: 16, 1024>}, {pipeline_mode = #tpu.pipeline_mode<synchronous>, transform_indices = @transform_1, window_bounds = array<i64: 1024, 1024>}, {pipeline_mode = #tpu.pipeline_mode<synchronous>, transform_indices = @transform_2, window_bounds = array<i64: 1, 1024>}, {pipeline_mode = #tpu.pipeline_mode<synchronous>, transform_indices = @transform_3, window_bounds = array<i64: 1024, 1024>}, {pipeline_mode = #tpu.pipeline_mode<synchronous>, transform_indices = @transform_4, window_bounds = array<i64: 1, 1024>}, {pipeline_mode = #tpu.pipeline_mode<synchronous>, transform_indices = @transform_5, window_bounds = array<i64: 1024, 128>}, {pipeline_mode = #tpu.pipeline_mode<synchronous>, transform_indices = @transform_6, window_bounds = array<i64: 1, 128>}, {transform_indices = @transform_7, window_bounds = array<i64: 16, 128>}]} {
    %c0 = arith.constant 0 : index
    %c0_0 = arith.constant 0 : index
    %0 = vector.load %arg1[%c0, %c0_0] : memref<16x1024xbf16, #tpu.memory_space<vmem>>, vector<16x1024xbf16>
    %c0_1 = arith.constant 0 : index
    %c0_2 = arith.constant 0 : index
    %1 = vector.load %arg2[%c0_1, %c0_2] : memref<1024x1024xbf16, #tpu.memory_space<vmem>>, vector<1024x1024xbf16>
    %cst = arith.constant dense<0.000000e+00> : vector<16x1024xf32>
    %2 = tpu.matmul %0, %1, %cst {dimension_numbers = #tpu.dot_dimension_numbers<[1], [0], [0], [1], [0, 0, 1, 1], [], []>} : vector<16x1024xbf16>, vector<1024x1024xbf16>, vector<16x1024xf32> -> vector<16x1024xf32>
    %c0_3 = arith.constant 0 : index
    %c0_4 = arith.constant 0 : index
    %3 = vector.load %arg3[%c0_3, %c0_4] : memref<1x1024xf32, #tpu.memory_space<vmem>>, vector<1x1024xf32>
    %4 = vector.broadcast %3 : vector<1x1024xf32> to vector<16x1024xf32>
    %5 = arith.addf %2, %4 : vector<16x1024xf32>
    %cst_5 = arith.constant 0.000000e+00 : f32
    %6 = vector.broadcast %cst_5 : f32 to vector<16x1024xf32>
    %7 = arith.maximumf %5, %6 : vector<16x1024xf32>
    %8 = arith.truncf %7 : vector<16x1024xf32> to vector<16x1024xbf16>
    %c0_6 = arith.constant 0 : index
    %c0_7 = arith.constant 0 : index
    %9 = vector.load %arg4[%c0_6, %c0_7] : memref<1024x1024xbf16, #tpu.memory_space<vmem>>, vector<1024x1024xbf16>
    %cst_8 = arith.constant dense<0.000000e+00> : vector<16x1024xf32>
    %10 = tpu.matmul %8, %9, %cst_8 {dimension_numbers = #tpu.dot_dimension_numbers<[1], [0], [0], [1], [0, 0, 1, 1], [], []>} : vector<16x1024xbf16>, vector<1024x1024xbf16>, vector<16x1024xf32> -> vector<16x1024xf32>
    %c0_9 = arith.constant 0 : index
    %c0_10 = arith.constant 0 : index
    %11 = vector.load %arg5[%c0_9, %c0_10] : memref<1x1024xf32, #tpu.memory_space<vmem>>, vector<1x1024xf32>
    %12 = vector.broadcast %11 : vector<1x1024xf32> to vector<16x1024xf32>
    %13 = arith.addf %10, %12 : vector<16x1024xf32>
    %cst_11 = arith.constant 0.000000e+00 : f32
    %14 = vector.broadcast %cst_11 : f32 to vector<16x1024xf32>
    %15 = arith.maximumf %13, %14 : vector<16x1024xf32>
    %16 = arith.truncf %15 : vector<16x1024xf32> to vector<16x1024xbf16>
    %c0_12 = arith.constant 0 : index
    %c0_13 = arith.constant 0 : index
    %17 = vector.load %arg6[%c0_12, %c0_13] : memref<1024x128xbf16, #tpu.memory_space<vmem>>, vector<1024x128xbf16>
    %cst_14 = arith.constant dense<0.000000e+00> : vector<16x128xf32>
    %18 = tpu.matmul %16, %17, %cst_14 {dimension_numbers = #tpu.dot_dimension_numbers<[1], [0], [0], [1], [0, 0, 1, 1], [], []>} : vector<16x1024xbf16>, vector<1024x128xbf16>, vector<16x128xf32> -> vector<16x128xf32>
    %c0_15 = arith.constant 0 : index
    %c0_16 = arith.constant 0 : index
    %19 = vector.load %arg7[%c0_15, %c0_16] : memref<1x128xf32, #tpu.memory_space<vmem>>, vector<1x128xf32>
    %20 = vector.broadcast %19 : vector<1x128xf32> to vector<16x128xf32>
    %21 = arith.addf %18, %20 : vector<16x128xf32>
    %c0_17 = arith.constant 0 : index
    %c0_18 = arith.constant 0 : index
    %22 = vector.load %arg8[%c0_17, %c0_18] : memref<16x128xf32, #tpu.memory_space<vmem>>, vector<16x128xf32>
    tpu.vector_store %arg8[%c0_17, %c0_18], %21 {strides = array<i32>} : memref<16x128xf32, #tpu.memory_space<vmem>>, vector<16x128xf32>,
    return
  }
  func.func @transform_0(%arg0: i32) -> (i32, i32) {
    %c0_i32 = arith.constant 0 : i32
    %c0_i32_0 = arith.constant 0 : i32
    return %arg0, %c0_i32 : i32, i32
  }
  func.func @transform_1(%arg0: i32) -> (i32, i32) {
    %c0_i32 = arith.constant 0 : i32
    %c0_i32_0 = arith.constant 0 : i32
    %c0_i32_1 = arith.constant 0 : i32
    return %c0_i32, %c0_i32_0 : i32, i32
  }
  func.func @transform_2(%arg0: i32) -> (i32, i32) {
    %c0_i32 = arith.constant 0 : i32
    %c0_i32_0 = arith.constant 0 : i32
    %c0_i32_1 = arith.constant 0 : i32
    return %c0_i32, %c0_i32_0 : i32, i32
  }
  func.func @transform_3(%arg0: i32) -> (i32, i32) {
    %c0_i32 = arith.constant 0 : i32
    %c0_i32_0 = arith.constant 0 : i32
    %c0_i32_1 = arith.constant 0 : i32
    return %c0_i32, %c0_i32_0 : i32, i32
  }
  func.func @transform_4(%arg0: i32) -> (i32, i32) {
    %c0_i32 = arith.constant 0 : i32
    %c0_i32_0 = arith.constant 0 : i32
    %c0_i32_1 = arith.constant 0 : i32
    return %c0_i32, %c0_i32_0 : i32, i32
  }
  func.func @transform_5(%arg0: i32) -> (i32, i32) {
    %c0_i32 = arith.constant 0 : i32
    %c0_i32_0 = arith.constant 0 : i32
    %c0_i32_1 = arith.constant 0 : i32
    return %c0_i32, %c0_i32_0 : i32, i32
  }
  func.func @transform_6(%arg0: i32) -> (i32, i32) {
    %c0_i32 = arith.constant 0 : i32
    %c0_i32_0 = arith.constant 0 : i32
    %c0_i32_1 = arith.constant 0 : i32
    return %c0_i32, %c0_i32_0 : i32, i32
  }
  func.func @transform_7(%arg0: i32) -> (i32, i32) {
    %c0_i32 = arith.constant 0 : i32
    %c0_i32_0 = arith.constant 0 : i32
    return %arg0, %c0_i32 : i32, i32
  }
}

</mosaic_0001>

<bundles_post_ra>
// kernel: tpu_custom_call.1
= control target key start
LH: loop header
LB: loop body
LE: loop exit
PB: predicated region body
PF: predicated region fallthrough
CT: control target
= control target key end

     0   :  { %12 = vsyncpa [#allocation3], 0  ;;  %s10374_s0 = inlined_call_operand.hbm [shape: bf16[16,1024], index: 0, kind: input, shape index: {}]   ;;  %s10375_s1 = inlined_call_operand.hbm [shape: bf16[1024,1024], index: 1, kind: input, shape index: {}]   ;;  %s10376_s2 = inlined_call_operand.hbm [shape: f32[1,1024], index: 2, kind: input, shape index: {}]   ;;  %s10377_s3 = inlined_call_operand.hbm [shape: bf16[1024,1024], index: 3, kind: input, shape index: {}]   ;;  %s10378_s4 = inlined_call_operand.hbm [shape: f32[1,1024], index: 4, kind: input, shape index: {}]   ;;  %s10379_s5 = inlined_call_operand.hbm [shape: bf16[1024,128], index: 5, kind: input, shape index: {}]   ;;  %s10380_s6 = inlined_call_operand.hbm [shape: f32[1,128], index: 6, kind: input, shape index: {}]   ;;  %s10381_s7 = inlined_call_operand.hbm [shape: f32[16,128], index: 7, kind: output, shape index: {}]  }
   0x1   :  { %13 = vsyncpa [#allocation6], 0 }
   0x2   :  { %14 = vsyncpa [#allocation9], 0 }
   0x3   :  { %15 = vsyncpa [#allocation12], 0 }
   0x4   :  { %16 = vsyncpa [#allocation4], 0  ;;  %s9957_s24 = smov [#allocation5]   ;;  %s9958_s26 = smov [#allocation8]  }
   0x5   :  { %s34_s25 = sshll.u32 %s9957_s24, 4  ;;  %s56_s27 = sshll.u32 %s9958_s26, 4  ;;  %s35_s25 = int_to_ptr.vmem [resolvable:$true] %s34_s25  ;;  %s57_s27 = int_to_ptr.vmem [resolvable:$true] %s56_s27 }
   0x6   :  { %s9795_s28 = scalar_lea.vmem %s35_s25, 65536  ;;  %p9800_p1 = scmp.lt.s32.totalorder %s35_s25, %s35_s25 }
   0x7   :  { %p9796_p0 = scmp.ne.s32.totalorder %s35_s25, %s9795_s28  ;;  %p9801_p2 = scmp.lt.s32.totalorder %s9795_s28, %s9795_s28 }
   0x9   :  { %p9802_p3 = por %p9801_p2, %p9800_p1 }
   0xb   :  { %p9803_p4 = pnand %p9802_p3, %p9796_p0 }
   0xd   :  { %9806 = shalt.err (!%p9803_p4)
}
   0xe   :  { %s9959_s29 = smov 512   ;;  %s9960_s30 = smov 32  }
   0xf   :  { %40 = dma.hbm_to_vmem [thread:$0]  %s10375_s1, 65536, %s35_s25, [#allocation6], %s9959_s29, %s9959_s29, %s9960_s30  }
  0x10   :  { %s9815_s10 = scalar_lea.vmem %s57_s27, 65536  ;;  %p9820_p6 = scmp.lt.s32.totalorder %s57_s27, %s57_s27 }
  0x11   :  { %p9816_p5 = scmp.ne.s32.totalorder %s57_s27, %s9815_s10  ;;  %p9821_p7 = scmp.lt.s32.totalorder %s9815_s10, %s9815_s10 }
  0x13   :  { %p9822_p8 = por %p9821_p7, %p9820_p6 }
  0x15   :  { %p9823_p9 = pnand %p9822_p8, %p9816_p5 }
  0x17   :  { %9826 = shalt.err (!%p9823_p9)
}
  0x18   :  { %62 = dma.hbm_to_vmem [thread:$0]  %s10377_s3, 65536, %s57_s27, [#allocation9], %s9959_s29, %s9959_s29, %s9960_s30  }
  0x19   :  { %s9961_s13 = smov [#allocation11]  }
  0x1a   :  { %s78_s14 = sshll.u32 %s9961_s13, 4  ;;  %s79_s14 = int_to_ptr.vmem [resolvable:$true] %s78_s14 }
  0x1b   :  { %s9835_s15 = scalar_lea.vmem %s79_s14, 8192  ;;  %p9840_p11 = scmp.lt.s32.totalorder %s79_s14, %s79_s14 }
  0x1c   :  { %p9836_p10 = scmp.ne.s32.totalorder %s79_s14, %s9835_s15  ;;  %p9841_p12 = scmp.lt.s32.totalorder %s9835_s15, %s9835_s15 }
  0x1e   :  { %p9842_p13 = por %p9841_p12, %p9840_p11 }
  0x20   :  { %p9843_p0 = pnand %p9842_p13, %p9836_p10 }
  0x22   :  { %9846 = shalt.err (!%p9843_p0)
}
  0x23   :  { %s9962_s1 = smov 64   ;;  %s9963_s16 = smov 4  }
  0x24   :  { %84 = dma.hbm_to_vmem [thread:$0]  %s10379_s5, 8192, %s79_s14, [#allocation12], %s9962_s1, %s9962_s1, %s9963_s16  }
  0x25   :  { %s9964_s19 = smov [#allocation2]   ;;  %s9965_s3 = smov [#allocation7]  }
  0x26   :  { %s22_s20 = sshll.u32 %s9964_s19, 4  ;;  %s47_s21 = sshll.u32 %s9965_s3, 4  ;;  %s23_s20 = int_to_ptr.vmem [resolvable:$true] %s22_s20  ;;  %s48_s21 = int_to_ptr.vmem [resolvable:$true] %s47_s21 }
  0x27   :  { %s9855_s22 = scalar_lea.vmem %s23_s20, 1024  ;;  %p9860_p2 = scmp.lt.s32.totalorder %s23_s20, %s23_s20 }
  0x28   :  { %p9856_p1 = scmp.ne.s32.totalorder %s23_s20, %s9855_s22  ;;  %p9861_p3 = scmp.lt.s32.totalorder %s9855_s22, %s9855_s22 }
  0x2a   :  { %p9862_p4 = por %p9861_p3, %p9860_p2 }
  0x2c   :  { %p9863_p5 = pnand %p9862_p4, %p9856_p1 }
  0x2e   :  { %9866 = shalt.err (!%p9863_p5)
}
  0x2f   :  { %28 = dma.hbm_to_vmem [thread:$0]  %s10374_s0, 1024, %s23_s20, [#allocation3], %s9959_s29, %s9959_s29, %s9960_s30  }
  0x30   :  { %s9875_s5 = scalar_lea.vmem %s48_s21, 128  ;;  %p9880_p7 = scmp.lt.s32.totalorder %s48_s21, %s48_s21 }
  0x31   :  { %p9876_p6 = scmp.ne.s32.totalorder %s48_s21, %s9875_s5  ;;  %p9881_p8 = scmp.lt.s32.totalorder %s9875_s5, %s9875_s5 }
  0x33   :  { %p9882_p9 = por %p9881_p8, %p9880_p7 }
  0x35   :  { %p9883_p10 = pnand %p9882_p9, %p9876_p6 }
  0x37   :  { %9886 = shalt.err (!%p9883_p10)
}
  0x38   :  { %50 = dma.hbm_to_vmem [thread:$0]  %s10376_s2, 128, %s48_s21, [#allocation6]  }
  0x39   :  { %s9966_s27 = smov [#allocation10]   ;;  %s9967_s8 = smov [#allocation13]  }
  0x3a   :  { %s69_s28 = sshll.u32 %s9966_s27, 4  ;;  %s91_s9 = sshll.u32 %s9967_s8, 4  ;;  %s70_s28 = int_to_ptr.vmem [resolvable:$true] %s69_s28  ;;  %s92_s9 = int_to_ptr.vmem [resolvable:$true] %s91_s9 }
  0x3b   :  { %s9895_s10 = scalar_lea.vmem %s70_s28, 128  ;;  %p9900_p12 = scmp.lt.s32.totalorder %s70_s28, %s70_s28 }
  0x3c   :  { %p9896_p11 = scmp.ne.s32.totalorder %s70_s28, %s9895_s10  ;;  %p9901_p13 = scmp.lt.s32.totalorder %s9895_s10, %s9895_s10 }
  0x3e   :  { %p9902_p0 = por %p9901_p13, %p9900_p12 }
  0x40   :  { %p9903_p1 = pnand %p9902_p0, %p9896_p11 }
  0x42   :  { %9906 = shalt.err (!%p9903_p1)
}
  0x43   :  { %72 = dma.hbm_to_vmem [thread:$0]  %s10378_s4, 128, %s70_s28, [#allocation9]  }
  0x44   :  { %s9915_s30 = scalar_lea.vmem %s92_s9, 16  ;;  %s9919_s2 = scalar_lea.vmem %s92_s9, 32 }
  0x45   :  { %p9916_p2 = scmp.ne.s32.totalorder %s92_s9, %s9915_s30  ;;  %p9920_p3 = scmp.lt.s32.totalorder %s92_s9, %s92_s9 }
  0x46   :  { %p9921_p4 = scmp.lt.s32.totalorder %s9919_s2, %s9915_s30 }
  0x48   :  { %p9922_p5 = por %p9921_p4, %p9920_p3 }
  0x4a   :  { %p9923_p6 = pnand %p9922_p5, %p9916_p2 }
  0x4c   :  { %9926 = shalt.err (!%p9923_p6)
}
  0x4d   :  { %94 = dma.hbm_to_vmem [thread:$0]  %s10380_s6, 16, %s92_s9, [#allocation12]  }
  0x4e   :  { %9947 = dma.done.wait [#allocation3], 1024  }
  0x4f   :  { %9948 = vsyncadd [#allocation3], 4294966272 }
  0x50   :  { %9949 = dma.done.wait [#allocation6], 65664  }
  0x51   :  { %9950 = vsyncadd [#allocation6], 4294901632 }
  0x52   :  { %9951 = dma.done.wait [#allocation9], 65664  }
  0x53   :  { %9952 = vsyncadd [#allocation9], 4294901632 }
  0x54   :  { %9953 = dma.done.wait [#allocation12], 8208  }
  0x55   :  { %9954 = vsyncadd [#allocation12], 4294959088  ;;  %v181_v0 = vld [vmem:[#allocation5 + $0x1c0] sm:$0xff]  ;;  %v10049_v59 = vld [vmem:[#allocation2 + $0x8] sm:$0xff]  ;;  %s9968_s4 = smov [#allocation14]  }
  0x56   :  { %v185_v1 = vld [vmem:[#allocation5 + $0x1e0] sm:$0xff]  ;;  %v10051_v60 = vld [vmem:[#allocation2 + $0x28] sm:$0xff]  ;;  %s8507_s6 = sshll.u32 %s9968_s4, 4  ;;  %s8508_s6 = int_to_ptr.vmem [resolvable:$true] %s8507_s6 }
  0x57   :  { %v309_v2 = vld [vmem:[#allocation5 + $0x5c0] sm:$0xff]  ;;  %v8587_v3 = vcombine.high %v181_v0, %v185_v1  ;;  %v8586_v5 = vcombine.low %v181_v0, %v185_v1  ;;  %v10055_v63 = vcombine.high %v10049_v59, %v10051_v60  ;;  %s9927_s13 = scalar_lea.vmem %s8508_s6, 256  ;;  %p9932_p8 = scmp.lt.s32.totalorder %s8508_s6, %s8508_s6 }
  0x58   :  { %v313_v4 = vld [vmem:[#allocation5 + $0x5e0] sm:$0xff]  ;;  %p9928_p7 = scmp.ne.s32.totalorder %s8508_s6, %s9927_s13  ;;  %p9933_p9 = scmp.lt.s32.totalorder %s9927_s13, %s9927_s13 }
  0x59   :  { %v173_v6 = vld [vmem:[#allocation5 + $0x180] sm:$0xff]  ;;  %v8715_v8 = vcombine.high %v309_v2, %v313_v4  ;;  %v8714_v9 = vcombine.low %v309_v2, %v313_v4  ;;  %3279 = vmatprep.subr.bf16.mxu0 %v8587_v3  ;;  %3354 = vmatprep.mubr.bf16.mxu1 %v10055_v63 }
  0x5a   :  { %v177_v7 = vld [vmem:[#allocation5 + $0x1a0] sm:$0xff]  ;;  %3280 = vmatpush1.bf16.msra.mxu0 %v8586_v5  ;;  %p9934_p10 = por %p9933_p9, %p9932_p8 }
  0x5b   :  { %v8579_v10 = vcombine.high %v173_v6, %v177_v7  ;;  %v301_v11 = vld [vmem:[#allocation5 + $0x580] sm:$0xff]  ;;  %3322 = vmatprep.subr.bf16.mxu1 %v8715_v8  ;;  %v8578_v18 = vcombine.low %v173_v6, %v177_v7 }
  0x5c   :  { %v305_v12 = vld [vmem:[#allocation5 + $0x5a0] sm:$0xff]  ;;  %3323 = vmatpush1.bf16.msra.mxu1 %v8714_v9  ;;  %p9935_p11 = pnand %p9934_p10, %p9928_p7 }
  0x5d   :  { %v165_v13 = vld [vmem:[#allocation5 + $0x140] sm:$0xff]  ;;  %v8707_v14 = vcombine.high %v301_v11, %v305_v12  ;;  %3281 = vmatprep.subr.bf16.mxu0 %v8579_v10  ;;  %v8706_v19 = vcombine.low %v301_v11, %v305_v12 }
  0x5e   :  { %v169_v15 = vld [vmem:[#allocation5 + $0x160] sm:$0xff]  ;;  %3282 = vmatpush1.bf16.msra.mxu0 %v8578_v18 }
  0x5f   :  { %v293_v16 = vld [vmem:[#allocation5 + $0x540] sm:$0xff]  ;;  %v8571_v20 = vcombine.high %v165_v13, %v169_v15  ;;  %3324 = vmatprep.subr.bf16.mxu1 %v8707_v14  ;;  %v8570_v26 = vcombine.low %v165_v13, %v169_v15 }
  0x60   :  { %v297_v17 = vld [vmem:[#allocation5 + $0x560] sm:$0xff]  ;;  %3325 = vmatpush1.bf16.msra.mxu1 %v8706_v19 }
  0x61   :  { %v8699_v21 = vcombine.high %v293_v16, %v297_v17  ;;  %v157_v22 = vld [vmem:[#allocation5 + $0x100] sm:$0xff]  ;;  %3283 = vmatprep.subr.bf16.mxu0 %v8571_v20  ;;  %v8698_v27 = vcombine.low %v293_v16, %v297_v17 }
  0x62   :  { %v161_v23 = vld [vmem:[#allocation5 + $0x120] sm:$0xff]  ;;  %3284 = vmatpush1.bf16.msra.mxu0 %v8570_v26 }
  0x63   :  { %v285_v24 = vld [vmem:[#allocation5 + $0x500] sm:$0xff]  ;;  %v8563_v28 = vcombine.high %v157_v22, %v161_v23  ;;  %3326 = vmatprep.subr.bf16.mxu1 %v8699_v21  ;;  %v8562_v34 = vcombine.low %v157_v22, %v161_v23 }
  0x64   :  { %v289_v25 = vld [vmem:[#allocation5 + $0x520] sm:$0xff]  ;;  %3327 = vmatpush1.bf16.msra.mxu1 %v8698_v27 }
  0x65   :  { %v8691_v29 = vcombine.high %v285_v24, %v289_v25  ;;  %v149_v30 = vld [vmem:[#allocation5 + $0xc0] sm:$0xff]  ;;  %3285 = vmatprep.subr.bf16.mxu0 %v8563_v28  ;;  %v8690_v35 = vcombine.low %v285_v24, %v289_v25 }
  0x66   :  { %v153_v31 = vld [vmem:[#allocation5 + $0xe0] sm:$0xff]  ;;  %3286 = vmatpush1.bf16.msra.mxu0 %v8562_v34 }
  0x67   :  { %v277_v32 = vld [vmem:[#allocation5 + $0x4c0] sm:$0xff]  ;;  %v8555_v36 = vcombine.high %v149_v30, %v153_v31  ;;  %3328 = vmatprep.subr.bf16.mxu1 %v8691_v29  ;;  %v8554_v42 = vcombine.low %v149_v30, %v153_v31 }
  0x68   :  { %v281_v33 = vld [vmem:[#allocation5 + $0x4e0] sm:$0xff]  ;;  %3329 = vmatpush1.bf16.msra.mxu1 %v8690_v35 }
  0x69   :  { %v8683_v37 = vcombine.high %v277_v32, %v281_v33  ;;  %v141_v38 = vld [vmem:[#allocation5 + $0x80] sm:$0xff]  ;;  %3287 = vmatprep.subr.bf16.mxu0 %v8555_v36  ;;  %v8682_v43 = vcombine.low %v277_v32, %v281_v33 }
  0x6a   :  { %v145_v39 = vld [vmem:[#allocation5 + $0xa0] sm:$0xff]  ;;  %3288 = vmatpush1.bf16.msra.mxu0 %v8554_v42 }
  0x6b   :  { %v269_v40 = vld [vmem:[#allocation5 + $0x480] sm:$0xff]  ;;  %v8547_v44 = vcombine.high %v141_v38, %v145_v39  ;;  %3330 = vmatprep.subr.bf16.mxu1 %v8683_v37  ;;  %v8546_v50 = vcombine.low %v141_v38, %v145_v39 }
  0x6c   :  { %v273_v41 = vld [vmem:[#allocation5 + $0x4a0] sm:$0xff]  ;;  %3331 = vmatpush1.bf16.msra.mxu1 %v8682_v43 }
  0x6d   :  { %v8675_v45 = vcombine.high %v269_v40, %v273_v41  ;;  %v133_v46 = vld [vmem:[#allocation5 + $0x40] sm:$0xff]  ;;  %3289 = vmatprep.subr.bf16.mxu0 %v8547_v44  ;;  %v8674_v51 = vcombine.low %v269_v40, %v273_v41 }
  0x6e   :  { %v137_v47 = vld [vmem:[#allocation5 + $0x60] sm:$0xff]  ;;  %3290 = vmatpush1.bf16.msra.mxu0 %v8546_v50 }
  0x6f   :  { %v261_v48 = vld [vmem:[#allocation5 + $0x440] sm:$0xff]  ;;  %v8539_v52 = vcombine.high %v133_v46, %v137_v47  ;;  %3332 = vmatprep.subr.bf16.mxu1 %v8675_v45  ;;  %v8538_v0 = vcombine.low %v133_v46, %v137_v47 }
  0x70   :  { %v265_v49 = vld [vmem:[#allocation5 + $0x460] sm:$0xff]  ;;  %3333 = vmatpush1.bf16.msra.mxu1 %v8674_v51 }
  0x71   :  { %v125_v53 = vld [vmem:[#allocation5] sm:$0xff]  ;;  %v8667_v56 = vcombine.high %v261_v48, %v265_v49  ;;  %3291 = vmatprep.subr.bf16.mxu0 %v8539_v52  ;;  %v8666_v1 = vcombine.low %v261_v48, %v265_v49 }
  0x72   :  { %v10041_v54 = vld [vmem:[#allocation2] sm:$0xff]  ;;  %3292 = vmatpush1.bf16.msra.mxu0 %v8538_v0 }
  0x73   :  { %v10043_v55 = vld [vmem:[#allocation2 + $0x20] sm:$0xff]  ;;  %3334 = vmatprep.subr.bf16.mxu1 %v8667_v56 }
  0x74   :  { %v129_v57 = vld [vmem:[#allocation5 + $0x20] sm:$0xff]  ;;  %v10047_v58 = vcombine.high %v10041_v54, %v10043_v55  ;;  %3335 = vmatpush1.bf16.msra.mxu1 %v8666_v1 }
  0x75   :  { %v253_v61 = vld [vmem:[#allocation5 + $0x400] sm:$0xff]  ;;  %v8531_v2 = vcombine.high %v125_v53, %v129_v57  ;;  %v8530_v8 = vcombine.low %v125_v53, %v129_v57 }
  0x76   :  { %v257_v62 = vld [vmem:[#allocation5 + $0x420] sm:$0xff]  ;;  %3311 = vmatprep.mubr.bf16.mxu0 %v10047_v58 }
  0x77   :  { %v8659_v3 = vcombine.high %v253_v61, %v257_v62  ;;  %v245_v4 = vld [vmem:[#allocation5 + $0x3c0] sm:$0xff]  ;;  %3293 = vmatprep.subr.bf16.mxu0 %v8531_v2  ;;  %v8658_v9 = vcombine.low %v253_v61, %v257_v62 }
  0x78   :  { %v249_v5 = vld [vmem:[#allocation5 + $0x3e0] sm:$0xff]  ;;  %3294 = vmatpush1.bf16.msra.mxu0 %v8530_v8 }
  0x79   :  { %v373_v6 = vld [vmem:[#allocation5 + $0x7c0] sm:$0xff]  ;;  %v8651_v10 = vcombine.high %v245_v4, %v249_v5  ;;  %3336 = vmatprep.subr.bf16.mxu1 %v8659_v3  ;;  %v8650_v16 = vcombine.low %v245_v4, %v249_v5 }
  0x7a   :  { %v377_v7 = vld [vmem:[#allocation5 + $0x7e0] sm:$0xff]  ;;  %3337 = vmatpush1.bf16.msra.mxu1 %v8658_v9 }
  0x7b   :  { %v8779_v11 = vcombine.high %v373_v6, %v377_v7  ;;  %v237_v12 = vld [vmem:[#allocation5 + $0x380] sm:$0xff]  ;;  %3295 = vmatprep.subr.bf16.mxu0 %v8651_v10  ;;  %v8778_v17 = vcombine.low %v373_v6, %v377_v7 }
  0x7c   :  { %v241_v13 = vld [vmem:[#allocation5 + $0x3a0] sm:$0xff]  ;;  %3296 = vmatpush2.bf16.msra.mxu0 %v8650_v16 }
  0x7d   :  { %v365_v14 = vld [vmem:[#allocation5 + $0x780] sm:$0xff]  ;;  %v8643_v18 = vcombine.high %v237_v12, %v241_v13  ;;  %3338 = vmatprep.subr.bf16.mxu1 %v8779_v11  ;;  %v8642_v24 = vcombine.low %v237_v12, %v241_v13 }
  0x7e   :  { %v369_v15 = vld [vmem:[#allocation5 + $0x7a0] sm:$0xff]  ;;  %3339 = vmatpush2.bf16.msra.mxu1 %v8778_v17 }
  0x7f   :  { %v8771_v19 = vcombine.high %v365_v14, %v369_v15  ;;  %v229_v20 = vld [vmem:[#allocation5 + $0x340] sm:$0xff]  ;;  %3297 = vmatprep.subr.bf16.mxu0 %v8643_v18  ;;  %v8770_v25 = vcombine.low %v365_v14, %v369_v15 }
  0x80   :  { %v233_v21 = vld [vmem:[#allocation5 + $0x360] sm:$0xff]  ;;  %3298 = vmatpush2.bf16.msra.mxu0 %v8642_v24  ;;  %v10065_v24 = vld [vmem:[#allocation2 + $0x30] sm:$0xff] }
  0x81   :  { %v357_v22 = vld [vmem:[#allocation5 + $0x740] sm:$0xff]  ;;  %v8635_v26 = vcombine.high %v229_v20, %v233_v21  ;;  %3340 = vmatprep.subr.bf16.mxu1 %v8771_v19  ;;  %v8634_v32 = vcombine.low %v229_v20, %v233_v21  ;;  %v10061_v21 = vcombine.low %v10041_v54, %v10043_v55 }
  0x82   :  { %v361_v23 = vld [vmem:[#allocation5 + $0x760] sm:$0xff]  ;;  %3341 = vmatpush2.bf16.msra.mxu1 %v8770_v25  ;;  %v10069_v25 = vcombine.low %v10049_v59, %v10051_v60 }
  0x83   :  { %v8763_v27 = vcombine.high %v357_v22, %v361_v23  ;;  %v221_v28 = vld [vmem:[#allocation5 + $0x300] sm:$0xff]  ;;  %3299 = vmatprep.subr.bf16.mxu0 %v8635_v26  ;;  %v8762_v33 = vcombine.low %v357_v22, %v361_v23  ;;  %v10063_v23 = vld [vmem:[#allocation2 + $0x10] sm:$0xff] }
  0x84   :  { %v225_v29 = vld [vmem:[#allocation5 + $0x320] sm:$0xff]  ;;  %3300 = vmatpush2.bf16.msra.mxu0 %v8634_v32  ;;  %v10077_v32 = vcombine.high %v10063_v23, %v10065_v24 }
  0x85   :  { %v349_v30 = vld [vmem:[#allocation5 + $0x700] sm:$0xff]  ;;  %v8627_v34 = vcombine.high %v221_v28, %v225_v29  ;;  %3342 = vmatprep.subr.bf16.mxu1 %v8763_v27  ;;  %v8626_v40 = vcombine.low %v221_v28, %v225_v29  ;;  %v10071_v27 = vld [vmem:[#allocation2 + $0x18] sm:$0xff] }
  0x86   :  { %v353_v31 = vld [vmem:[#allocation5 + $0x720] sm:$0xff]  ;;  %3343 = vmatpush2.bf16.msra.mxu1 %v8762_v33  ;;  %v10073_v28 = vld [vmem:[#allocation2 + $0x38] sm:$0xff] }
  0x87   :  { %v8755_v35 = vcombine.high %v349_v30, %v353_v31  ;;  %v213_v36 = vld [vmem:[#allocation5 + $0x2c0] sm:$0xff]  ;;  %3301 = vmatprep.subr.bf16.mxu0 %v8627_v34  ;;  %v8754_v41 = vcombine.low %v349_v30, %v353_v31  ;;  %v10082_v33 = vcombine.high %v10071_v27, %v10073_v28 }
  0x88   :  { %v217_v37 = vld [vmem:[#allocation5 + $0x2e0] sm:$0xff]  ;;  %3302 = vmatpush2.bf16.msra.mxu0 %v8626_v40 }
  0x89   :  { %v341_v38 = vld [vmem:[#allocation5 + $0x6c0] sm:$0xff]  ;;  %v8619_v42 = vcombine.high %v213_v36, %v217_v37  ;;  %3344 = vmatprep.subr.bf16.mxu1 %v8755_v35  ;;  %v8618_v48 = vcombine.low %v213_v36, %v217_v37 }
  0x8a   :  { %v345_v39 = vld [vmem:[#allocation5 + $0x6e0] sm:$0xff]  ;;  %3345 = vmatpush2.bf16.msra.mxu1 %v8754_v41 }
  0x8b   :  { %v8747_v43 = vcombine.high %v341_v38, %v345_v39  ;;  %v205_v44 = vld [vmem:[#allocation5 + $0x280] sm:$0xff]  ;;  %3303 = vmatprep.subr.bf16.mxu0 %v8619_v42  ;;  %v8746_v49 = vcombine.low %v341_v38, %v345_v39 }
  0x8c   :  { %v209_v45 = vld [vmem:[#allocation5 + $0x2a0] sm:$0xff]  ;;  %3304 = vmatpush2.bf16.msra.mxu0 %v8618_v48 }
  0x8d   :  { %v333_v46 = vld [vmem:[#allocation5 + $0x680] sm:$0xff]  ;;  %v8611_v50 = vcombine.high %v205_v44, %v209_v45  ;;  %3346 = vmatprep.subr.bf16.mxu1 %v8747_v43  ;;  %v8610_v61 = vcombine.low %v205_v44, %v209_v45 }
  0x8e   :  { %v337_v47 = vld [vmem:[#allocation5 + $0x6a0] sm:$0xff]  ;;  %3347 = vmatpush2.bf16.msra.mxu1 %v8746_v49 }
  0x8f   :  { %v8739_v51 = vcombine.high %v333_v46, %v337_v47  ;;  %v197_v52 = vld [vmem:[#allocation5 + $0x240] sm:$0xff]  ;;  %3305 = vmatprep.subr.bf16.mxu0 %v8611_v50  ;;  %v8738_v62 = vcombine.low %v333_v46, %v337_v47 }
  0x90   :  { %v201_v53 = vld [vmem:[#allocation5 + $0x260] sm:$0xff]  ;;  %3306 = vmatpush2.bf16.msra.mxu0 %v8610_v61 }
  0x91   :  { %v325_v56 = vld [vmem:[#allocation5 + $0x640] sm:$0xff]  ;;  %v8603_v0 = vcombine.high %v197_v52, %v201_v53  ;;  %3348 = vmatprep.subr.bf16.mxu1 %v8739_v51  ;;  %v8602_v6 = vcombine.low %v197_v52, %v201_v53 }
  0x92   :  { %v329_v57 = vld [vmem:[#allocation5 + $0x660] sm:$0xff]  ;;  %3349 = vmatpush2.bf16.msra.mxu1 %v8738_v62 }
  0x93   :  { %v8731_v1 = vcombine.high %v325_v56, %v329_v57  ;;  %v189_v2 = vld [vmem:[#allocation5 + $0x200] sm:$0xff]  ;;  %3307 = vmatprep.subr.bf16.mxu0 %v8603_v0  ;;  %v8730_v7 = vcombine.low %v325_v56, %v329_v57 }
  0x94   :  { %v193_v3 = vld [vmem:[#allocation5 + $0x220] sm:$0xff]  ;;  %3308 = vmatpush2.bf16.msra.mxu0 %v8602_v6 }
  0x95   :  { %v317_v4 = vld [vmem:[#allocation5 + $0x600] sm:$0xff]  ;;  %v8595_v8 = vcombine.high %v189_v2, %v193_v3  ;;  %3350 = vmatprep.subr.bf16.mxu1 %v8731_v1  ;;  %v8594_v14 = vcombine.low %v189_v2, %v193_v3 }
  0x96   :  { %v321_v5 = vld [vmem:[#allocation5 + $0x620] sm:$0xff]  ;;  %3351 = vmatpush2.bf16.msra.mxu1 %v8730_v7 }
  0x97   :  { %v8723_v9 = vcombine.high %v317_v4, %v321_v5  ;;  %v437_v10 = vld [vmem:[#allocation5 + $0x9c0] sm:$0xff]  ;;  %3309 = vmatprep.subr.bf16.mxu0 %v8595_v8  ;;  %v8722_v15 = vcombine.low %v317_v4, %v321_v5 }
  0x98   :  { %v441_v11 = vld [vmem:[#allocation5 + $0x9e0] sm:$0xff]  ;;  %3310 = vmatpush2.bf16.msra.mxu0 %v8594_v14 }
  0x99   :  { %v565_v12 = vld [vmem:[#allocation5 + $0xdc0] sm:$0xff]  ;;  %v8843_v16 = vcombine.high %v437_v10, %v441_v11  ;;  %3352 = vmatprep.subr.bf16.mxu1 %v8723_v9  ;;  %v8842_v26 = vcombine.low %v437_v10, %v441_v11 }
  0x9a   :  { %v569_v13 = vld [vmem:[#allocation5 + $0xde0] sm:$0xff]  ;;  %3353 = vmatpush2.bf16.msra.mxu1 %v8722_v15 }
  0x9b   :  { %v8971_v17 = vcombine.high %v565_v12, %v569_v13  ;;  %v429_v18 = vld [vmem:[#allocation5 + $0x980] sm:$0xff]  ;;  %3365 = vmatprep.subr.bf16.mxu0 %v8843_v16  ;;  %v8970_v29 = vcombine.low %v565_v12, %v569_v13  ;;  %3312 = vmatmul.mubr.bf16.vlgmr.msra.gmra.mxu0 %v10061_v21 }
  0x9c   :  { %v433_v19 = vld [vmem:[#allocation5 + $0x9a0] sm:$0xff]  ;;  %3366 = vmatpush1.bf16.msra.mxu0 %v8842_v26  ;;  %3397 = vmatprep.mubr.bf16.mxu0 %v10077_v32 }
  0x9d   :  { %v557_v20 = vld [vmem:[#allocation5 + $0xd80] sm:$0xff]  ;;  %v8835_v54 = vcombine.high %v429_v18, %v433_v19  ;;  %3408 = vmatprep.subr.bf16.mxu1 %v8971_v17  ;;  %3355 = vmatmul.mubr.bf16.vlgmr.msra.gmra.mxu1 %v10069_v25  ;;  %v8834_v34 = vcombine.low %v429_v18, %v433_v19 }
  0x9e   :  { %v561_v22 = vld [vmem:[#allocation5 + $0xda0] sm:$0xff]  ;;  %3409 = vmatpush1.bf16.msra.mxu1 %v8970_v29  ;;  %3440 = vmatprep.mubr.bf16.mxu1 %v10082_v33 }
  0x9f   :  { %v8963_v55 = vcombine.high %v557_v20, %v561_v22  ;;  %v421_v30 = vld [vmem:[#allocation5 + $0x940] sm:$0xff]  ;;  %3367 = vmatprep.subr.bf16.mxu0 %v8835_v54  ;;  %v8962_v35 = vcombine.low %v557_v20, %v561_v22 }
  0xa0   :  { %v425_v31 = vld [vmem:[#allocation5 + $0x960] sm:$0xff]  ;;  %3368 = vmatpush1.bf16.msra.mxu0 %v8834_v34 }
  0xa1   :  { %v549_v59 = vld [vmem:[#allocation5 + $0xd40] sm:$0xff]  ;;  %v8827_v36 = vcombine.high %v421_v30, %v425_v31  ;;  %3410 = vmatprep.subr.bf16.mxu1 %v8963_v55  ;;  %v8826_v42 = vcombine.low %v421_v30, %v425_v31 }
  0xa2   :  { %v553_v60 = vld [vmem:[#allocation5 + $0xd60] sm:$0xff]  ;;  %3411 = vmatpush1.bf16.msra.mxu1 %v8962_v35 }
  0xa3   :  { %v413_v37 = vld [vmem:[#allocation5 + $0x900] sm:$0xff]  ;;  %v8955_v40 = vcombine.high %v549_v59, %v553_v60  ;;  %3369 = vmatprep.subr.bf16.mxu0 %v8827_v36  ;;  %v8954_v43 = vcombine.low %v549_v59, %v553_v60 }
  0xa4   :  { %v417_v38 = vld [vmem:[#allocation5 + $0x920] sm:$0xff]  ;;  %3370 = vmatpush1.bf16.msra.mxu0 %v8826_v42 }
  0xa5   :  { %v541_v39 = vld [vmem:[#allocation5 + $0xd00] sm:$0xff]  ;;  %v8819_v44 = vcombine.high %v413_v37, %v417_v38  ;;  %3412 = vmatprep.subr.bf16.mxu1 %v8955_v40  ;;  %v8818_v50 = vcombine.low %v413_v37, %v417_v38 }
  0xa6   :  { %v545_v41 = vld [vmem:[#allocation5 + $0xd20] sm:$0xff]  ;;  %3413 = vmatpush1.bf16.msra.mxu1 %v8954_v43 }
  0xa7   :  { %v405_v45 = vld [vmem:[#allocation5 + $0x8c0] sm:$0xff]  ;;  %v8947_v48 = vcombine.high %v541_v39, %v545_v41  ;;  %3371 = vmatprep.subr.bf16.mxu0 %v8819_v44  ;;  %v8946_v51 = vcombine.low %v541_v39, %v545_v41 }
  0xa8   :  { %v409_v46 = vld [vmem:[#allocation5 + $0x8e0] sm:$0xff]  ;;  %3372 = vmatpush1.bf16.msra.mxu0 %v8818_v50 }
  0xa9   :  { %v533_v47 = vld [vmem:[#allocation5 + $0xcc0] sm:$0xff]  ;;  %v8811_v52 = vcombine.high %v405_v45, %v409_v46  ;;  %3414 = vmatprep.subr.bf16.mxu1 %v8947_v48  ;;  %v8810_v0 = vcombine.low %v405_v45, %v409_v46 }
  0xaa   :  { %v537_v49 = vld [vmem:[#allocation5 + $0xce0] sm:$0xff]  ;;  %3415 = vmatpush1.bf16.msra.mxu1 %v8946_v51 }
  0xab   :  { %v397_v53 = vld [vmem:[#allocation5 + $0x880] sm:$0xff]  ;;  %v8939_v61 = vcombine.high %v533_v47, %v537_v49  ;;  %3373 = vmatprep.subr.bf16.mxu0 %v8811_v52  ;;  %v8938_v1 = vcombine.low %v533_v47, %v537_v49 }
  0xac   :  { %v401_v56 = vld [vmem:[#allocation5 + $0x8a0] sm:$0xff]  ;;  %3374 = vmatpush1.bf16.msra.mxu0 %v8810_v0 }
  0xad   :  { %v525_v57 = vld [vmem:[#allocation5 + $0xc80] sm:$0xff]  ;;  %v8803_v2 = vcombine.high %v397_v53, %v401_v56  ;;  %3416 = vmatprep.subr.bf16.mxu1 %v8939_v61  ;;  %v8802_v8 = vcombine.low %v397_v53, %v401_v56 }
  0xae   :  { %v529_v62 = vld [vmem:[#allocation5 + $0xca0] sm:$0xff]  ;;  %3417 = vmatpush1.bf16.msra.mxu1 %v8938_v1 }
  0xaf   :  { %v389_v3 = vld [vmem:[#allocation5 + $0x840] sm:$0xff]  ;;  %v8931_v6 = vcombine.high %v525_v57, %v529_v62  ;;  %3375 = vmatprep.subr.bf16.mxu0 %v8803_v2  ;;  %v8930_v9 = vcombine.low %v525_v57, %v529_v62 }
  0xb0   :  { %v393_v4 = vld [vmem:[#allocation5 + $0x860] sm:$0xff]  ;;  %3376 = vmatpush1.bf16.msra.mxu0 %v8802_v8 }
  0xb1   :  { %v517_v5 = vld [vmem:[#allocation5 + $0xc40] sm:$0xff]  ;;  %v8795_v10 = vcombine.high %v389_v3, %v393_v4  ;;  %3418 = vmatprep.subr.bf16.mxu1 %v8931_v6  ;;  %v8794_v16 = vcombine.low %v389_v3, %v393_v4 }
  0xb2   :  { %v521_v7 = vld [vmem:[#allocation5 + $0xc60] sm:$0xff]  ;;  %3419 = vmatpush1.bf16.msra.mxu1 %v8930_v9 }
  0xb3   :  { %v381_v11 = vld [vmem:[#allocation5 + $0x800] sm:$0xff]  ;;  %v8923_v14 = vcombine.high %v517_v5, %v521_v7  ;;  %3377 = vmatprep.subr.bf16.mxu0 %v8795_v10  ;;  %v8922_v17 = vcombine.low %v517_v5, %v521_v7 }
  0xb4   :  { %v385_v12 = vld [vmem:[#allocation5 + $0x820] sm:$0xff]  ;;  %3378 = vmatpush1.bf16.msra.mxu0 %v8794_v16 }
  0xb5   :  { %v509_v13 = vld [vmem:[#allocation5 + $0xc00] sm:$0xff]  ;;  %v8787_v18 = vcombine.high %v381_v11, %v385_v12  ;;  %3420 = vmatprep.subr.bf16.mxu1 %v8923_v14  ;;  %v8786_v54 = vcombine.low %v381_v11, %v385_v12 }
  0xb6   :  { %v513_v15 = vld [vmem:[#allocation5 + $0xc20] sm:$0xff]  ;;  %3421 = vmatpush1.bf16.msra.mxu1 %v8922_v17 }
  0xb7   :  { %v501_v19 = vld [vmem:[#allocation5 + $0xbc0] sm:$0xff]  ;;  %v8915_v26 = vcombine.high %v509_v13, %v513_v15  ;;  %3379 = vmatprep.subr.bf16.mxu0 %v8787_v18  ;;  %v8914_v55 = vcombine.low %v509_v13, %v513_v15 }
  0xb8   :  { %v505_v20 = vld [vmem:[#allocation5 + $0xbe0] sm:$0xff]  ;;  %3380 = vmatpush1.bf16.msra.mxu0 %v8786_v54 }
  0xb9   :  { %v629_v22 = vld [vmem:[#allocation5 + $0xfc0] sm:$0xff]  ;;  %v8907_v30 = vcombine.high %v501_v19, %v505_v20  ;;  %3422 = vmatprep.subr.bf16.mxu1 %v8915_v26  ;;  %v8906_v36 = vcombine.low %v501_v19, %v505_v20 }
  0xba   :  { %v633_v29 = vld [vmem:[#allocation5 + $0xfe0] sm:$0xff]  ;;  %3423 = vmatpush1.bf16.msra.mxu1 %v8914_v55 }
  0xbb   :  { %v493_v31 = vld [vmem:[#allocation5 + $0xb80] sm:$0xff]  ;;  %v9035_v34 = vcombine.high %v629_v22, %v633_v29  ;;  %3381 = vmatprep.subr.bf16.mxu0 %v8907_v30  ;;  %v9034_v37 = vcombine.low %v629_v22, %v633_v29 }
  0xbc   :  { %v497_v59 = vld [vmem:[#allocation5 + $0xba0] sm:$0xff]  ;;  %3382 = vmatpush2.bf16.msra.mxu0 %v8906_v36 }
  0xbd   :  { %v621_v60 = vld [vmem:[#allocation5 + $0xf80] sm:$0xff]  ;;  %v8899_v38 = vcombine.high %v493_v31, %v497_v59  ;;  %3424 = vmatprep.subr.bf16.mxu1 %v9035_v34  ;;  %v8898_v44 = vcombine.low %v493_v31, %v497_v59  ;;  %v186_v34 = vld [vmem:[#allocation5 + $0x1e8] sm:$0xff] }
  0xbe   :  { %v625_v35 = vld [vmem:[#allocation5 + $0xfa0] sm:$0xff]  ;;  %3425 = vmatpush2.bf16.msra.mxu1 %v9034_v37  ;;  %v314_v37 = vld [vmem:[#allocation5 + $0x5e8] sm:$0xff] }
  0xbf   :  { %v485_v39 = vld [vmem:[#allocation5 + $0xb40] sm:$0xff]  ;;  %v9027_v42 = vcombine.high %v621_v60, %v625_v35  ;;  %3383 = vmatprep.subr.bf16.mxu0 %v8899_v38  ;;  %v9026_v45 = vcombine.low %v621_v60, %v625_v35  ;;  %v182_v60 = vld [vmem:[#allocation5 + $0x1c8] sm:$0xff] }
  0xc0   :  { %v489_v40 = vld [vmem:[#allocation5 + $0xb60] sm:$0xff]  ;;  %3384 = vmatpush2.bf16.msra.mxu0 %v8898_v44  ;;  %v310_v35 = vld [vmem:[#allocation5 + $0x5c8] sm:$0xff] }
  0xc1   :  { %v613_v41 = vld [vmem:[#allocation5 + $0xf40] sm:$0xff]  ;;  %v8891_v46 = vcombine.high %v485_v39, %v489_v40  ;;  %3426 = vmatprep.subr.bf16.mxu1 %v9027_v42  ;;  %v8890_v52 = vcombine.low %v485_v39, %v489_v40  ;;  %v8589_v40 = vcombine.high %v182_v60, %v186_v34  ;;  %v178_v42 = vld [vmem:[#allocation5 + $0x1a8] sm:$0xff]  ;;  %v8717_v44 = vcombine.high %v310_v35, %v314_v37 }
  0xc2   :  { %v617_v43 = vld [vmem:[#allocation5 + $0xf60] sm:$0xff]  ;;  %3427 = vmatpush2.bf16.msra.mxu1 %v9026_v45  ;;  %v306_v45 = vld [vmem:[#allocation5 + $0x5a8] sm:$0xff] }
  0xc3   :  { %v477_v47 = vld [vmem:[#allocation5 + $0xb00] sm:$0xff]  ;;  %v9019_v50 = vcombine.high %v613_v41, %v617_v43  ;;  %3385 = vmatprep.subr.bf16.mxu0 %v8891_v46  ;;  %v9018_v53 = vcombine.low %v613_v41, %v617_v43  ;;  %v174_v41 = vld [vmem:[#allocation5 + $0x188] sm:$0xff]  ;;  %v10089_v46 = vcombine.low %v10063_v23, %v10065_v24 }
  0xc4   :  { %v481_v48 = vld [vmem:[#allocation5 + $0xb20] sm:$0xff]  ;;  %3386 = vmatpush2.bf16.msra.mxu0 %v8890_v52  ;;  %v302_v43 = vld [vmem:[#allocation5 + $0x588] sm:$0xff]  ;;  %v8580_v23 = vcombine.low %v174_v41, %v178_v42 }
  0xc5   :  { %v605_v49 = vld [vmem:[#allocation5 + $0xf00] sm:$0xff]  ;;  %v8883_v56 = vcombine.high %v477_v47, %v481_v48  ;;  %3428 = vmatprep.subr.bf16.mxu1 %v9019_v50  ;;  %v8882_v2 = vcombine.low %v477_v47, %v481_v48  ;;  %v10093_v47 = vcombine.low %v10071_v27, %v10073_v28  ;;  %v8588_v48 = vcombine.low %v182_v60, %v186_v34  ;;  %v126_v34 = vld [vmem:[#allocation5 + $0x8] sm:$0xff] }
  0xc6   :  { %v609_v51 = vld [vmem:[#allocation5 + $0xf20] sm:$0xff]  ;;  %3429 = vmatpush2.bf16.msra.mxu1 %v9018_v53  ;;  %v8581_v50 = vcombine.high %v174_v41, %v178_v42  ;;  %v8709_v52 = vcombine.high %v302_v43, %v306_v45  ;;  %v170_v53 = vld [vmem:[#allocation5 + $0x168] sm:$0xff]  ;;  %v8708_v24 = vcombine.low %v302_v43, %v306_v45 }
  0xc7   :  { %v469_v57 = vld [vmem:[#allocation5 + $0xac0] sm:$0xff]  ;;  %v9011_v0 = vcombine.high %v605_v49, %v609_v51  ;;  %3387 = vmatprep.subr.bf16.mxu0 %v8883_v56  ;;  %v9010_v3 = vcombine.low %v605_v49, %v609_v51  ;;  %v8716_v49 = vcombine.low %v310_v35, %v314_v37  ;;  %v166_v51 = vld [vmem:[#allocation5 + $0x148] sm:$0xff] }
  0xc8   :  { %v473_v61 = vld [vmem:[#allocation5 + $0xae0] sm:$0xff]  ;;  %3388 = vmatpush2.bf16.msra.mxu0 %v8882_v2  ;;  %v294_v56 = vld [vmem:[#allocation5 + $0x548] sm:$0xff]  ;;  %v8573_v27 = vcombine.high %v166_v51, %v170_v53  ;;  %v8572_v2 = vcombine.low %v166_v51, %v170_v53 }
  0xc9   :  { %v597_v62 = vld [vmem:[#allocation5 + $0xec0] sm:$0xff]  ;;  %v8875_v4 = vcombine.high %v469_v57, %v473_v61  ;;  %3430 = vmatprep.subr.bf16.mxu1 %v9011_v0  ;;  %v8874_v10 = vcombine.low %v469_v57, %v473_v61  ;;  %v298_v57 = vld [vmem:[#allocation5 + $0x568] sm:$0xff] }
  0xca   :  { %v601_v1 = vld [vmem:[#allocation5 + $0xee0] sm:$0xff]  ;;  %3431 = vmatpush2.bf16.msra.mxu1 %v9010_v3  ;;  %v8701_v28 = vcombine.high %v294_v56, %v298_v57  ;;  %v158_v61 = vld [vmem:[#allocation5 + $0x108] sm:$0xff]  ;;  %v8700_v3 = vcombine.low %v294_v56, %v298_v57 }
  0xcb   :  { %v461_v5 = vld [vmem:[#allocation5 + $0xa80] sm:$0xff]  ;;  %v9003_v8 = vcombine.high %v597_v62, %v601_v1  ;;  %3389 = vmatprep.subr.bf16.mxu0 %v8875_v4  ;;  %v9002_v11 = vcombine.low %v597_v62, %v601_v1  ;;  %v162_v62 = vld [vmem:[#allocation5 + $0x128] sm:$0xff] }
  0xcc   :  { %v465_v6 = vld [vmem:[#allocation5 + $0xaa0] sm:$0xff]  ;;  %3390 = vmatpush2.bf16.msra.mxu0 %v8874_v10  ;;  %v286_v0 = vld [vmem:[#allocation5 + $0x508] sm:$0xff]  ;;  %v8565_v4 = vcombine.high %v158_v61, %v162_v62  ;;  %v8564_v10 = vcombine.low %v158_v61, %v162_v62 }
  0xcd   :  { %v589_v7 = vld [vmem:[#allocation5 + $0xe80] sm:$0xff]  ;;  %v8867_v12 = vcombine.high %v461_v5, %v465_v6  ;;  %3432 = vmatprep.subr.bf16.mxu1 %v9003_v8  ;;  %v8866_v18 = vcombine.low %v461_v5, %v465_v6  ;;  %v290_v1 = vld [vmem:[#allocation5 + $0x528] sm:$0xff] }
  0xce   :  { %v593_v9 = vld [vmem:[#allocation5 + $0xea0] sm:$0xff]  ;;  %3433 = vmatpush2.bf16.msra.mxu1 %v9002_v11  ;;  %v8693_v5 = vcombine.high %v286_v0, %v290_v1  ;;  %v150_v6 = vld [vmem:[#allocation5 + $0xc8] sm:$0xff]  ;;  %v8692_v11 = vcombine.low %v286_v0, %v290_v1 }
  0xcf   :  { %v453_v13 = vld [vmem:[#allocation5 + $0xa40] sm:$0xff]  ;;  %v8995_v16 = vcombine.high %v589_v7, %v593_v9  ;;  %3391 = vmatprep.subr.bf16.mxu0 %v8867_v12  ;;  %v8994_v19 = vcombine.low %v589_v7, %v593_v9  ;;  %v154_v7 = vld [vmem:[#allocation5 + $0xe8] sm:$0xff] }
  0xd0   :  { %v457_v14 = vld [vmem:[#allocation5 + $0xa60] sm:$0xff]  ;;  %3392 = vmatpush2.bf16.msra.mxu0 %v8866_v18  ;;  %v278_v8 = vld [vmem:[#allocation5 + $0x4c8] sm:$0xff]  ;;  %v8557_v12 = vcombine.high %v150_v6, %v154_v7  ;;  %v8556_v18 = vcombine.low %v150_v6, %v154_v7 }
  0xd1   :  { %v581_v15 = vld [vmem:[#allocation5 + $0xe40] sm:$0xff]  ;;  %v8859_v20 = vcombine.high %v453_v13, %v457_v14  ;;  %3434 = vmatprep.subr.bf16.mxu1 %v8995_v16  ;;  %v8858_v30 = vcombine.low %v453_v13, %v457_v14  ;;  %v282_v9 = vld [vmem:[#allocation5 + $0x4e8] sm:$0xff] }
  0xd2   :  { %v585_v17 = vld [vmem:[#allocation5 + $0xe60] sm:$0xff]  ;;  %3435 = vmatpush2.bf16.msra.mxu1 %v8994_v19  ;;  %v8685_v13 = vcombine.high %v278_v8, %v282_v9  ;;  %v142_v14 = vld [vmem:[#allocation5 + $0x88] sm:$0xff]  ;;  %v8684_v19 = vcombine.low %v278_v8, %v282_v9 }
  0xd3   :  { %v445_v22 = vld [vmem:[#allocation5 + $0xa00] sm:$0xff]  ;;  %v8987_v54 = vcombine.high %v581_v15, %v585_v17  ;;  %3393 = vmatprep.subr.bf16.mxu0 %v8859_v20  ;;  %v8986_v31 = vcombine.low %v581_v15, %v585_v17  ;;  %v146_v15 = vld [vmem:[#allocation5 + $0xa8] sm:$0xff] }
  0xd4   :  { %v449_v26 = vld [vmem:[#allocation5 + $0xa20] sm:$0xff]  ;;  %3394 = vmatpush2.bf16.msra.mxu0 %v8858_v30  ;;  %v270_v16 = vld [vmem:[#allocation5 + $0x488] sm:$0xff]  ;;  %v8549_v20 = vcombine.high %v142_v14, %v146_v15  ;;  %v8548_v30 = vcombine.low %v142_v14, %v146_v15 }
  0xd5   :  { %v573_v29 = vld [vmem:[#allocation5 + $0xe00] sm:$0xff]  ;;  %v8851_v59 = vcombine.high %v445_v22, %v449_v26  ;;  %3436 = vmatprep.subr.bf16.mxu1 %v8987_v54  ;;  %v8850_v38 = vcombine.low %v445_v22, %v449_v26  ;;  %v274_v17 = vld [vmem:[#allocation5 + $0x4a8] sm:$0xff] }
  0xd6   :  { %v577_v55 = vld [vmem:[#allocation5 + $0xe20] sm:$0xff]  ;;  %3437 = vmatpush2.bf16.msra.mxu1 %v8986_v31  ;;  %v8677_v22 = vcombine.high %v270_v16, %v274_v17  ;;  %v134_v26 = vld [vmem:[#allocation5 + $0x48] sm:$0xff]  ;;  %v8676_v31 = vcombine.low %v270_v16, %v274_v17 }
  0xd7   :  { %v8979_v36 = vcombine.high %v573_v29, %v577_v55  ;;  %3395 = vmatprep.subr.bf16.mxu0 %v8851_v59  ;;  %v8978_v39 = vcombine.low %v573_v29, %v577_v55  ;;  %v138_v29 = vld [vmem:[#allocation5 + $0x68] sm:$0xff] }
  0xd8   :  { %3396 = vmatpush2.bf16.msra.mxu0 %v8850_v38  ;;  %v262_v54 = vld [vmem:[#allocation5 + $0x448] sm:$0xff]  ;;  %v8541_v59 = vcombine.high %v134_v26, %v138_v29  ;;  %v8540_v38 = vcombine.low %v134_v26, %v138_v29 }
  0xd9   :  { %3438 = vmatprep.subr.bf16.mxu1 %v8979_v36  ;;  %3451 = vmatprep.subr.bf16.mxu0 %v8589_v40  ;;  %v266_v55 = vld [vmem:[#allocation5 + $0x468] sm:$0xff] }
  0xda   :  { %3439 = vmatpush2.bf16.msra.mxu1 %v8978_v39  ;;  %v8669_v60 = vcombine.high %v262_v54, %v266_v55  ;;  %v130_v35 = vld [vmem:[#allocation5 + $0x28] sm:$0xff]  ;;  %v8668_v39 = vcombine.low %v262_v54, %v266_v55 }
  0xdb   :  { %3494 = vmatprep.subr.bf16.mxu1 %v8717_v44  ;;  %3398 = vmatmul.mubr.bf16.vlgmr.msra.gmra.mxu0 %v10089_v46  ;;  %v254_v36 = vld [vmem:[#allocation5 + $0x408] sm:$0xff]  ;;  %v8533_v40 = vcombine.high %v126_v34, %v130_v35 }
  0xdc   :  { %3452 = vmatpush1.bf16.msra.mxu0 %v8588_v48  ;;  %3483 = vmatprep.mubr.bf16.mxu0 %v10047_v58  ;;  %v258_v37 = vld [vmem:[#allocation5 + $0x428] sm:$0xff]  ;;  %v8532_v48 = vcombine.low %v126_v34, %v130_v35 }
  0xdd   :  { %3441 = vmatmul.mubr.bf16.vlgmr.msra.gmra.mxu1 %v10093_v47  ;;  %3453 = vmatprep.subr.bf16.mxu0 %v8581_v50  ;;  %v8661_v41 = vcombine.high %v254_v36, %v258_v37  ;;  %v246_v42 = vld [vmem:[#allocation5 + $0x3c8] sm:$0xff] }
  0xde   :  { %3495 = vmatpush1.bf16.msra.mxu1 %v8716_v49  ;;  %3526 = vmatprep.mubr.bf16.mxu1 %v10055_v63  ;;  %v250_v43 = vld [vmem:[#allocation5 + $0x3e8] sm:$0xff]  ;;  %v8660_v49 = vcombine.low %v254_v36, %v258_v37 }
  0xdf   :  { %3496 = vmatprep.subr.bf16.mxu1 %v8709_v52  ;;  %v374_v44 = vld [vmem:[#allocation5 + $0x7c8] sm:$0xff]  ;;  %v8653_v50 = vcombine.high %v246_v42, %v250_v43 }
  0xe0   :  { %3454 = vmatpush1.bf16.msra.mxu0 %v8580_v23  ;;  %v378_v45 = vld [vmem:[#allocation5 + $0x7e8] sm:$0xff]  ;;  %v8652_v23 = vcombine.low %v246_v42, %v250_v43 }
  0xe1   :  { %3455 = vmatprep.subr.bf16.mxu0 %v8573_v27  ;;  %v8781_v51 = vcombine.high %v374_v44, %v378_v45  ;;  %v238_v52 = vld [vmem:[#allocation5 + $0x388] sm:$0xff] }
  0xe2   :  { %3497 = vmatpush1.bf16.msra.mxu1 %v8708_v24  ;;  %v242_v53 = vld [vmem:[#allocation5 + $0x3a8] sm:$0xff]  ;;  %v8780_v24 = vcombine.low %v374_v44, %v378_v45 }
  0xe3   :  { %3498 = vmatprep.subr.bf16.mxu1 %v8701_v28  ;;  %v366_v56 = vld [vmem:[#allocation5 + $0x788] sm:$0xff]  ;;  %v8645_v27 = vcombine.high %v238_v52, %v242_v53 }
  0xe4   :  { %3456 = vmatpush1.bf16.msra.mxu0 %v8572_v2  ;;  %v370_v57 = vld [vmem:[#allocation5 + $0x7a8] sm:$0xff]  ;;  %v8644_v2 = vcombine.low %v238_v52, %v242_v53 }
  0xe5   :  { %3457 = vmatprep.subr.bf16.mxu0 %v8565_v4  ;;  %v8773_v28 = vcombine.high %v366_v56, %v370_v57  ;;  %v230_v61 = vld [vmem:[#allocation5 + $0x348] sm:$0xff] }
  0xe6   :  { %3499 = vmatpush1.bf16.msra.mxu1 %v8700_v3  ;;  %v234_v62 = vld [vmem:[#allocation5 + $0x368] sm:$0xff]  ;;  %v8772_v3 = vcombine.low %v366_v56, %v370_v57 }
  0xe7   :  { %3500 = vmatprep.subr.bf16.mxu1 %v8693_v5  ;;  %v358_v0 = vld [vmem:[#allocation5 + $0x748] sm:$0xff]  ;;  %v8637_v4 = vcombine.high %v230_v61, %v234_v62 }
  0xe8   :  { %3458 = vmatpush1.bf16.msra.mxu0 %v8564_v10  ;;  %v362_v1 = vld [vmem:[#allocation5 + $0x768] sm:$0xff]  ;;  %v8636_v10 = vcombine.low %v230_v61, %v234_v62 }
  0xe9   :  { %3459 = vmatprep.subr.bf16.mxu0 %v8557_v12  ;;  %v8765_v5 = vcombine.high %v358_v0, %v362_v1  ;;  %v222_v6 = vld [vmem:[#allocation5 + $0x308] sm:$0xff] }
  0xea   :  { %3501 = vmatpush1.bf16.msra.mxu1 %v8692_v11  ;;  %v226_v7 = vld [vmem:[#allocation5 + $0x328] sm:$0xff]  ;;  %v8764_v11 = vcombine.low %v358_v0, %v362_v1 }
  0xeb   :  { %3502 = vmatprep.subr.bf16.mxu1 %v8685_v13  ;;  %v350_v8 = vld [vmem:[#allocation5 + $0x708] sm:$0xff]  ;;  %v8629_v12 = vcombine.high %v222_v6, %v226_v7 }
  0xec   :  { %3460 = vmatpush1.bf16.msra.mxu0 %v8556_v18  ;;  %v354_v9 = vld [vmem:[#allocation5 + $0x728] sm:$0xff]  ;;  %v8628_v18 = vcombine.low %v222_v6, %v226_v7 }
  0xed   :  { %3461 = vmatprep.subr.bf16.mxu0 %v8549_v20  ;;  %v8757_v13 = vcombine.high %v350_v8, %v354_v9  ;;  %v214_v14 = vld [vmem:[#allocation5 + $0x2c8] sm:$0xff] }
  0xee   :  { %3503 = vmatpush1.bf16.msra.mxu1 %v8684_v19  ;;  %v218_v15 = vld [vmem:[#allocation5 + $0x2e8] sm:$0xff]  ;;  %v8756_v19 = vcombine.low %v350_v8, %v354_v9 }
  0xef   :  { %3504 = vmatprep.subr.bf16.mxu1 %v8677_v22  ;;  %v342_v16 = vld [vmem:[#allocation5 + $0x6c8] sm:$0xff]  ;;  %v8621_v20 = vcombine.high %v214_v14, %v218_v15 }
  0xf0   :  { %3462 = vmatpush1.bf16.msra.mxu0 %v8548_v30  ;;  %v346_v17 = vld [vmem:[#allocation5 + $0x6e8] sm:$0xff]  ;;  %v8620_v30 = vcombine.low %v214_v14, %v218_v15 }
  0xf1   :  { %3463 = vmatprep.subr.bf16.mxu0 %v8541_v59  ;;  %v8749_v22 = vcombine.high %v342_v16, %v346_v17  ;;  %v206_v26 = vld [vmem:[#allocation5 + $0x288] sm:$0xff] }
  0xf2   :  { %3505 = vmatpush1.bf16.msra.mxu1 %v8676_v31  ;;  %v210_v29 = vld [vmem:[#allocation5 + $0x2a8] sm:$0xff]  ;;  %v8748_v31 = vcombine.low %v342_v16, %v346_v17 }
  0xf3   :  { %3506 = vmatprep.subr.bf16.mxu1 %v8669_v60  ;;  %v334_v54 = vld [vmem:[#allocation5 + $0x688] sm:$0xff]  ;;  %v8613_v59 = vcombine.high %v206_v26, %v210_v29 }
  0xf4   :  { %3464 = vmatpush1.bf16.msra.mxu0 %v8540_v38  ;;  %v338_v55 = vld [vmem:[#allocation5 + $0x6a8] sm:$0xff]  ;;  %v8612_v38 = vcombine.low %v206_v26, %v210_v29 }
  0xf5   :  { %3465 = vmatprep.subr.bf16.mxu0 %v8533_v40  ;;  %v8741_v60 = vcombine.high %v334_v54, %v338_v55  ;;  %v198_v34 = vld [vmem:[#allocation5 + $0x248] sm:$0xff] }
  0xf6   :  { %3507 = vmatpush1.bf16.msra.mxu1 %v8668_v39  ;;  %v202_v35 = vld [vmem:[#allocation5 + $0x268] sm:$0xff]  ;;  %v8740_v39 = vcombine.low %v334_v54, %v338_v55 }
  0xf7   :  { %3508 = vmatprep.subr.bf16.mxu1 %v8661_v41  ;;  %v326_v36 = vld [vmem:[#allocation5 + $0x648] sm:$0xff]  ;;  %v8605_v40 = vcombine.high %v198_v34, %v202_v35 }
  0xf8   :  { %3466 = vmatpush1.bf16.msra.mxu0 %v8532_v48  ;;  %v330_v37 = vld [vmem:[#allocation5 + $0x668] sm:$0xff]  ;;  %v8604_v48 = vcombine.low %v198_v34, %v202_v35 }
  0xf9   :  { %3467 = vmatprep.subr.bf16.mxu0 %v8653_v50  ;;  %v8733_v41 = vcombine.high %v326_v36, %v330_v37  ;;  %v190_v42 = vld [vmem:[#allocation5 + $0x208] sm:$0xff] }
  0xfa   :  { %3509 = vmatpush1.bf16.msra.mxu1 %v8660_v49  ;;  %v194_v43 = vld [vmem:[#allocation5 + $0x228] sm:$0xff]  ;;  %v8732_v49 = vcombine.low %v326_v36, %v330_v37 }
  0xfb   :  { %3510 = vmatprep.subr.bf16.mxu1 %v8781_v51  ;;  %v318_v44 = vld [vmem:[#allocation5 + $0x608] sm:$0xff]  ;;  %v8597_v50 = vcombine.high %v190_v42, %v194_v43 }
  0xfc   :  { %3468 = vmatpush2.bf16.msra.mxu0 %v8652_v23  ;;  %v322_v45 = vld [vmem:[#allocation5 + $0x628] sm:$0xff]  ;;  %v8596_v23 = vcombine.low %v190_v42, %v194_v43 }
  0xfd   :  { %3469 = vmatprep.subr.bf16.mxu0 %v8645_v27  ;;  %v8725_v51 = vcombine.high %v318_v44, %v322_v45  ;;  %v438_v52 = vld [vmem:[#allocation5 + $0x9c8] sm:$0xff] }
  0xfe   :  { %3511 = vmatpush2.bf16.msra.mxu1 %v8780_v24  ;;  %v442_v53 = vld [vmem:[#allocation5 + $0x9e8] sm:$0xff]  ;;  %v8724_v24 = vcombine.low %v318_v44, %v322_v45 }
  0xff   :  { %3512 = vmatprep.subr.bf16.mxu1 %v8773_v28  ;;  %v566_v56 = vld [vmem:[#allocation5 + $0xdc8] sm:$0xff]  ;;  %v8845_v27 = vcombine.high %v438_v52, %v442_v53 }
 0x100   :  { %3470 = vmatpush2.bf16.msra.mxu0 %v8644_v2  ;;  %v570_v57 = vld [vmem:[#allocation5 + $0xde8] sm:$0xff]  ;;  %v8844_v2 = vcombine.low %v438_v52, %v442_v53 }
 0x101   :  { %3471 = vmatprep.subr.bf16.mxu0 %v8637_v4  ;;  %v8973_v28 = vcombine.high %v566_v56, %v570_v57  ;;  %v430_v61 = vld [vmem:[#allocation5 + $0x988] sm:$0xff] }
 0x102   :  { %3513 = vmatpush2.bf16.msra.mxu1 %v8772_v3  ;;  %v434_v62 = vld [vmem:[#allocation5 + $0x9a8] sm:$0xff]  ;;  %v8972_v3 = vcombine.low %v566_v56, %v570_v57 }
 0x103   :  { %3514 = vmatprep.subr.bf16.mxu1 %v8765_v5  ;;  %v558_v0 = vld [vmem:[#allocation5 + $0xd88] sm:$0xff]  ;;  %v8837_v4 = vcombine.high %v430_v61, %v434_v62 }
 0x104   :  { %3472 = vmatpush2.bf16.msra.mxu0 %v8636_v10  ;;  %v562_v1 = vld [vmem:[#allocation5 + $0xda8] sm:$0xff]  ;;  %v8836_v10 = vcombine.low %v430_v61, %v434_v62 }
 0x105   :  { %3473 = vmatprep.subr.bf16.mxu0 %v8629_v12  ;;  %v8965_v5 = vcombine.high %v558_v0, %v562_v1  ;;  %v422_v6 = vld [vmem:[#allocation5 + $0x948] sm:$0xff] }
 0x106   :  { %3515 = vmatpush2.bf16.msra.mxu1 %v8764_v11  ;;  %v426_v7 = vld [vmem:[#allocation5 + $0x968] sm:$0xff]  ;;  %v8964_v11 = vcombine.low %v558_v0, %v562_v1 }
 0x107   :  { %3516 = vmatprep.subr.bf16.mxu1 %v8757_v13  ;;  %v550_v8 = vld [vmem:[#allocation5 + $0xd48] sm:$0xff]  ;;  %v8829_v12 = vcombine.high %v422_v6, %v426_v7 }
 0x108   :  { %3474 = vmatpush2.bf16.msra.mxu0 %v8628_v18  ;;  %v554_v9 = vld [vmem:[#allocation5 + $0xd68] sm:$0xff]  ;;  %v8828_v18 = vcombine.low %v422_v6, %v426_v7 }
 0x109   :  { %3475 = vmatprep.subr.bf16.mxu0 %v8621_v20  ;;  %v8957_v13 = vcombine.high %v550_v8, %v554_v9  ;;  %v414_v14 = vld [vmem:[#allocation5 + $0x908] sm:$0xff] }
 0x10a   :  { %3517 = vmatpush2.bf16.msra.mxu1 %v8756_v19  ;;  %v418_v15 = vld [vmem:[#allocation5 + $0x928] sm:$0xff]  ;;  %v8956_v19 = vcombine.low %v550_v8, %v554_v9 }
 0x10b   :  { %3518 = vmatprep.subr.bf16.mxu1 %v8749_v22  ;;  %v542_v16 = vld [vmem:[#allocation5 + $0xd08] sm:$0xff]  ;;  %v8821_v20 = vcombine.high %v414_v14, %v418_v15 }
 0x10c   :  { %3476 = vmatpush2.bf16.msra.mxu0 %v8620_v30  ;;  %v546_v17 = vld [vmem:[#allocation5 + $0xd28] sm:$0xff]  ;;  %v8820_v30 = vcombine.low %v414_v14, %v418_v15 }
 0x10d   :  { %3477 = vmatprep.subr.bf16.mxu0 %v8613_v59  ;;  %v8949_v22 = vcombine.high %v542_v16, %v546_v17  ;;  %v406_v26 = vld [vmem:[#allocation5 + $0x8c8] sm:$0xff] }
 0x10e   :  { %3519 = vmatpush2.bf16.msra.mxu1 %v8748_v31  ;;  %v410_v29 = vld [vmem:[#allocation5 + $0x8e8] sm:$0xff]  ;;  %v8948_v31 = vcombine.low %v542_v16, %v546_v17 }
 0x10f   :  { %3520 = vmatprep.subr.bf16.mxu1 %v8741_v60  ;;  %v534_v54 = vld [vmem:[#allocation5 + $0xcc8] sm:$0xff]  ;;  %v8813_v59 = vcombine.high %v406_v26, %v410_v29 }
 0x110   :  { %3478 = vmatpush2.bf16.msra.mxu0 %v8612_v38  ;;  %v538_v55 = vld [vmem:[#allocation5 + $0xce8] sm:$0xff]  ;;  %v8812_v38 = vcombine.low %v406_v26, %v410_v29 }
 0x111   :  { %3479 = vmatprep.subr.bf16.mxu0 %v8605_v40  ;;  %v8941_v60 = vcombine.high %v534_v54, %v538_v55  ;;  %v398_v34 = vld [vmem:[#allocation5 + $0x888] sm:$0xff] }
 0x112   :  { %3521 = vmatpush2.bf16.msra.mxu1 %v8740_v39  ;;  %v402_v35 = vld [vmem:[#allocation5 + $0x8a8] sm:$0xff]  ;;  %v8940_v39 = vcombine.low %v534_v54, %v538_v55 }
 0x113   :  { %3522 = vmatprep.subr.bf16.mxu1 %v8733_v41  ;;  %v526_v36 = vld [vmem:[#allocation5 + $0xc88] sm:$0xff]  ;;  %v8805_v40 = vcombine.high %v398_v34, %v402_v35 }
 0x114   :  { %3480 = vmatpush2.bf16.msra.mxu0 %v8604_v48  ;;  %v530_v37 = vld [vmem:[#allocation5 + $0xca8] sm:$0xff]  ;;  %v8804_v48 = vcombine.low %v398_v34, %v402_v35 }
 0x115   :  { %3481 = vmatprep.subr.bf16.mxu0 %v8597_v50  ;;  %v8933_v41 = vcombine.high %v526_v36, %v530_v37  ;;  %v390_v42 = vld [vmem:[#allocation5 + $0x848] sm:$0xff] }
 0x116   :  { %3523 = vmatpush2.bf16.msra.mxu1 %v8732_v49  ;;  %v394_v43 = vld [vmem:[#allocation5 + $0x868] sm:$0xff]  ;;  %v8932_v49 = vcombine.low %v526_v36, %v530_v37 }
 0x117   :  { %3524 = vmatprep.subr.bf16.mxu1 %v8725_v51  ;;  %v518_v44 = vld [vmem:[#allocation5 + $0xc48] sm:$0xff]  ;;  %v8797_v50 = vcombine.high %v390_v42, %v394_v43 }
 0x118   :  { %3482 = vmatpush2.bf16.msra.mxu0 %v8596_v23  ;;  %v522_v45 = vld [vmem:[#allocation5 + $0xc68] sm:$0xff]  ;;  %v8796_v23 = vcombine.low %v390_v42, %v394_v43 }
 0x119   :  { %3537 = vmatprep.subr.bf16.mxu0 %v8845_v27  ;;  %v8925_v51 = vcombine.high %v518_v44, %v522_v45  ;;  %v382_v52 = vld [vmem:[#allocation5 + $0x808] sm:$0xff] }
 0x11a   :  { %3525 = vmatpush2.bf16.msra.mxu1 %v8724_v24  ;;  %v386_v53 = vld [vmem:[#allocation5 + $0x828] sm:$0xff]  ;;  %v8924_v24 = vcombine.low %v518_v44, %v522_v45 }
 0x11b   :  { %3580 = vmatprep.subr.bf16.mxu1 %v8973_v28  ;;  %3484 = vmatmul.mubr.bf16.vlgmr.msra.gmra.mxu0 %v10061_v21  ;;  %v510_v56 = vld [vmem:[#allocation5 + $0xc08] sm:$0xff]  ;;  %v8789_v27 = vcombine.high %v382_v52, %v386_v53 }
 0x11c   :  { %3538 = vmatpush1.bf16.msra.mxu0 %v8844_v2  ;;  %3569 = vmatprep.mubr.bf16.mxu0 %v10077_v32  ;;  %v514_v57 = vld [vmem:[#allocation5 + $0xc28] sm:$0xff]  ;;  %v8788_v2 = vcombine.low %v382_v52, %v386_v53 }
 0x11d   :  { %3527 = vmatmul.mubr.bf16.vlgmr.msra.gmra.mxu1 %v10069_v25  ;;  %3539 = vmatprep.subr.bf16.mxu0 %v8837_v4  ;;  %v8917_v28 = vcombine.high %v510_v56, %v514_v57  ;;  %v502_v61 = vld [vmem:[#allocation5 + $0xbc8] sm:$0xff] }
 0x11e   :  { %3581 = vmatpush1.bf16.msra.mxu1 %v8972_v3  ;;  %3612 = vmatprep.mubr.bf16.mxu1 %v10082_v33  ;;  %v506_v62 = vld [vmem:[#allocation5 + $0xbe8] sm:$0xff]  ;;  %v8916_v3 = vcombine.low %v510_v56, %v514_v57 }
 0x11f   :  { %3582 = vmatprep.subr.bf16.mxu1 %v8965_v5  ;;  %v630_v0 = vld [vmem:[#allocation5 + $0xfc8] sm:$0xff]  ;;  %v8909_v4 = vcombine.high %v502_v61, %v506_v62 }
 0x120   :  { %3540 = vmatpush1.bf16.msra.mxu0 %v8836_v10  ;;  %v634_v1 = vld [vmem:[#allocation5 + $0xfe8] sm:$0xff]  ;;  %v8908_v10 = vcombine.low %v502_v61, %v506_v62 }
 0x121   :  { %3541 = vmatprep.subr.bf16.mxu0 %v8829_v12  ;;  %v9037_v5 = vcombine.high %v630_v0, %v634_v1  ;;  %v494_v6 = vld [vmem:[#allocation5 + $0xb88] sm:$0xff] }
 0x122   :  { %3583 = vmatpush1.bf16.msra.mxu1 %v8964_v11  ;;  %v498_v7 = vld [vmem:[#allocation5 + $0xba8] sm:$0xff]  ;;  %v9036_v11 = vcombine.low %v630_v0, %v634_v1 }
 0x123   :  { %3584 = vmatprep.subr.bf16.mxu1 %v8957_v13  ;;  %v622_v8 = vld [vmem:[#allocation5 + $0xf88] sm:$0xff]  ;;  %v8901_v12 = vcombine.high %v494_v6, %v498_v7 }
 0x124   :  { %3542 = vmatpush1.bf16.msra.mxu0 %v8828_v18  ;;  %v626_v9 = vld [vmem:[#allocation5 + $0xfa8] sm:$0xff]  ;;  %v8900_v18 = vcombine.low %v494_v6, %v498_v7 }
 0x125   :  { %3543 = vmatprep.subr.bf16.mxu0 %v8821_v20  ;;  %v9029_v13 = vcombine.high %v622_v8, %v626_v9  ;;  %v486_v14 = vld [vmem:[#allocation5 + $0xb48] sm:$0xff] }
 0x126   :  { %3585 = vmatpush1.bf16.msra.mxu1 %v8956_v19  ;;  %v490_v15 = vld [vmem:[#allocation5 + $0xb68] sm:$0xff]  ;;  %v9028_v19 = vcombine.low %v622_v8, %v626_v9  ;;  %v183_v8 = vld [vmem:[#allocation5 + $0x1d0] sm:$0xff] }
 0x127   :  { %3586 = vmatprep.subr.bf16.mxu1 %v8949_v22  ;;  %v614_v16 = vld [vmem:[#allocation5 + $0xf48] sm:$0xff]  ;;  %v8893_v20 = vcombine.high %v486_v14, %v490_v15  ;;  %v187_v9 = vld [vmem:[#allocation5 + $0x1f0] sm:$0xff] }
 0x128   :  { %3544 = vmatpush1.bf16.msra.mxu0 %v8820_v30  ;;  %v618_v17 = vld [vmem:[#allocation5 + $0xf68] sm:$0xff]  ;;  %v8892_v30 = vcombine.low %v486_v14, %v490_v15  ;;  %v10106_v15 = vld [vmem:[#allocation7] sm:$0xff] }
 0x129   :  { %3545 = vmatprep.subr.bf16.mxu0 %v8813_v59  ;;  %v9021_v22 = vcombine.high %v614_v16, %v618_v17  ;;  %v478_v26 = vld [vmem:[#allocation5 + $0xb08] sm:$0xff] }
 0x12a   :  { %3587 = vmatpush1.bf16.msra.mxu1 %v8948_v31  ;;  %v482_v29 = vld [vmem:[#allocation5 + $0xb28] sm:$0xff]  ;;  %v9020_v31 = vcombine.low %v614_v16, %v618_v17  ;;  %v8591_v16 = vcombine.high %v183_v8, %v187_v9 }
 0x12b   :  { %3588 = vmatprep.subr.bf16.mxu1 %v8941_v60  ;;  %v606_v54 = vld [vmem:[#allocation5 + $0xf08] sm:$0xff]  ;;  %v8885_v59 = vcombine.high %v478_v26, %v482_v29 }
 0x12c   :  { %3546 = vmatpush1.bf16.msra.mxu0 %v8812_v38  ;;  %v610_v55 = vld [vmem:[#allocation5 + $0xf28] sm:$0xff]  ;;  %v8884_v38 = vcombine.low %v478_v26, %v482_v29  ;;  %v8590_v29 = vcombine.low %v183_v8, %v187_v9  ;;  %v271_v8 = vld [vmem:[#allocation5 + $0x490] sm:$0xff] }
 0x12d   :  { %3547 = vmatprep.subr.bf16.mxu0 %v8805_v40  ;;  %v9013_v60 = vcombine.high %v606_v54, %v610_v55  ;;  %v470_v34 = vld [vmem:[#allocation5 + $0xac8] sm:$0xff]  ;;  %v275_v9 = vld [vmem:[#allocation5 + $0x4b0] sm:$0xff] }
 0x12e   :  { %3589 = vmatpush1.bf16.msra.mxu1 %v8940_v39  ;;  %v474_v35 = vld [vmem:[#allocation5 + $0xae8] sm:$0xff]  ;;  %v9012_v39 = vcombine.low %v606_v54, %v610_v55 }
 0x12f   :  { %3590 = vmatprep.subr.bf16.mxu1 %v8933_v41  ;;  %v598_v36 = vld [vmem:[#allocation5 + $0xec8] sm:$0xff]  ;;  %v8877_v40 = vcombine.high %v470_v34, %v474_v35 }
 0x130   :  { %3548 = vmatpush1.bf16.msra.mxu0 %v8804_v48  ;;  %v602_v37 = vld [vmem:[#allocation5 + $0xee8] sm:$0xff]  ;;  %v8876_v48 = vcombine.low %v470_v34, %v474_v35  ;;  %v295_v34 = vld [vmem:[#allocation5 + $0x550] sm:$0xff] }
 0x131   :  { %3549 = vmatprep.subr.bf16.mxu0 %v8797_v50  ;;  %v9005_v41 = vcombine.high %v598_v36, %v602_v37  ;;  %v462_v42 = vld [vmem:[#allocation5 + $0xa88] sm:$0xff]  ;;  %v299_v35 = vld [vmem:[#allocation5 + $0x570] sm:$0xff] }
 0x132   :  { %3591 = vmatpush1.bf16.msra.mxu1 %v8932_v49  ;;  %v466_v43 = vld [vmem:[#allocation5 + $0xaa8] sm:$0xff]  ;;  %v9004_v49 = vcombine.low %v598_v36, %v602_v37 }
 0x133   :  { %3592 = vmatprep.subr.bf16.mxu1 %v8925_v51  ;;  %v590_v44 = vld [vmem:[#allocation5 + $0xe88] sm:$0xff]  ;;  %v8869_v50 = vcombine.high %v462_v42, %v466_v43 }
 0x134   :  { %3550 = vmatpush1.bf16.msra.mxu0 %v8796_v23  ;;  %v594_v45 = vld [vmem:[#allocation5 + $0xea8] sm:$0xff]  ;;  %v8868_v23 = vcombine.low %v462_v42, %v466_v43 }
 0x135   :  { %3551 = vmatprep.subr.bf16.mxu0 %v8789_v27  ;;  %v8997_v51 = vcombine.high %v590_v44, %v594_v45  ;;  %v454_v52 = vld [vmem:[#allocation5 + $0xa48] sm:$0xff]  ;;  %v8996_v27 = vcombine.low %v590_v44, %v594_v45  ;;  %v8703_v44 = vcombine.high %v295_v34, %v299_v35  ;;  %v159_v45 = vld [vmem:[#allocation5 + $0x110] sm:$0xff] }
 0x136   :  { %3593 = vmatpush1.bf16.msra.mxu1 %v8924_v24  ;;  %v458_v53 = vld [vmem:[#allocation5 + $0xa68] sm:$0xff]  ;;  %v639_v24 = vlaneseq }
 0x137   :  { %3594 = vmatprep.subr.bf16.mxu1 %v8917_v28  ;;  %v582_v56 = vld [vmem:[#allocation5 + $0xe48] sm:$0xff]  ;;  %v8861_v28 = vcombine.high %v454_v52, %v458_v53 }
 0x138   :  { %3552 = vmatpush1.bf16.msra.mxu0 %v8788_v2  ;;  %v586_v57 = vld [vmem:[#allocation5 + $0xe68] sm:$0xff] }
 0x139   :  { %3553 = vmatprep.subr.bf16.mxu0 %v8909_v4  ;;  %v8989_v61 = vcombine.high %v582_v56, %v586_v57  ;;  %v446_v62 = vld [vmem:[#allocation5 + $0xa08] sm:$0xff]  ;;  %v10103_v4 = vshrl.u32 %v639_v24, 7 }
 0x13a   :  { %3595 = vmatpush1.bf16.msra.mxu1 %v8916_v3  ;;  %v450_v0 = vld [vmem:[#allocation5 + $0xa28] sm:$0xff]  ;;  %v8860_v3 = vcombine.low %v454_v52, %v458_v53 }
 0x13b   :  { %3596 = vmatprep.subr.bf16.mxu1 %v9037_v5  ;;  %v574_v1 = vld [vmem:[#allocation5 + $0xe08] sm:$0xff]  ;;  %v8988_v5 = vcombine.low %v582_v56, %v586_v57  ;;  %v8853_v6 = vcombine.high %v446_v62, %v450_v0  ;;  %v8702_v57 = vcombine.low %v295_v34, %v299_v35 }
 0x13c   :  { %3554 = vmatpush2.bf16.msra.mxu0 %v8908_v10  ;;  %v578_v2 = vld [vmem:[#allocation5 + $0xe28] sm:$0xff]  ;;  %v311_v10 = vld [vmem:[#allocation5 + $0x5d0] sm:$0xff] }
 0x13d   :  { %3555 = vmatprep.subr.bf16.mxu0 %v8901_v12  ;;  %v8981_v7 = vcombine.high %v574_v1, %v578_v2  ;;  %v8852_v12 = vcombine.low %v446_v62, %v450_v0  ;;  %v8980_v14 = vcombine.low %v574_v1, %v578_v2  ;;  %v279_v62 = vld [vmem:[#allocation5 + $0x4d0] sm:$0xff] }
 0x13e   :  { %3597 = vmatpush2.bf16.msra.mxu1 %v9036_v11  ;;  %v315_v11 = vld [vmem:[#allocation5 + $0x5f0] sm:$0xff] }
 0x13f   :  { %3598 = vmatprep.subr.bf16.mxu1 %v9029_v13  ;;  %v641_v13 = vsub.s32 0, %v10103_v4  ;;  %v8719_v17 = vcombine.high %v311_v10, %v315_v11  ;;  %v8718_v54 = vcombine.low %v311_v10, %v315_v11  ;;  %v283_v0 = vld [vmem:[#allocation5 + $0x4f0] sm:$0xff] }
 0x140   :  { %3556 = vmatpush2.bf16.msra.mxu0 %v8900_v18  ;;  %v175_v18 = vld [vmem:[#allocation5 + $0x190] sm:$0xff]  ;;  %v8686_v11 = vcombine.low %v279_v62, %v283_v0 }
 0x141   :  { %3557 = vmatprep.subr.bf16.mxu0 %v8893_v20  ;;  %v303_v20 = vld [vmem:[#allocation5 + $0x590] sm:$0xff]  ;;  %v642_v26 = vrot.slane %v10106_v15, %v641_v13 }
 0x142   :  { %3599 = vmatpush2.bf16.msra.mxu1 %v9028_v19  ;;  %v179_v19 = vld [vmem:[#allocation5 + $0x1b0] sm:$0xff] }
 0x143   :  { %3600 = vmatprep.subr.bf16.mxu1 %v9021_v22  ;;  %v307_v22 = vld [vmem:[#allocation5 + $0x5b0] sm:$0xff]  ;;  %v8583_v55 = vcombine.high %v175_v18, %v179_v19 }
 0x144   :  { %3558 = vmatpush2.bf16.msra.mxu0 %v8892_v30  ;;  %v8711_v30 = vcombine.high %v303_v20, %v307_v22 }
 0x145   :  { %3559 = vmatprep.subr.bf16.mxu0 %v8885_v59  ;;  %v171_v59 = vld [vmem:[#allocation5 + $0x170] sm:$0xff] }
 0x146   :  { %3601 = vmatpush2.bf16.msra.mxu1 %v9020_v31  ;;  %v167_v31 = vld [vmem:[#allocation5 + $0x150] sm:$0xff] }
 0x147   :  { %3602 = vmatprep.subr.bf16.mxu1 %v9013_v60  ;;  %v8574_v53 = vcombine.low %v167_v31, %v171_v59 }
 0x148   :  { %3560 = vmatpush2.bf16.msra.mxu0 %v8884_v38  ;;  %v8582_v38 = vcombine.low %v175_v18, %v179_v19  ;;  %v263_v18 = vld [vmem:[#allocation5 + $0x450] sm:$0xff] }
 0x149   :  { %3561 = vmatprep.subr.bf16.mxu0 %v8877_v40  ;;  %v8710_v40 = vcombine.low %v303_v20, %v307_v22  ;;  %v267_v19 = vld [vmem:[#allocation5 + $0x470] sm:$0xff]  ;;  %v8678_v22 = vcombine.low %v271_v8, %v275_v9 }
 0x14a   :  { %3603 = vmatpush2.bf16.msra.mxu1 %v9012_v39 }
 0x14b   :  { %3604 = vmatprep.subr.bf16.mxu1 %v9005_v41  ;;  %v8575_v41 = vcombine.high %v167_v31, %v171_v59  ;;  %v259_v31 = vld [vmem:[#allocation5 + $0x430] sm:$0xff] }
 0x14c   :  { %3562 = vmatpush2.bf16.msra.mxu0 %v8876_v48  ;;  %v163_v48 = vld [vmem:[#allocation5 + $0x130] sm:$0xff] }
 0x14d   :  { %3563 = vmatprep.subr.bf16.mxu0 %v8869_v50  ;;  %v287_v50 = vld [vmem:[#allocation5 + $0x510] sm:$0xff]  ;;  %v8566_v1 = vcombine.low %v159_v45, %v163_v48 }
 0x14e   :  { %3605 = vmatpush2.bf16.msra.mxu1 %v9004_v49 }
 0x14f   :  { %3606 = vmatprep.subr.bf16.mxu1 %v8997_v51  ;;  %v291_v51 = vld [vmem:[#allocation5 + $0x530] sm:$0xff] }
 0x150   :  { %3564 = vmatpush2.bf16.msra.mxu0 %v8868_v23  ;;  %v8567_v23 = vcombine.high %v159_v45, %v163_v48  ;;  %v8694_v2 = vcombine.low %v287_v50, %v291_v51 }
 0x151   :  { %3565 = vmatprep.subr.bf16.mxu0 %v8861_v28  ;;  %v151_v28 = vld [vmem:[#allocation5 + $0xd0] sm:$0xff] }
 0x152   :  { %3607 = vmatpush2.bf16.msra.mxu1 %v8996_v27  ;;  %v8695_v27 = vcombine.high %v287_v50, %v291_v51  ;;  %v243_v50 = vld [vmem:[#allocation5 + $0x3b0] sm:$0xff] }
 0x153   :  { %3608 = vmatprep.subr.bf16.mxu1 %v8989_v61  ;;  %v155_v61 = vld [vmem:[#allocation5 + $0xf0] sm:$0xff] }
 0x154   :  { %3566 = vmatpush2.bf16.msra.mxu0 %v8860_v3  ;;  %v8559_v3 = vcombine.high %v151_v28, %v155_v61  ;;  %v8558_v10 = vcombine.low %v151_v28, %v155_v61  ;;  %v367_v51 = vld [vmem:[#allocation5 + $0x790] sm:$0xff] }
 0x155   :  { %3567 = vmatprep.subr.bf16.mxu0 %v8853_v6  ;;  %v143_v6 = vld [vmem:[#allocation5 + $0x90] sm:$0xff] }
 0x156   :  { %3609 = vmatpush2.bf16.msra.mxu1 %v8988_v5  ;;  %v8687_v5 = vcombine.high %v279_v62, %v283_v0  ;;  %v235_v28 = vld [vmem:[#allocation5 + $0x370] sm:$0xff] }
 0x157   :  { %3610 = vmatprep.subr.bf16.mxu1 %v8981_v7  ;;  %v147_v7 = vld [vmem:[#allocation5 + $0xb0] sm:$0xff] }
 0x158   :  { %3568 = vmatpush2.bf16.msra.mxu0 %v8852_v12  ;;  %v8551_v12 = vcombine.high %v143_v6, %v147_v7  ;;  %v8550_v20 = vcombine.low %v143_v6, %v147_v7  ;;  %v359_v61 = vld [vmem:[#allocation5 + $0x750] sm:$0xff] }
 0x159   :  { %3623 = vmatprep.subr.bf16.mxu0 %v8591_v16  ;;  %v135_v16 = vld [vmem:[#allocation5 + $0x50] sm:$0xff] }
 0x15a   :  { %3611 = vmatpush2.bf16.msra.mxu1 %v8980_v14  ;;  %v8679_v14 = vcombine.high %v271_v8, %v275_v9  ;;  %v363_v62 = vld [vmem:[#allocation5 + $0x770] sm:$0xff] }
 0x15b   :  { %3666 = vmatprep.subr.bf16.mxu1 %v8719_v17  ;;  %v3313_v60 = vpop.f32.mrf.mxu0  ;;  %3570 = vmatmul.mubr.bf16.vlgmr.msra.gmra.mxu0 %v10089_v46  ;;  %v139_v17 = vld [vmem:[#allocation5 + $0x70] sm:$0xff] }
 0x15c   :  { %v3314_v36 = vadd.f32 %v3313_v60, %v642_v26  ;;  %3624 = vmatpush1.bf16.msra.mxu0 %v8590_v29  ;;  %3655 = vmatprep.mubr.bf16.mxu0 %v10047_v58  ;;  %v8671_v29 = vcombine.high %v263_v18, %v267_v19  ;;  %v8542_v59 = vcombine.low %v135_v16, %v139_v17  ;;  %v227_v6 = vld [vmem:[#allocation5 + $0x330] sm:$0xff] }
 0x15d   :  { %v3356_v37 = vpop.f32.mrf.mxu1  ;;  %3613 = vmatmul.mubr.bf16.vlgmr.msra.gmra.mxu1 %v10093_v47  ;;  %v10113_v39 = vpop.f32.mrf.mxu0  ;;  %3625 = vmatprep.subr.bf16.mxu0 %v8583_v55  ;;  %v131_v55 = vld [vmem:[#allocation5 + $0x30] sm:$0xff]  ;;  %v8670_v60 = vcombine.low %v263_v18, %v267_v19 }
 0x15e   :  { %3667 = vmatpush1.bf16.msra.mxu1 %v8718_v54  ;;  %v10115_v42 = vadd.f32 %v3356_v37, %v3314_v36  ;;  %3698 = vmatprep.mubr.bf16.mxu1 %v10055_v63  ;;  %v127_v54 = vld [vmem:[#allocation5 + $0x10] sm:$0xff] }
 0x15f   :  { %v10117_v43 = vpop.f32.mrf.mxu1  ;;  %3668 = vmatprep.subr.bf16.mxu1 %v8711_v30  ;;  %v3317_v49 = vpop.f32.mrf.mxu0  ;;  %v255_v30 = vld [vmem:[#allocation5 + $0x410] sm:$0xff]  ;;  %v8535_v34 = vcombine.high %v127_v54, %v131_v55 }
 0x160   :  { %v3318_v52 = vadd.f32 %v3317_v49, %v642_v26  ;;  %3626 = vmatpush1.bf16.msra.mxu0 %v8582_v38  ;;  %v8543_v26 = vcombine.high %v135_v16, %v139_v17  ;;  %v8663_v35 = vcombine.high %v255_v30, %v259_v31  ;;  %v247_v36 = vld [vmem:[#allocation5 + $0x3d0] sm:$0xff] }
 0x161   :  { %v3360_v56 = vpop.f32.mrf.mxu1  ;;  %3627 = vmatprep.subr.bf16.mxu0 %v8575_v41  ;;  %v251_v37 = vld [vmem:[#allocation5 + $0x3f0] sm:$0xff]  ;;  %v8534_v41 = vcombine.low %v127_v54, %v131_v55 }
 0x162   :  { %3669 = vmatpush1.bf16.msra.mxu1 %v8710_v40  ;;  %v10121_v24 = vadd.f32 %v3360_v56, %v3318_v52  ;;  %v375_v38 = vld [vmem:[#allocation5 + $0x7d0] sm:$0xff]  ;;  %v8655_v45 = vcombine.high %v247_v36, %v251_v37 }
 0x163   :  { %3670 = vmatprep.subr.bf16.mxu1 %v8703_v44  ;;  %v379_v40 = vld [vmem:[#allocation5 + $0x7f0] sm:$0xff]  ;;  %v8662_v44 = vcombine.low %v255_v30, %v259_v31 }
 0x164   :  { %3628 = vmatpush1.bf16.msra.mxu0 %v8574_v53  ;;  %v8783_v48 = vcombine.high %v375_v38, %v379_v40  ;;  %v239_v49 = vld [vmem:[#allocation5 + $0x390] sm:$0xff]  ;;  %v8654_v53 = vcombine.low %v247_v36, %v251_v37  ;;  %v8782_v56 = vcombine.low %v375_v38, %v379_v40 }
 0x165   :  { %3629 = vmatprep.subr.bf16.mxu0 %v8567_v23  ;;  %v371_v52 = vld [vmem:[#allocation5 + $0x7b0] sm:$0xff]  ;;  %v8646_v0 = vcombine.low %v239_v49, %v243_v50 }
 0x166   :  { %3671 = vmatpush1.bf16.msra.mxu1 %v8702_v57  ;;  %v8647_v57 = vcombine.high %v239_v49, %v243_v50  ;;  %v8775_v23 = vcombine.high %v367_v51, %v371_v52  ;;  %v351_v7 = vld [vmem:[#allocation5 + $0x710] sm:$0xff] }
 0x167   :  { %3672 = vmatprep.subr.bf16.mxu1 %v8695_v27  ;;  %v231_v27 = vld [vmem:[#allocation5 + $0x350] sm:$0xff] }
 0x168   :  { %3630 = vmatpush1.bf16.msra.mxu0 %v8566_v1  ;;  %v8774_v1 = vcombine.low %v367_v51, %v371_v52  ;;  %v355_v8 = vld [vmem:[#allocation5 + $0x730] sm:$0xff]  ;;  %v8638_v9 = vcombine.low %v231_v27, %v235_v28 }
 0x169   :  { %3631 = vmatprep.subr.bf16.mxu0 %v8559_v3  ;;  %v8767_v3 = vcombine.high %v359_v61, %v363_v62  ;;  %v219_v16 = vld [vmem:[#allocation5 + $0x2f0] sm:$0xff] }
 0x16a   :  { %3673 = vmatpush1.bf16.msra.mxu1 %v8694_v2  ;;  %v8639_v2 = vcombine.high %v231_v27, %v235_v28  ;;  %v343_v17 = vld [vmem:[#allocation5 + $0x6d0] sm:$0xff] }
 0x16b   :  { %3674 = vmatprep.subr.bf16.mxu1 %v8687_v5  ;;  %v223_v5 = vld [vmem:[#allocation5 + $0x310] sm:$0xff] }
 0x16c   :  { %3632 = vmatpush1.bf16.msra.mxu0 %v8558_v10  ;;  %v8766_v10 = vcombine.low %v359_v61, %v363_v62  ;;  %v347_v18 = vld [vmem:[#allocation5 + $0x6f0] sm:$0xff]  ;;  %v8630_v19 = vcombine.low %v223_v5, %v227_v6 }
 0x16d   :  { %3633 = vmatprep.subr.bf16.mxu0 %v8551_v12  ;;  %v8759_v12 = vcombine.high %v351_v7, %v355_v8  ;;  %v211_v54 = vld [vmem:[#allocation5 + $0x2b0] sm:$0xff] }
 0x16e   :  { %3675 = vmatpush1.bf16.msra.mxu1 %v8686_v11  ;;  %v8631_v11 = vcombine.high %v223_v5, %v227_v6  ;;  %v335_v55 = vld [vmem:[#allocation5 + $0x690] sm:$0xff] }
 0x16f   :  { %3676 = vmatprep.subr.bf16.mxu1 %v8679_v14  ;;  %v215_v14 = vld [vmem:[#allocation5 + $0x2d0] sm:$0xff] }
 0x170   :  { %3634 = vmatpush1.bf16.msra.mxu0 %v8550_v20  ;;  %v8758_v20 = vcombine.low %v351_v7, %v355_v8  ;;  %v339_v30 = vld [vmem:[#allocation5 + $0x6b0] sm:$0xff]  ;;  %v8622_v31 = vcombine.low %v215_v14, %v219_v16 }
 0x171   :  { %3635 = vmatprep.subr.bf16.mxu0 %v8543_v26  ;;  %v8751_v26 = vcombine.high %v343_v17, %v347_v18  ;;  %v203_v36 = vld [vmem:[#allocation5 + $0x270] sm:$0xff] }
 0x172   :  { %3677 = vmatpush1.bf16.msra.mxu1 %v8678_v22  ;;  %v8623_v22 = vcombine.high %v215_v14, %v219_v16  ;;  %v327_v37 = vld [vmem:[#allocation5 + $0x650] sm:$0xff] }
 0x173   :  { %3678 = vmatprep.subr.bf16.mxu1 %v8671_v29  ;;  %v207_v29 = vld [vmem:[#allocation5 + $0x290] sm:$0xff] }
 0x174   :  { %3636 = vmatpush1.bf16.msra.mxu0 %v8542_v59  ;;  %v8750_v59 = vcombine.low %v343_v17, %v347_v18  ;;  %v331_v38 = vld [vmem:[#allocation5 + $0x670] sm:$0xff]  ;;  %v8614_v40 = vcombine.low %v207_v29, %v211_v54 }
 0x175   :  { %3637 = vmatprep.subr.bf16.mxu0 %v8535_v34  ;;  %v8743_v34 = vcombine.high %v335_v55, %v339_v30  ;;  %v195_v49 = vld [vmem:[#allocation5 + $0x230] sm:$0xff] }
 0x176   :  { %3679 = vmatpush1.bf16.msra.mxu1 %v8670_v60  ;;  %v8615_v60 = vcombine.high %v207_v29, %v211_v54  ;;  %v319_v50 = vld [vmem:[#allocation5 + $0x610] sm:$0xff] }
 0x177   :  { %3680 = vmatprep.subr.bf16.mxu1 %v8663_v35  ;;  %v199_v35 = vld [vmem:[#allocation5 + $0x250] sm:$0xff] }
 0x178   :  { %3638 = vmatpush1.bf16.msra.mxu0 %v8534_v41  ;;  %v8742_v41 = vcombine.low %v335_v55, %v339_v30  ;;  %v323_v51 = vld [vmem:[#allocation5 + $0x630] sm:$0xff]  ;;  %v8606_v52 = vcombine.low %v199_v35, %v203_v36 }
 0x179   :  { %3639 = vmatprep.subr.bf16.mxu0 %v8655_v45  ;;  %v8735_v45 = vcombine.high %v327_v37, %v331_v38  ;;  %v443_v27 = vld [vmem:[#allocation5 + $0x9f0] sm:$0xff] }
 0x17a   :  { %3681 = vmatpush1.bf16.msra.mxu1 %v8662_v44  ;;  %v8607_v44 = vcombine.high %v199_v35, %v203_v36  ;;  %v567_v28 = vld [vmem:[#allocation5 + $0xdd0] sm:$0xff] }
 0x17b   :  { %3682 = vmatprep.subr.bf16.mxu1 %v8783_v48  ;;  %v191_v48 = vld [vmem:[#allocation5 + $0x210] sm:$0xff] }
 0x17c   :  { %3640 = vmatpush2.bf16.msra.mxu0 %v8654_v53  ;;  %v8734_v53 = vcombine.low %v327_v37, %v331_v38  ;;  %v571_v61 = vld [vmem:[#allocation5 + $0xdf0] sm:$0xff]  ;;  %v8598_v62 = vcombine.low %v191_v48, %v195_v49 }
 0x17d   :  { %3641 = vmatprep.subr.bf16.mxu0 %v8647_v57  ;;  %v8727_v57 = vcombine.high %v319_v50, %v323_v51  ;;  %v435_v5 = vld [vmem:[#allocation5 + $0x9b0] sm:$0xff] }
 0x17e   :  { %3683 = vmatpush2.bf16.msra.mxu1 %v8782_v56  ;;  %v8599_v56 = vcombine.high %v191_v48, %v195_v49  ;;  %v559_v6 = vld [vmem:[#allocation5 + $0xd90] sm:$0xff] }
 0x17f   :  { %3684 = vmatprep.subr.bf16.mxu1 %v8775_v23  ;;  %v439_v23 = vld [vmem:[#allocation5 + $0x9d0] sm:$0xff] }
 0x180   :  { %3642 = vmatpush2.bf16.msra.mxu0 %v8646_v0  ;;  %v8726_v0 = vcombine.low %v319_v50, %v323_v51  ;;  %v563_v7 = vld [vmem:[#allocation5 + $0xdb0] sm:$0xff]  ;;  %v8846_v8 = vcombine.low %v439_v23, %v443_v27 }
 0x181   :  { %3643 = vmatprep.subr.bf16.mxu0 %v8639_v2  ;;  %v8975_v2 = vcombine.high %v567_v28, %v571_v61  ;;  %v8967_v14 = vcombine.high %v559_v6, %v563_v7  ;;  %v423_v16 = vld [vmem:[#allocation5 + $0x950] sm:$0xff]  ;;  %v8966_v55 = vcombine.low %v559_v6, %v563_v7 }
 0x182   :  { %3685 = vmatpush2.bf16.msra.mxu1 %v8774_v1  ;;  %v8847_v1 = vcombine.high %v439_v23, %v443_v27  ;;  %v427_v17 = vld [vmem:[#allocation5 + $0x970] sm:$0xff] }
 0x183   :  { %3686 = vmatprep.subr.bf16.mxu1 %v8767_v3  ;;  %v431_v3 = vld [vmem:[#allocation5 + $0x990] sm:$0xff]  ;;  %v8831_v30 = vcombine.high %v423_v16, %v427_v17 }
 0x184   :  { %3644 = vmatpush2.bf16.msra.mxu0 %v8638_v9  ;;  %v10123_v9 = vpop.f32.mrf.mxu0  ;;  %v8838_v29 = vcombine.low %v431_v3, %v435_v5  ;;  %v419_v35 = vld [vmem:[#allocation5 + $0x930] sm:$0xff] }
 0x185   :  { %3645 = vmatprep.subr.bf16.mxu0 %v8631_v11  ;;  %v8839_v11 = vcombine.high %v431_v3, %v435_v5  ;;  %v543_v36 = vld [vmem:[#allocation5 + $0xd10] sm:$0xff] }
 0x186   :  { %3687 = vmatpush2.bf16.msra.mxu1 %v8766_v10  ;;  %v8974_v10 = vcombine.low %v567_v28, %v571_v61  ;;  %v547_v37 = vld [vmem:[#allocation5 + $0xd30] sm:$0xff] }
 0x187   :  { %3688 = vmatprep.subr.bf16.mxu1 %v8759_v12  ;;  %v10125_v12 = vpop.f32.mrf.mxu1  ;;  %v8951_v49 = vcombine.high %v543_v36, %v547_v37  ;;  %v407_v50 = vld [vmem:[#allocation5 + $0x8d0] sm:$0xff] }
 0x188   :  { %3646 = vmatpush2.bf16.msra.mxu0 %v8630_v19  ;;  %v551_v19 = vld [vmem:[#allocation5 + $0xd50] sm:$0xff] }
 0x189   :  { %3647 = vmatprep.subr.bf16.mxu0 %v8623_v22  ;;  %v411_v51 = vld [vmem:[#allocation5 + $0x8f0] sm:$0xff] }
 0x18a   :  { %3689 = vmatpush2.bf16.msra.mxu1 %v8758_v20  ;;  %v555_v20 = vld [vmem:[#allocation5 + $0xd70] sm:$0xff]  ;;  %v8815_v27 = vcombine.high %v407_v50, %v411_v51  ;;  %v8814_v3 = vcombine.low %v407_v50, %v411_v51 }
 0x18b   :  { %3690 = vmatprep.subr.bf16.mxu1 %v8751_v26 }
 0x18c   :  { %3648 = vmatpush2.bf16.msra.mxu0 %v8622_v31 }
 0x18d   :  { %3649 = vmatprep.subr.bf16.mxu0 %v8615_v60  ;;  %v8959_v60 = vcombine.high %v551_v19, %v555_v20 }
 0x18e   :  { %3691 = vmatpush2.bf16.msra.mxu1 %v8750_v59 }
 0x18f   :  { %3692 = vmatprep.subr.bf16.mxu1 %v8743_v34  ;;  %v415_v34 = vld [vmem:[#allocation5 + $0x910] sm:$0xff] }
 0x190   :  { %3650 = vmatpush2.bf16.msra.mxu0 %v8614_v40  ;;  %v8830_v40 = vcombine.low %v423_v16, %v427_v17  ;;  %v8822_v23 = vcombine.low %v415_v34, %v419_v35 }
 0x191   :  { %3651 = vmatprep.subr.bf16.mxu0 %v8607_v44  ;;  %v8958_v44 = vcombine.low %v551_v19, %v555_v20  ;;  %v383_v20 = vld [vmem:[#allocation5 + $0x810] sm:$0xff] }
 0x192   :  { %3693 = vmatpush2.bf16.msra.mxu1 %v8742_v41 }
 0x193   :  { %3694 = vmatprep.subr.bf16.mxu1 %v8735_v45  ;;  %v8823_v45 = vcombine.high %v415_v34, %v419_v35  ;;  %v503_v34 = vld [vmem:[#allocation5 + $0xbd0] sm:$0xff] }
 0x194   :  { %3652 = vmatpush2.bf16.msra.mxu0 %v8606_v52  ;;  %v535_v52 = vld [vmem:[#allocation5 + $0xcd0] sm:$0xff] }
 0x195   :  { %3653 = vmatprep.subr.bf16.mxu0 %v8599_v56  ;;  %v507_v35 = vld [vmem:[#allocation5 + $0xbf0] sm:$0xff] }
 0x196   :  { %3695 = vmatpush2.bf16.msra.mxu1 %v8734_v53  ;;  %v539_v53 = vld [vmem:[#allocation5 + $0xcf0] sm:$0xff]  ;;  %v8910_v50 = vcombine.low %v503_v34, %v507_v35 }
 0x197   :  { %3696 = vmatprep.subr.bf16.mxu1 %v8727_v57  ;;  %v8943_v61 = vcombine.high %v535_v52, %v539_v53  ;;  %v8942_v5 = vcombine.low %v535_v52, %v539_v53 }
 0x198   :  { %3654 = vmatpush2.bf16.msra.mxu0 %v8598_v62  ;;  %v399_v62 = vld [vmem:[#allocation5 + $0x890] sm:$0xff] }
 0x199   :  { %3709 = vmatprep.subr.bf16.mxu0 %v8847_v1  ;;  %v527_v1 = vld [vmem:[#allocation5 + $0xc90] sm:$0xff] }
 0x19a   :  { %3697 = vmatpush2.bf16.msra.mxu1 %v8726_v0  ;;  %v403_v0 = vld [vmem:[#allocation5 + $0x8b0] sm:$0xff] }
 0x19b   :  { %3752 = vmatprep.subr.bf16.mxu1 %v8975_v2  ;;  %v3399_v18 = vpop.f32.mrf.mxu0  ;;  %3656 = vmatmul.mubr.bf16.vlgmr.msra.gmra.mxu0 %v10061_v21  ;;  %v531_v2 = vld [vmem:[#allocation5 + $0xcb0] sm:$0xff]  ;;  %v8807_v6 = vcombine.high %v399_v62, %v403_v0  ;;  %v8806_v16 = vcombine.low %v399_v62, %v403_v0 }
 0x19c   :  { %v3400_v22 = vadd.f32 %v3399_v18, %v10115_v42  ;;  %3710 = vmatpush1.bf16.msra.mxu0 %v8846_v8  ;;  %3741 = vmatprep.mubr.bf16.mxu0 %v10077_v32  ;;  %v8935_v7 = vcombine.high %v527_v1, %v531_v2  ;;  %v391_v8 = vld [vmem:[#allocation5 + $0x850] sm:$0xff]  ;;  %v8934_v17 = vcombine.low %v527_v1, %v531_v2 }
 0x19d   :  { %v3442_v26 = vpop.f32.mrf.mxu1  ;;  %3699 = vmatmul.mubr.bf16.vlgmr.msra.gmra.mxu1 %v10069_v25  ;;  %v10130_v54 = vpop.f32.mrf.mxu0  ;;  %3711 = vmatprep.subr.bf16.mxu0 %v8839_v11  ;;  %v519_v11 = vld [vmem:[#allocation5 + $0xc50] sm:$0xff] }
 0x19e   :  { %3753 = vmatpush1.bf16.msra.mxu1 %v8974_v10  ;;  %v3443_v31 = vadd.f32 %v3442_v26, %v3400_v22  ;;  %3784 = vmatprep.mubr.bf16.mxu1 %v10082_v33  ;;  %v395_v10 = vld [vmem:[#allocation5 + $0x870] sm:$0xff] }
 0x19f   :  { %v10132_v59 = vpop.f32.mrf.mxu1  ;;  %3754 = vmatprep.subr.bf16.mxu1 %v8967_v14  ;;  %v3403_v42 = vpop.f32.mrf.mxu0  ;;  %v523_v14 = vld [vmem:[#allocation5 + $0xc70] sm:$0xff]  ;;  %v8799_v18 = vcombine.high %v391_v8, %v395_v10 }
 0x1a0   :  { %v3404_v38 = vadd.f32 %v3403_v42, %v10121_v24  ;;  %3712 = vmatpush1.bf16.msra.mxu0 %v8838_v29  ;;  %v3967_v56 = vmax.f32 %v3443_v31, 0.0  ;;  %v8950_v24 = vcombine.low %v543_v36, %v547_v37  ;;  %v8927_v19 = vcombine.high %v519_v11, %v523_v14  ;;  %v387_v22 = vld [vmem:[#allocation5 + $0x830] sm:$0xff] }
 0x1a1   :  { %v3446_v41 = vpop.f32.mrf.mxu1  ;;  %3713 = vmatprep.subr.bf16.mxu0 %v8831_v30  ;;  %v511_v26 = vld [vmem:[#allocation5 + $0xc10] sm:$0xff]  ;;  %v8926_v30 = vcombine.low %v519_v11, %v523_v14  ;;  %v8791_v31 = vcombine.high %v383_v20, %v387_v22  ;;  %v8790_v37 = vcombine.low %v383_v20, %v387_v22 }
 0x1a2   :  { %3755 = vmatpush1.bf16.msra.mxu1 %v8966_v55  ;;  %v3447_v48 = vadd.f32 %v3446_v41, %v3404_v38  ;;  %v515_v29 = vld [vmem:[#allocation5 + $0xc30] sm:$0xff]  ;;  %v8798_v55 = vcombine.low %v391_v8, %v395_v10 }
 0x1a3   :  { %3756 = vmatprep.subr.bf16.mxu1 %v8959_v60  ;;  %v8919_v60 = vcombine.high %v511_v26, %v515_v29  ;;  %v631_v42 = vld [vmem:[#allocation5 + $0xfd0] sm:$0xff]  ;;  %v8918_v38 = vcombine.low %v511_v26, %v515_v29 }
 0x1a4   :  { %v3975_v57 = vmax.f32 %v3447_v48, 0.0  ;;  %3714 = vmatpush1.bf16.msra.mxu0 %v8830_v40  ;;  %v635_v36 = vld [vmem:[#allocation5 + $0xff0] sm:$0xff]  ;;  %v8911_v40 = vcombine.high %v503_v34, %v507_v35 }
 0x1a5   :  { %3715 = vmatprep.subr.bf16.mxu0 %v8823_v45  ;;  %v9039_v41 = vcombine.high %v631_v42, %v635_v36  ;;  %v499_v45 = vld [vmem:[#allocation5 + $0xbb0] sm:$0xff]  ;;  %v9038_v51 = vcombine.low %v631_v42, %v635_v36 }
 0x1a6   :  { %3757 = vmatpush1.bf16.msra.mxu1 %v8958_v44  ;;  %v10137_v28 = vpack.c.bf16 %v3975_v57, %v3967_v56  ;;  %v495_v44 = vld [vmem:[#allocation5 + $0xb90] sm:$0xff] }
 0x1a7   :  { %3758 = vmatprep.subr.bf16.mxu1 %v8951_v49  ;;  %v623_v48 = vld [vmem:[#allocation5 + $0xf90] sm:$0xff]  ;;  %v8903_v52 = vcombine.high %v495_v44, %v499_v45 }
 0x1a8   :  { %3716 = vmatpush1.bf16.msra.mxu0 %v8822_v23  ;;  %v627_v49 = vld [vmem:[#allocation5 + $0xfb0] sm:$0xff] }
 0x1a9   :  { %3717 = vmatprep.subr.bf16.mxu0 %v8815_v27  ;;  %v9031_v53 = vcombine.high %v623_v48, %v627_v49  ;;  %v487_v56 = vld [vmem:[#allocation5 + $0xb50] sm:$0xff]  ;;  %v8902_v27 = vcombine.low %v495_v44, %v499_v45 }
 0x1aa   :  { %3759 = vmatpush1.bf16.msra.mxu1 %v8950_v24  ;;  %v491_v57 = vld [vmem:[#allocation5 + $0xb70] sm:$0xff] }
 0x1ab   :  { %3760 = vmatprep.subr.bf16.mxu1 %v8943_v61  ;;  %v615_v23 = vld [vmem:[#allocation5 + $0xf50] sm:$0xff]  ;;  %v9030_v61 = vcombine.low %v623_v48, %v627_v49  ;;  %v8895_v62 = vcombine.high %v487_v56, %v491_v57 }
 0x1ac   :  { %3718 = vmatpush1.bf16.msra.mxu0 %v8814_v3  ;;  %v619_v24 = vld [vmem:[#allocation5 + $0xf70] sm:$0xff] }
 0x1ad   :  { %3719 = vmatprep.subr.bf16.mxu0 %v8807_v6  ;;  %v9023_v0 = vcombine.high %v615_v23, %v619_v24  ;;  %v479_v1 = vld [vmem:[#allocation5 + $0xb10] sm:$0xff]  ;;  %v8894_v6 = vcombine.low %v487_v56, %v491_v57 }
 0x1ae   :  { %3761 = vmatpush1.bf16.msra.mxu1 %v8942_v5  ;;  %v483_v2 = vld [vmem:[#allocation5 + $0xb30] sm:$0xff] }
 0x1af   :  { %3762 = vmatprep.subr.bf16.mxu1 %v8935_v7  ;;  %v607_v3 = vld [vmem:[#allocation5 + $0xf10] sm:$0xff]  ;;  %v9022_v7 = vcombine.low %v615_v23, %v619_v24  ;;  %v8887_v8 = vcombine.high %v479_v1, %v483_v2  ;;  %v184_v23 = vld [vmem:[#allocation5 + $0x1d8] sm:$0xff] }
 0x1b0   :  { %3720 = vmatpush1.bf16.msra.mxu0 %v8806_v16  ;;  %v611_v5 = vld [vmem:[#allocation5 + $0xf30] sm:$0xff]  ;;  %v188_v24 = vld [vmem:[#allocation5 + $0x1f8] sm:$0xff] }
 0x1b1   :  { %3721 = vmatprep.subr.bf16.mxu0 %v8799_v18  ;;  %v9015_v10 = vcombine.high %v607_v3, %v611_v5  ;;  %v471_v11 = vld [vmem:[#allocation5 + $0xad0] sm:$0xff]  ;;  %v8886_v18 = vcombine.low %v479_v1, %v483_v2  ;;  %v8593_v2 = vcombine.high %v184_v23, %v188_v24 }
 0x1b2   :  { %3763 = vmatpush1.bf16.msra.mxu1 %v8934_v17  ;;  %v475_v14 = vld [vmem:[#allocation5 + $0xaf0] sm:$0xff] }
 0x1b3   :  { %3764 = vmatprep.subr.bf16.mxu1 %v8927_v19  ;;  %v599_v16 = vld [vmem:[#allocation5 + $0xed0] sm:$0xff]  ;;  %v9014_v19 = vcombine.low %v607_v3, %v611_v5  ;;  %v8879_v20 = vcombine.high %v471_v11, %v475_v14  ;;  %v176_v5 = vld [vmem:[#allocation5 + $0x198] sm:$0xff] }
 0x1b4   :  { %3722 = vmatpush1.bf16.msra.mxu0 %v8798_v55  ;;  %v603_v17 = vld [vmem:[#allocation5 + $0xef0] sm:$0xff] }
 0x1b5   :  { %3723 = vmatprep.subr.bf16.mxu0 %v8791_v31  ;;  %v9007_v22 = vcombine.high %v599_v16, %v603_v17  ;;  %v463_v26 = vld [vmem:[#allocation5 + $0xa90] sm:$0xff]  ;;  %v8878_v31 = vcombine.low %v471_v11, %v475_v14  ;;  %v8592_v11 = vcombine.low %v184_v23, %v188_v24  ;;  %v10143_v14 = vpop.f32.mrf.mxu0  ;;  %v156_v23 = vld [vmem:[#allocation5 + $0xf8] sm:$0xff] }
 0x1b6   :  { %3765 = vmatpush1.bf16.msra.mxu1 %v8926_v30  ;;  %v467_v29 = vld [vmem:[#allocation5 + $0xab0] sm:$0xff]  ;;  %v284_v24 = vld [vmem:[#allocation5 + $0x4f8] sm:$0xff] }
 0x1b7   :  { %3766 = vmatprep.subr.bf16.mxu1 %v8919_v60  ;;  %v591_v55 = vld [vmem:[#allocation5 + $0xe90] sm:$0xff]  ;;  %v9006_v60 = vcombine.low %v599_v16, %v603_v17  ;;  %v8871_v34 = vcombine.high %v463_v26, %v467_v29 }
 0x1b8   :  { %3724 = vmatpush1.bf16.msra.mxu0 %v8790_v37  ;;  %v595_v30 = vld [vmem:[#allocation5 + $0xeb0] sm:$0xff] }
 0x1b9   :  { %3725 = vmatprep.subr.bf16.mxu0 %v8911_v40  ;;  %v8999_v35 = vcombine.high %v591_v55, %v595_v30  ;;  %v455_v42 = vld [vmem:[#allocation5 + $0xa50] sm:$0xff]  ;;  %v8870_v40 = vcombine.low %v463_v26, %v467_v29  ;;  %v296_v29 = vld [vmem:[#allocation5 + $0x558] sm:$0xff] }
 0x1ba   :  { %3767 = vmatpush1.bf16.msra.mxu1 %v8918_v38  ;;  %v459_v36 = vld [vmem:[#allocation5 + $0xa70] sm:$0xff] }
 0x1bb   :  { %3768 = vmatprep.subr.bf16.mxu1 %v9039_v41  ;;  %v583_v37 = vld [vmem:[#allocation5 + $0xe50] sm:$0xff]  ;;  %v8998_v41 = vcombine.low %v591_v55, %v595_v30  ;;  %v8863_v44 = vcombine.high %v455_v42, %v459_v36  ;;  %v300_v55 = vld [vmem:[#allocation5 + $0x578] sm:$0xff] }
 0x1bc   :  { %3726 = vmatpush2.bf16.msra.mxu0 %v8910_v50  ;;  %v587_v38 = vld [vmem:[#allocation5 + $0xe70] sm:$0xff] }
 0x1bd   :  { %3727 = vmatprep.subr.bf16.mxu0 %v8903_v52  ;;  %v8991_v45 = vcombine.high %v583_v37, %v587_v38  ;;  %v447_v48 = vld [vmem:[#allocation5 + $0xa10] sm:$0xff]  ;;  %v8862_v52 = vcombine.low %v455_v42, %v459_v36 }
 0x1be   :  { %3769 = vmatpush2.bf16.msra.mxu1 %v9038_v51  ;;  %v451_v49 = vld [vmem:[#allocation5 + $0xa30] sm:$0xff] }
 0x1bf   :  { %3770 = vmatprep.subr.bf16.mxu1 %v9031_v53  ;;  %v575_v50 = vld [vmem:[#allocation5 + $0xe10] sm:$0xff]  ;;  %v8990_v53 = vcombine.low %v583_v37, %v587_v38  ;;  %v8855_v56 = vcombine.high %v447_v48, %v451_v49  ;;  %v8705_v37 = vcombine.high %v296_v29, %v300_v55  ;;  %v160_v38 = vld [vmem:[#allocation5 + $0x118] sm:$0xff] }
 0x1c0   :  { %3728 = vmatpush2.bf16.msra.mxu0 %v8902_v27  ;;  %v579_v51 = vld [vmem:[#allocation5 + $0xe30] sm:$0xff]  ;;  %v312_v27 = vld [vmem:[#allocation5 + $0x5d8] sm:$0xff] }
 0x1c1   :  { %3729 = vmatprep.subr.bf16.mxu0 %v8895_v62  ;;  %v8983_v57 = vcombine.high %v575_v50, %v579_v51  ;;  %v8854_v62 = vcombine.low %v447_v48, %v451_v49  ;;  %v8982_v1 = vcombine.low %v575_v50, %v579_v51  ;;  %v8704_v51 = vcombine.low %v296_v29, %v300_v55  ;;  %v128_v55 = vld [vmem:[#allocation5 + $0x18] sm:$0xff] }
 0x1c2   :  { %3771 = vmatpush2.bf16.msra.mxu1 %v9030_v61  ;;  %v316_v61 = vld [vmem:[#allocation5 + $0x5f8] sm:$0xff] }
 0x1c3   :  { %3772 = vmatprep.subr.bf16.mxu1 %v9023_v0  ;;  %v649_v0 = vsub.s32 2, %v10103_v4  ;;  %v8721_v3 = vcombine.high %v312_v27, %v316_v61  ;;  %v8720_v16 = vcombine.low %v312_v27, %v316_v61 }
 0x1c4   :  { %3730 = vmatpush2.bf16.msra.mxu0 %v8894_v6  ;;  %v180_v6 = vld [vmem:[#allocation5 + $0x1b8] sm:$0xff] }
 0x1c5   :  { %3731 = vmatprep.subr.bf16.mxu0 %v8887_v8  ;;  %v308_v8 = vld [vmem:[#allocation5 + $0x5b8] sm:$0xff]  ;;  %v8585_v17 = vcombine.high %v176_v5, %v180_v6 }
 0x1c6   :  { %3773 = vmatpush2.bf16.msra.mxu1 %v9022_v7  ;;  %v304_v7 = vld [vmem:[#allocation5 + $0x598] sm:$0xff] }
 0x1c7   :  { %3774 = vmatprep.subr.bf16.mxu1 %v9015_v10  ;;  %v650_v10 = vrot.slane %v10106_v15, %v649_v0 }
 0x1c8   :  { %3732 = vmatpush2.bf16.msra.mxu0 %v8886_v18  ;;  %v10145_v18 = vpop.f32.mrf.mxu1 }
 0x1c9   :  { %3733 = vmatprep.subr.bf16.mxu0 %v8879_v20  ;;  %v168_v20 = vld [vmem:[#allocation5 + $0x158] sm:$0xff] }
 0x1ca   :  { %3775 = vmatpush2.bf16.msra.mxu1 %v9014_v19  ;;  %v8713_v19 = vcombine.high %v304_v7, %v308_v8 }
 0x1cb   :  { %3776 = vmatprep.subr.bf16.mxu1 %v9007_v22  ;;  %v172_v22 = vld [vmem:[#allocation5 + $0x178] sm:$0xff] }
 0x1cc   :  { %3734 = vmatpush2.bf16.msra.mxu0 %v8878_v31  ;;  %v8584_v31 = vcombine.low %v176_v5, %v180_v6  ;;  %v8576_v49 = vcombine.low %v168_v20, %v172_v22  ;;  %v276_v5 = vld [vmem:[#allocation5 + $0x4b8] sm:$0xff] }
 0x1cd   :  { %3735 = vmatprep.subr.bf16.mxu0 %v8871_v34  ;;  %v8712_v34 = vcombine.low %v304_v7, %v308_v8 }
 0x1ce   :  { %3777 = vmatpush2.bf16.msra.mxu1 %v9006_v60 }
 0x1cf   :  { %3778 = vmatprep.subr.bf16.mxu1 %v8999_v35  ;;  %v8577_v35 = vcombine.high %v168_v20, %v172_v22 }
 0x1d0   :  { %3736 = vmatpush2.bf16.msra.mxu0 %v8870_v40  ;;  %v164_v40 = vld [vmem:[#allocation5 + $0x138] sm:$0xff] }
 0x1d1   :  { %3737 = vmatprep.subr.bf16.mxu0 %v8863_v44  ;;  %v288_v44 = vld [vmem:[#allocation5 + $0x518] sm:$0xff]  ;;  %v8568_v27 = vcombine.low %v160_v38, %v164_v40 }
 0x1d2   :  { %3779 = vmatpush2.bf16.msra.mxu1 %v8998_v41 }
 0x1d3   :  { %3780 = vmatprep.subr.bf16.mxu1 %v8991_v45  ;;  %v292_v45 = vld [vmem:[#allocation5 + $0x538] sm:$0xff] }
 0x1d4   :  { %3738 = vmatpush2.bf16.msra.mxu0 %v8862_v52  ;;  %v8569_v52 = vcombine.high %v160_v38, %v164_v40  ;;  %v248_v40 = vld [vmem:[#allocation5 + $0x3d8] sm:$0xff] }
 0x1d5   :  { %3739 = vmatprep.subr.bf16.mxu0 %v8855_v56  ;;  %v8697_v56 = vcombine.high %v288_v44, %v292_v45 }
 0x1d6   :  { %3781 = vmatpush2.bf16.msra.mxu1 %v8990_v53 }
 0x1d7   :  { %3782 = vmatprep.subr.bf16.mxu1 %v8983_v57  ;;  %v152_v57 = vld [vmem:[#allocation5 + $0xd8] sm:$0xff] }
 0x1d8   :  { %3740 = vmatpush2.bf16.msra.mxu0 %v8854_v62  ;;  %v8561_v61 = vcombine.high %v152_v57, %v156_v23  ;;  %v8560_v6 = vcombine.low %v152_v57, %v156_v23  ;;  %v368_v57 = vld [vmem:[#allocation5 + $0x798] sm:$0xff] }
 0x1d9   :  { %3795 = vmatprep.subr.bf16.mxu0 %v8593_v2  ;;  %v148_v2 = vld [vmem:[#allocation5 + $0xb8] sm:$0xff] }
 0x1da   :  { %3783 = vmatpush2.bf16.msra.mxu1 %v8982_v1  ;;  %v144_v1 = vld [vmem:[#allocation5 + $0x98] sm:$0xff] }
 0x1db   :  { %3838 = vmatprep.subr.bf16.mxu1 %v8721_v3  ;;  %v3485_v26 = vpop.f32.mrf.mxu0  ;;  %3742 = vmatmul.mubr.bf16.vlgmr.msra.gmra.mxu0 %v10089_v46  ;;  %v272_v3 = vld [vmem:[#allocation5 + $0x498] sm:$0xff]  ;;  %v8553_v8 = vcombine.high %v144_v1, %v148_v2  ;;  %v8552_v20 = vcombine.low %v144_v1, %v148_v2 }
 0x1dc   :  { %v3486_v30 = vadd.f32 %v3485_v26, %v650_v10  ;;  %3796 = vmatpush1.bf16.msra.mxu0 %v8592_v11  ;;  %3827 = vmatprep.mubr.bf16.mxu0 %v10047_v58  ;;  %v280_v58 = vld [vmem:[#allocation5 + $0x4d8] sm:$0xff]  ;;  %v8680_v22 = vcombine.low %v272_v3, %v276_v5 }
 0x1dd   :  { %v3528_v15 = vpop.f32.mrf.mxu1  ;;  %3785 = vmatmul.mubr.bf16.vlgmr.msra.gmra.mxu1 %v10093_v47  ;;  %v10149_v60 = vpop.f32.mrf.mxu0  ;;  %3797 = vmatprep.subr.bf16.mxu0 %v8585_v17  ;;  %v8689_v62 = vcombine.high %v280_v58, %v284_v24  ;;  %v8688_v7 = vcombine.low %v280_v58, %v284_v24  ;;  %v136_v11 = vld [vmem:[#allocation5 + $0x58] sm:$0xff] }
 0x1de   :  { %3839 = vmatpush1.bf16.msra.mxu1 %v8720_v16  ;;  %v10151_v42 = vadd.f32 %v3528_v15, %v3486_v30  ;;  %3870 = vmatprep.mubr.bf16.mxu1 %v10055_v63  ;;  %v8696_v63 = vcombine.low %v288_v44, %v292_v45  ;;  %v140_v16 = vld [vmem:[#allocation5 + $0x78] sm:$0xff] }
 0x1df   :  { %v10153_v36 = vpop.f32.mrf.mxu1  ;;  %3840 = vmatprep.subr.bf16.mxu1 %v8713_v19  ;;  %v3489_v41 = vpop.f32.mrf.mxu0  ;;  %v264_v17 = vld [vmem:[#allocation5 + $0x458] sm:$0xff]  ;;  %v8545_v26 = vcombine.high %v136_v11, %v140_v16 }
 0x1e0   :  { %v3490_v48 = vadd.f32 %v3489_v41, %v650_v10  ;;  %3798 = vmatpush1.bf16.msra.mxu0 %v8584_v31  ;;  %v8681_v10 = vcombine.high %v272_v3, %v276_v5  ;;  %v268_v19 = vld [vmem:[#allocation5 + $0x478] sm:$0xff] }
 0x1e1   :  { %v3532_v50 = vpop.f32.mrf.mxu1  ;;  %3799 = vmatprep.subr.bf16.mxu0 %v8577_v35  ;;  %v8673_v29 = vcombine.high %v264_v17, %v268_v19  ;;  %v132_v30 = vld [vmem:[#allocation5 + $0x38] sm:$0xff]  ;;  %v8672_v35 = vcombine.low %v264_v17, %v268_v19 }
 0x1e2   :  { %3841 = vmatpush1.bf16.msra.mxu1 %v8712_v34  ;;  %v10157_v53 = vadd.f32 %v3532_v50, %v3490_v48  ;;  %v256_v15 = vld [vmem:[#allocation5 + $0x418] sm:$0xff]  ;;  %v8544_v34 = vcombine.low %v136_v11, %v140_v16  ;;  %v8536_v48 = vcombine.low %v128_v55, %v132_v30 }
 0x1e3   :  { %3842 = vmatprep.subr.bf16.mxu1 %v8705_v37  ;;  %v260_v31 = vld [vmem:[#allocation5 + $0x438] sm:$0xff]  ;;  %v8537_v37 = vcombine.high %v128_v55, %v132_v30 }
 0x1e4   :  { %3800 = vmatpush1.bf16.msra.mxu0 %v8576_v49  ;;  %v8665_v38 = vcombine.high %v256_v15, %v260_v31  ;;  %v252_v41 = vld [vmem:[#allocation5 + $0x3f8] sm:$0xff]  ;;  %v8664_v49 = vcombine.low %v256_v15, %v260_v31 }
 0x1e5   :  { %3801 = vmatprep.subr.bf16.mxu0 %v8569_v52  ;;  %v376_v44 = vld [vmem:[#allocation5 + $0x7d8] sm:$0xff]  ;;  %v8657_v50 = vcombine.high %v248_v40, %v252_v41  ;;  %v8656_v58 = vcombine.low %v248_v40, %v252_v41 }
 0x1e6   :  { %3843 = vmatpush1.bf16.msra.mxu1 %v8704_v51  ;;  %v380_v45 = vld [vmem:[#allocation5 + $0x7f8] sm:$0xff] }
 0x1e7   :  { %3844 = vmatprep.subr.bf16.mxu1 %v8697_v56  ;;  %v8785_v51 = vcombine.high %v376_v44, %v380_v45  ;;  %v240_v52 = vld [vmem:[#allocation5 + $0x398] sm:$0xff]  ;;  %v8784_v24 = vcombine.low %v376_v44, %v380_v45 }
 0x1e8   :  { %3802 = vmatpush1.bf16.msra.mxu0 %v8568_v27  ;;  %v244_v56 = vld [vmem:[#allocation5 + $0x3b8] sm:$0xff] }
 0x1e9   :  { %3803 = vmatprep.subr.bf16.mxu0 %v8561_v61  ;;  %v372_v23 = vld [vmem:[#allocation5 + $0x7b8] sm:$0xff]  ;;  %v8649_v27 = vcombine.high %v240_v52, %v244_v56  ;;  %v8648_v3 = vcombine.low %v240_v52, %v244_v56 }
 0x1ea   :  { %3845 = vmatpush1.bf16.msra.mxu1 %v8696_v63  ;;  %v8777_v63 = vcombine.high %v368_v57, %v372_v23  ;;  %v232_v61 = vld [vmem:[#allocation5 + $0x358] sm:$0xff]  ;;  %v8776_v5 = vcombine.low %v368_v57, %v372_v23 }
 0x1eb   :  { %3846 = vmatprep.subr.bf16.mxu1 %v8689_v62  ;;  %v236_v62 = vld [vmem:[#allocation5 + $0x378] sm:$0xff] }
 0x1ec   :  { %3804 = vmatpush1.bf16.msra.mxu0 %v8560_v6  ;;  %v360_v1 = vld [vmem:[#allocation5 + $0x758] sm:$0xff]  ;;  %v8641_v6 = vcombine.high %v232_v61, %v236_v62  ;;  %v8640_v17 = vcombine.low %v232_v61, %v236_v62 }
 0x1ed   :  { %3805 = vmatprep.subr.bf16.mxu0 %v8553_v8  ;;  %v364_v2 = vld [vmem:[#allocation5 + $0x778] sm:$0xff] }
 0x1ee   :  { %3847 = vmatpush1.bf16.msra.mxu1 %v8688_v7  ;;  %v8769_v7 = vcombine.high %v360_v1, %v364_v2  ;;  %v224_v8 = vld [vmem:[#allocation5 + $0x318] sm:$0xff]  ;;  %v8768_v19 = vcombine.low %v360_v1, %v364_v2 }
 0x1ef   :  { %3848 = vmatprep.subr.bf16.mxu1 %v8681_v10  ;;  %v228_v10 = vld [vmem:[#allocation5 + $0x338] sm:$0xff] }
 0x1f0   :  { %3806 = vmatpush1.bf16.msra.mxu0 %v8552_v20  ;;  %v352_v11 = vld [vmem:[#allocation5 + $0x718] sm:$0xff]  ;;  %v8633_v20 = vcombine.high %v224_v8, %v228_v10  ;;  %v8632_v15 = vcombine.low %v224_v8, %v228_v10 }
 0x1f1   :  { %3807 = vmatprep.subr.bf16.mxu0 %v8545_v26  ;;  %v356_v16 = vld [vmem:[#allocation5 + $0x738] sm:$0xff] }
 0x1f2   :  { %3849 = vmatpush1.bf16.msra.mxu1 %v8680_v22  ;;  %v8761_v22 = vcombine.high %v352_v11, %v356_v16  ;;  %v216_v26 = vld [vmem:[#allocation5 + $0x2d8] sm:$0xff]  ;;  %v8760_v31 = vcombine.low %v352_v11, %v356_v16 }
 0x1f3   :  { %3850 = vmatprep.subr.bf16.mxu1 %v8673_v29  ;;  %v220_v29 = vld [vmem:[#allocation5 + $0x2f8] sm:$0xff] }
 0x1f4   :  { %3808 = vmatpush1.bf16.msra.mxu0 %v8544_v34  ;;  %v344_v55 = vld [vmem:[#allocation5 + $0x6d8] sm:$0xff]  ;;  %v8625_v34 = vcombine.high %v216_v26, %v220_v29  ;;  %v8624_v44 = vcombine.low %v216_v26, %v220_v29 }
 0x1f5   :  { %3809 = vmatprep.subr.bf16.mxu0 %v8537_v37  ;;  %v348_v30 = vld [vmem:[#allocation5 + $0x6f8] sm:$0xff] }
 0x1f6   :  { %3851 = vmatpush1.bf16.msra.mxu1 %v8672_v35  ;;  %v8753_v35 = vcombine.high %v344_v55, %v348_v30  ;;  %v208_v37 = vld [vmem:[#allocation5 + $0x298] sm:$0xff]  ;;  %v8752_v45 = vcombine.low %v344_v55, %v348_v30  ;;  %v10159_v30 = vpop.f32.mrf.mxu0 }
 0x1f7   :  { %3852 = vmatprep.subr.bf16.mxu1 %v8665_v38  ;;  %v212_v38 = vld [vmem:[#allocation5 + $0x2b8] sm:$0xff] }
 0x1f8   :  { %3810 = vmatpush1.bf16.msra.mxu0 %v8536_v48  ;;  %v336_v40 = vld [vmem:[#allocation5 + $0x698] sm:$0xff]  ;;  %v8617_v48 = vcombine.high %v208_v37, %v212_v38  ;;  %v8616_v57 = vcombine.low %v208_v37, %v212_v38 }
 0x1f9   :  { %3811 = vmatprep.subr.bf16.mxu0 %v8657_v50  ;;  %v340_v41 = vld [vmem:[#allocation5 + $0x6b8] sm:$0xff] }
 0x1fa   :  { %3853 = vmatpush1.bf16.msra.mxu1 %v8664_v49  ;;  %v8745_v49 = vcombine.high %v336_v40, %v340_v41  ;;  %v200_v50 = vld [vmem:[#allocation5 + $0x258] sm:$0xff]  ;;  %v8744_v23 = vcombine.low %v336_v40, %v340_v41 }
 0x1fb   :  { %3854 = vmatprep.subr.bf16.mxu1 %v8785_v51  ;;  %v204_v51 = vld [vmem:[#allocation5 + $0x278] sm:$0xff] }
 0x1fc   :  { %3812 = vmatpush2.bf16.msra.mxu0 %v8656_v58  ;;  %v328_v52 = vld [vmem:[#allocation5 + $0x658] sm:$0xff]  ;;  %v8609_v58 = vcombine.high %v200_v50, %v204_v51  ;;  %v8608_v1 = vcombine.low %v200_v50, %v204_v51 }
 0x1fd   :  { %3813 = vmatprep.subr.bf16.mxu0 %v8649_v27  ;;  %v332_v56 = vld [vmem:[#allocation5 + $0x678] sm:$0xff] }
 0x1fe   :  { %3855 = vmatpush2.bf16.msra.mxu1 %v8784_v24  ;;  %v8737_v24 = vcombine.high %v328_v52, %v332_v56  ;;  %v192_v27 = vld [vmem:[#allocation5 + $0x218] sm:$0xff]  ;;  %v8736_v2 = vcombine.low %v328_v52, %v332_v56 }
 0x1ff   :  { %3856 = vmatprep.subr.bf16.mxu1 %v8777_v63  ;;  %v196_v63 = vld [vmem:[#allocation5 + $0x238] sm:$0xff] }
 0x200   :  { %3814 = vmatpush2.bf16.msra.mxu0 %v8648_v3  ;;  %v320_v61 = vld [vmem:[#allocation5 + $0x618] sm:$0xff]  ;;  %v8601_v3 = vcombine.high %v192_v27, %v196_v63  ;;  %v8600_v11 = vcombine.low %v192_v27, %v196_v63 }
 0x201   :  { %3815 = vmatprep.subr.bf16.mxu0 %v8641_v6  ;;  %v324_v62 = vld [vmem:[#allocation5 + $0x638] sm:$0xff] }
 0x202   :  { %3857 = vmatpush2.bf16.msra.mxu1 %v8776_v5  ;;  %v8729_v5 = vcombine.high %v320_v61, %v324_v62  ;;  %v440_v6 = vld [vmem:[#allocation5 + $0x9d8] sm:$0xff]  ;;  %v8728_v16 = vcombine.low %v320_v61, %v324_v62 }
 0x203   :  { %3858 = vmatprep.subr.bf16.mxu1 %v8769_v7  ;;  %v444_v7 = vld [vmem:[#allocation5 + $0x9f8] sm:$0xff] }
 0x204   :  { %3816 = vmatpush2.bf16.msra.mxu0 %v8640_v17  ;;  %v568_v8 = vld [vmem:[#allocation5 + $0xdd8] sm:$0xff]  ;;  %v8849_v17 = vcombine.high %v440_v6, %v444_v7  ;;  %v8848_v55 = vcombine.low %v440_v6, %v444_v7 }
 0x205   :  { %3817 = vmatprep.subr.bf16.mxu0 %v8633_v20  ;;  %v572_v10 = vld [vmem:[#allocation5 + $0xdf8] sm:$0xff] }
 0x206   :  { %3859 = vmatpush2.bf16.msra.mxu1 %v8768_v19  ;;  %v8977_v19 = vcombine.high %v568_v8, %v572_v10  ;;  %v432_v20 = vld [vmem:[#allocation5 + $0x998] sm:$0xff] }
 0x207   :  { %3860 = vmatprep.subr.bf16.mxu1 %v8761_v22  ;;  %v436_v22 = vld [vmem:[#allocation5 + $0x9b8] sm:$0xff] }
 0x208   :  { %3818 = vmatpush2.bf16.msra.mxu0 %v8632_v15  ;;  %v560_v26 = vld [vmem:[#allocation5 + $0xd98] sm:$0xff]  ;;  %v8976_v15 = vcombine.low %v568_v8, %v572_v10 }
 0x209   :  { %3819 = vmatprep.subr.bf16.mxu0 %v8625_v34  ;;  %v564_v29 = vld [vmem:[#allocation5 + $0xdb8] sm:$0xff]  ;;  %v10161_v34 = vpop.f32.mrf.mxu1 }
 0x20a   :  { %3861 = vmatpush2.bf16.msra.mxu1 %v8760_v31  ;;  %v8841_v31 = vcombine.high %v432_v20, %v436_v22  ;;  %v424_v37 = vld [vmem:[#allocation5 + $0x958] sm:$0xff]  ;;  %v8968_v51 = vcombine.low %v560_v26, %v564_v29 }
 0x20b   :  { %3862 = vmatprep.subr.bf16.mxu1 %v8753_v35  ;;  %v8969_v35 = vcombine.high %v560_v26, %v564_v29  ;;  %v428_v38 = vld [vmem:[#allocation5 + $0x978] sm:$0xff] }
 0x20c   :  { %3820 = vmatpush2.bf16.msra.mxu0 %v8624_v44  ;;  %v552_v41 = vld [vmem:[#allocation5 + $0xd58] sm:$0xff]  ;;  %v8833_v52 = vcombine.high %v424_v37, %v428_v38  ;;  %v8832_v63 = vcombine.low %v424_v37, %v428_v38 }
 0x20d   :  { %3821 = vmatprep.subr.bf16.mxu0 %v8617_v48  ;;  %v556_v44 = vld [vmem:[#allocation5 + $0xd78] sm:$0xff] }
 0x20e   :  { %3863 = vmatpush2.bf16.msra.mxu1 %v8752_v45  ;;  %v8960_v62 = vcombine.low %v552_v41, %v556_v44  ;;  %v412_v6 = vld [vmem:[#allocation5 + $0x8f8] sm:$0xff] }
 0x20f   :  { %3864 = vmatprep.subr.bf16.mxu1 %v8745_v49  ;;  %v8840_v49 = vcombine.low %v432_v20, %v436_v22  ;;  %v540_v7 = vld [vmem:[#allocation5 + $0xcf8] sm:$0xff] }
 0x210   :  { %3822 = vmatpush2.bf16.msra.mxu0 %v8616_v57  ;;  %v404_v20 = vld [vmem:[#allocation5 + $0x8b8] sm:$0xff] }
 0x211   :  { %3823 = vmatprep.subr.bf16.mxu0 %v8609_v58  ;;  %v420_v58 = vld [vmem:[#allocation5 + $0x938] sm:$0xff] }
 0x212   :  { %3865 = vmatpush2.bf16.msra.mxu1 %v8744_v23  ;;  %v416_v23 = vld [vmem:[#allocation5 + $0x918] sm:$0xff] }
 0x213   :  { %3866 = vmatprep.subr.bf16.mxu1 %v8737_v24  ;;  %v544_v24 = vld [vmem:[#allocation5 + $0xd18] sm:$0xff] }
 0x214   :  { %3824 = vmatpush2.bf16.msra.mxu0 %v8608_v1  ;;  %v8825_v1 = vcombine.high %v416_v23, %v420_v58  ;;  %v528_v22 = vld [vmem:[#allocation5 + $0xc98] sm:$0xff] }
 0x215   :  { %3825 = vmatprep.subr.bf16.mxu0 %v8601_v3  ;;  %v532_v26 = vld [vmem:[#allocation5 + $0xcb8] sm:$0xff] }
 0x216   :  { %3867 = vmatpush2.bf16.msra.mxu1 %v8736_v2  ;;  %v396_v37 = vld [vmem:[#allocation5 + $0x878] sm:$0xff] }
 0x217   :  { %3868 = vmatprep.subr.bf16.mxu1 %v8729_v5  ;;  %v408_v5 = vld [vmem:[#allocation5 + $0x8d8] sm:$0xff] }
 0x218   :  { %3826 = vmatpush2.bf16.msra.mxu0 %v8600_v11  ;;  %v8817_v11 = vcombine.high %v408_v5, %v412_v6  ;;  %v8816_v29 = vcombine.low %v408_v5, %v412_v6  ;;  %v520_v38 = vld [vmem:[#allocation5 + $0xc58] sm:$0xff] }
 0x219   :  { %3881 = vmatprep.subr.bf16.mxu0 %v8849_v17  ;;  %v500_v5 = vld [vmem:[#allocation5 + $0xbb8] sm:$0xff] }
 0x21a   :  { %3869 = vmatpush2.bf16.msra.mxu1 %v8728_v16  ;;  %v624_v6 = vld [vmem:[#allocation5 + $0xf98] sm:$0xff] }
 0x21b   :  { %3924 = vmatprep.subr.bf16.mxu1 %v8977_v19  ;;  %v3571_v40 = vpop.f32.mrf.mxu0  ;;  %3828 = vmatmul.mubr.bf16.vlgmr.msra.gmra.mxu0 %v10061_v21  ;;  %v8961_v21 = vcombine.high %v552_v41, %v556_v44  ;;  %v400_v19 = vld [vmem:[#allocation5 + $0x898] sm:$0xff]  ;;  %v8936_v44 = vcombine.low %v528_v22, %v532_v26 }
 0x21c   :  { %v3572_v45 = vadd.f32 %v3571_v40, %v10151_v42  ;;  %3882 = vmatpush1.bf16.msra.mxu0 %v8848_v55  ;;  %3913 = vmatprep.mubr.bf16.mxu0 %v10077_v32  ;;  %v536_v32 = vld [vmem:[#allocation5 + $0xcd8] sm:$0xff]  ;;  %v8808_v41 = vcombine.low %v400_v19, %v404_v20 }
 0x21d   :  { %v3614_v48 = vpop.f32.mrf.mxu1  ;;  %3871 = vmatmul.mubr.bf16.vlgmr.msra.gmra.mxu1 %v10069_v25  ;;  %v10166_v50 = vpop.f32.mrf.mxu0  ;;  %3883 = vmatprep.subr.bf16.mxu0 %v8841_v31  ;;  %v548_v25 = vld [vmem:[#allocation5 + $0xd38] sm:$0xff]  ;;  %v8945_v17 = vcombine.high %v536_v32, %v540_v7  ;;  %v8944_v55 = vcombine.low %v536_v32, %v540_v7  ;;  %v8937_v31 = vcombine.high %v528_v22, %v532_v26 }
 0x21e   :  { %3925 = vmatpush1.bf16.msra.mxu1 %v8976_v15  ;;  %v3615_v56 = vadd.f32 %v3614_v48, %v3572_v45  ;;  %3956 = vmatprep.mubr.bf16.mxu1 %v10082_v33  ;;  %v8953_v3 = vcombine.high %v544_v24, %v548_v25  ;;  %v8824_v33 = vcombine.low %v416_v23, %v420_v58  ;;  %v524_v40 = vld [vmem:[#allocation5 + $0xc78] sm:$0xff] }
 0x21f   :  { %v10168_v57 = vpop.f32.mrf.mxu1  ;;  %3926 = vmatprep.subr.bf16.mxu1 %v8969_v35  ;;  %v3575_v42 = vpop.f32.mrf.mxu0  ;;  %v8809_v15 = vcombine.high %v400_v19, %v404_v20  ;;  %v392_v35 = vld [vmem:[#allocation5 + $0x858] sm:$0xff]  ;;  %v8929_v48 = vcombine.high %v520_v38, %v524_v40  ;;  %v8928_v23 = vcombine.low %v520_v38, %v524_v40 }
 0x220   :  { %v3576_v27 = vadd.f32 %v3575_v42, %v10157_v53  ;;  %3884 = vmatpush1.bf16.msra.mxu0 %v8840_v49  ;;  %v3969_v8 = vmax.f32 %v3615_v56, 0.0  ;;  %v8952_v53 = vcombine.low %v544_v24, %v548_v25  ;;  %v8801_v45 = vcombine.high %v392_v35, %v396_v37  ;;  %v384_v49 = vld [vmem:[#allocation5 + $0x818] sm:$0xff] }
 0x221   :  { %v3618_v61 = vpop.f32.mrf.mxu1  ;;  %3885 = vmatprep.subr.bf16.mxu0 %v8833_v52  ;;  %v512_v52 = vld [vmem:[#allocation5 + $0xc18] sm:$0xff] }
 0x222   :  { %3927 = vmatpush1.bf16.msra.mxu1 %v8968_v51  ;;  %v3619_v2 = vadd.f32 %v3618_v61, %v3576_v27  ;;  %v388_v51 = vld [vmem:[#allocation5 + $0x838] sm:$0xff] }
 0x223   :  { %3928 = vmatprep.subr.bf16.mxu1 %v8961_v21  ;;  %v516_v56 = vld [vmem:[#allocation5 + $0xc38] sm:$0xff]  ;;  %v8800_v21 = vcombine.low %v392_v35, %v396_v37  ;;  %v8793_v58 = vcombine.high %v384_v49, %v388_v51  ;;  %v8792_v61 = vcombine.low %v384_v49, %v388_v51 }
 0x224   :  { %v3977_v10 = vmax.f32 %v3619_v2, 0.0  ;;  %3886 = vmatpush1.bf16.msra.mxu0 %v8832_v63  ;;  %v8921_v42 = vcombine.high %v512_v52, %v516_v56  ;;  %v504_v24 = vld [vmem:[#allocation5 + $0xbd8] sm:$0xff] }
 0x225   :  { %3887 = vmatprep.subr.bf16.mxu0 %v8825_v1  ;;  %v508_v25 = vld [vmem:[#allocation5 + $0xbf8] sm:$0xff] }
 0x226   :  { %3929 = vmatpush1.bf16.msra.mxu1 %v8960_v62  ;;  %v10173_v16 = vpack.c.bf16 %v3977_v10, %v3969_v8  ;;  %v632_v27 = vld [vmem:[#allocation5 + $0xfd8] sm:$0xff]  ;;  %v8920_v62 = vcombine.low %v512_v52, %v516_v56  ;;  %v8913_v1 = vcombine.high %v504_v24, %v508_v25  ;;  %v8912_v7 = vcombine.low %v504_v24, %v508_v25  ;;  %v10177_v25 = vld [vmem:[#allocation7] sm:$0xff] }
 0x227   :  { %3930 = vmatprep.subr.bf16.mxu1 %v8953_v3  ;;  %v636_v63 = vld [vmem:[#allocation5 + $0xff8] sm:$0xff]  ;;  %v653_v52 = vsub.s32 3, %v10103_v4 }
 0x228   :  { %3888 = vmatpush1.bf16.msra.mxu0 %v8824_v33  ;;  %v9041_v2 = vcombine.high %v632_v27, %v636_v63  ;;  %v496_v3 = vld [vmem:[#allocation5 + $0xb98] sm:$0xff]  ;;  %v9040_v8 = vcombine.low %v632_v27, %v636_v63 }
 0x229   :  { %3889 = vmatprep.subr.bf16.mxu0 %v8817_v11  ;;  %v628_v32 = vld [vmem:[#allocation5 + $0xfb8] sm:$0xff]  ;;  %v8905_v10 = vcombine.high %v496_v3, %v500_v5  ;;  %v8904_v20 = vcombine.low %v496_v3, %v500_v5 }
 0x22a   :  { %3931 = vmatpush1.bf16.msra.mxu1 %v8952_v53  ;;  %v9033_v33 = vcombine.high %v624_v6, %v628_v32  ;;  %v488_v53 = vld [vmem:[#allocation5 + $0xb58] sm:$0xff]  ;;  %v9032_v22 = vcombine.low %v624_v6, %v628_v32 }
 0x22b   :  { %3932 = vmatprep.subr.bf16.mxu1 %v8945_v17  ;;  %v492_v11 = vld [vmem:[#allocation5 + $0xb78] sm:$0xff] }
 0x22c   :  { %3890 = vmatpush1.bf16.msra.mxu0 %v8816_v29  ;;  %v616_v17 = vld [vmem:[#allocation5 + $0xf58] sm:$0xff]  ;;  %v8897_v26 = vcombine.high %v488_v53, %v492_v11  ;;  %v8896_v37 = vcombine.low %v488_v53, %v492_v11 }
 0x22d   :  { %3891 = vmatprep.subr.bf16.mxu0 %v8809_v15  ;;  %v620_v19 = vld [vmem:[#allocation5 + $0xf78] sm:$0xff] }
 0x22e   :  { %3933 = vmatpush1.bf16.msra.mxu1 %v8944_v55  ;;  %v9025_v29 = vcombine.high %v616_v17, %v620_v19  ;;  %v480_v55 = vld [vmem:[#allocation5 + $0xb18] sm:$0xff]  ;;  %v9024_v38 = vcombine.low %v616_v17, %v620_v19  ;;  %v3577_v19 = vpop.f32.mrf.mxu0 }
 0x22f   :  { %3934 = vmatprep.subr.bf16.mxu1 %v8937_v31  ;;  %v484_v15 = vld [vmem:[#allocation5 + $0xb38] sm:$0xff] }
 0x230   :  { %3892 = vmatpush1.bf16.msra.mxu0 %v8808_v41  ;;  %v608_v31 = vld [vmem:[#allocation5 + $0xf18] sm:$0xff]  ;;  %v8889_v40 = vcombine.high %v480_v55, %v484_v15  ;;  %v8888_v56 = vcombine.low %v480_v55, %v484_v15 }
 0x231   :  { %3893 = vmatprep.subr.bf16.mxu0 %v8801_v45  ;;  %v612_v35 = vld [vmem:[#allocation5 + $0xf38] sm:$0xff] }
 0x232   :  { %3935 = vmatpush1.bf16.msra.mxu1 %v8936_v44  ;;  %v9017_v41 = vcombine.high %v608_v31, %v612_v35  ;;  %v472_v44 = vld [vmem:[#allocation5 + $0xad8] sm:$0xff] }
 0x233   :  { %3936 = vmatprep.subr.bf16.mxu1 %v8929_v48  ;;  %v476_v45 = vld [vmem:[#allocation5 + $0xaf8] sm:$0xff]  ;;  %v645_v48 = vsub.s32 1, %v10103_v4 }
 0x234   :  { %3894 = vmatpush1.bf16.msra.mxu0 %v8800_v21  ;;  %v600_v49 = vld [vmem:[#allocation5 + $0xed8] sm:$0xff]  ;;  %v9016_v21 = vcombine.low %v608_v31, %v612_v35 }
 0x235   :  { %3895 = vmatprep.subr.bf16.mxu0 %v8793_v58  ;;  %v604_v51 = vld [vmem:[#allocation5 + $0xef8] sm:$0xff]  ;;  %v646_v27 = vrot.slane %v10177_v25, %v645_v48 }
 0x236   :  { %3937 = vmatpush1.bf16.msra.mxu1 %v8928_v23  ;;  %v8881_v23 = vcombine.high %v472_v44, %v476_v45  ;;  %v9009_v58 = vcombine.high %v600_v49, %v604_v51  ;;  %v468_v24 = vld [vmem:[#allocation5 + $0xab8] sm:$0xff]  ;;  %v9008_v3 = vcombine.low %v600_v49, %v604_v51  ;;  %v3620_v49 = vpop.f32.mrf.mxu1  ;;  %v4175_v51 = vld [vmem:[#allocation8 + $0x5c0] sm:$0xff] }
 0x237   :  { %3938 = vmatprep.subr.bf16.mxu1 %v8921_v42  ;;  %v464_v42 = vld [vmem:[#allocation5 + $0xa98] sm:$0xff] }
 0x238   :  { %3896 = vmatpush1.bf16.msra.mxu0 %v8792_v61  ;;  %v592_v63 = vld [vmem:[#allocation5 + $0xe98] sm:$0xff]  ;;  %v8873_v5 = vcombine.high %v464_v42, %v468_v24  ;;  %v8872_v17 = vcombine.low %v464_v42, %v468_v24 }
 0x239   :  { %3897 = vmatprep.subr.bf16.mxu0 %v8913_v1  ;;  %v596_v61 = vld [vmem:[#allocation5 + $0xeb8] sm:$0xff]  ;;  %v8880_v1 = vcombine.low %v472_v44, %v476_v45  ;;  %v4051_v45 = vld [vmem:[#allocation8 + $0x1e0] sm:$0xff] }
 0x23a   :  { %3939 = vmatpush1.bf16.msra.mxu1 %v8920_v62  ;;  %v654_v62 = vrot.slane %v10177_v25, %v653_v52  ;;  %v9001_v32 = vcombine.high %v592_v63, %v596_v61  ;;  %v588_v53 = vld [vmem:[#allocation5 + $0xe78] sm:$0xff] }
 0x23b   :  { %3940 = vmatprep.subr.bf16.mxu1 %v9041_v2  ;;  %v3320_v2 = vadd.f32 %v10123_v9, %v646_v27  ;;  %v452_v55 = vld [vmem:[#allocation5 + $0xa38] sm:$0xff] }
 0x23c   :  { %3898 = vmatpush2.bf16.msra.mxu0 %v8912_v7  ;;  %v3492_v6 = vadd.f32 %v10159_v30, %v654_v62  ;;  %v456_v7 = vld [vmem:[#allocation5 + $0xa58] sm:$0xff]  ;;  %v3488_v11 = vadd.f32 %v10149_v60, %v654_v62  ;;  %v4167_v62 = vld [vmem:[#allocation8 + $0x580] sm:$0xff] }
 0x23d   :  { %3899 = vmatprep.subr.bf16.mxu0 %v8905_v10  ;;  %v3316_v10 = vadd.f32 %v10113_v39, %v646_v27  ;;  %v3363_v9 = vadd.f32 %v10125_v12, %v3320_v2  ;;  %v576_v60 = vld [vmem:[#allocation5 + $0xe18] sm:$0xff]  ;;  %v4039_v27 = vld [vmem:[#allocation8 + $0x180] sm:$0xff] }
 0x23e   :  { %3941 = vmatpush2.bf16.msra.mxu1 %v9040_v8  ;;  %v460_v8 = vld [vmem:[#allocation5 + $0xa78] sm:$0xff]  ;;  %v3535_v30 = vadd.f32 %v10161_v34, %v3492_v6  ;;  %v3531_v35 = vadd.f32 %v10153_v36, %v3488_v11  ;;  %v4179_v36 = vld [vmem:[#allocation8 + $0x5e0] sm:$0xff] }
 0x23f   :  { %3942 = vmatprep.subr.bf16.mxu1 %v9033_v33  ;;  %v584_v33 = vld [vmem:[#allocation5 + $0xe58] sm:$0xff]  ;;  %v3359_v39 = vadd.f32 %v10117_v43, %v3316_v10  ;;  %v3406_v15 = vadd.f32 %v10143_v14, %v3363_v9  ;;  %v4047_v43 = vld [vmem:[#allocation8 + $0x1c0] sm:$0xff]  ;;  %v9227_v42 = vcombine.high %v4175_v51, %v4179_v36 }
 0x240   :  { %3900 = vmatpush2.bf16.msra.mxu0 %v8904_v20  ;;  %v9000_v20 = vcombine.low %v592_v63, %v596_v61  ;;  %v580_v31 = vld [vmem:[#allocation5 + $0xe38] sm:$0xff]  ;;  %v3578_v12 = vadd.f32 %v3577_v19, %v3535_v30  ;;  %v8992_v34 = vcombine.low %v584_v33, %v588_v53  ;;  %v4043_v63 = vld [vmem:[#allocation8 + $0x1a0] sm:$0xff]  ;;  %v9098_v61 = vcombine.low %v4047_v43, %v4051_v45 }
 0x241   :  { %3901 = vmatprep.subr.bf16.mxu0 %v8897_v26  ;;  %v8993_v26 = vcombine.high %v584_v33, %v588_v53  ;;  %v8985_v44 = vcombine.high %v576_v60, %v580_v31  ;;  %v3449_v14 = vadd.f32 %v10145_v18, %v3406_v15  ;;  %v4031_v6 = vld [vmem:[#allocation8 + $0x140] sm:$0xff]  ;;  %v9090_v53 = vcombine.low %v4039_v27, %v4043_v63 }
 0x242   :  { %3943 = vmatpush2.bf16.msra.mxu1 %v9032_v22  ;;  %v8865_v22 = vcombine.high %v456_v7, %v460_v8  ;;  %v4163_v10 = vld [vmem:[#allocation8 + $0x560] sm:$0xff] }
 0x243   :  { %3944 = vmatprep.subr.bf16.mxu1 %v9025_v29  ;;  %v448_v29 = vld [vmem:[#allocation5 + $0xa18] sm:$0xff]  ;;  %v3976_v24 = vmax.f32 %v3449_v14, 0.0  ;;  %v4023_v19 = vld [vmem:[#allocation8 + $0x100] sm:$0xff] }
 0x244   :  { %3902 = vmatpush2.bf16.msra.mxu0 %v8896_v37  ;;  %v8864_v37 = vcombine.low %v456_v7, %v460_v8  ;;  %v4159_v8 = vld [vmem:[#allocation8 + $0x540] sm:$0xff] }
 0x245   :  { %3903 = vmatprep.subr.bf16.mxu0 %v8889_v40  ;;  %v8857_v40 = vcombine.high %v448_v29, %v452_v55  ;;  %v9211_v9 = vcombine.high %v4159_v8, %v4163_v10  ;;  %v4143_v15 = vld [vmem:[#allocation8 + $0x4c0] sm:$0xff] }
 0x246   :  { %3945 = vmatpush2.bf16.msra.mxu1 %v9024_v38  ;;  %v3402_v38 = vadd.f32 %v10130_v54, %v3359_v39  ;;  %v4019_v39 = vld [vmem:[#allocation8 + $0xe0] sm:$0xff] }
 0x247   :  { %3946 = vmatprep.subr.bf16.mxu1 %v9017_v41  ;;  %v3574_v41 = vadd.f32 %v10166_v50, %v3531_v35 }
 0x248   :  { %3904 = vmatpush2.bf16.msra.mxu0 %v8888_v56  ;;  %v3621_v56 = vadd.f32 %v3620_v49, %v3578_v12  ;;  %v3445_v54 = vadd.f32 %v10132_v59, %v3402_v38  ;;  %v9226_v59 = vcombine.low %v4175_v51, %v4179_v36  ;;  %v4007_v38 = vld [vmem:[#allocation8 + $0x80] sm:$0xff] }
 0x249   :  { %3905 = vmatprep.subr.bf16.mxu0 %v8881_v23  ;;  %v8984_v23 = vcombine.low %v576_v60, %v580_v31  ;;  %v3617_v50 = vadd.f32 %v10168_v57, %v3574_v41  ;;  %v4147_v60 = vld [vmem:[#allocation8 + $0x4e0] sm:$0xff] }
 0x24a   :  { %3947 = vmatpush2.bf16.msra.mxu1 %v9016_v21  ;;  %v8856_v21 = vcombine.low %v448_v29, %v452_v55  ;;  %v3978_v18 = vmax.f32 %v3621_v56, 0.0  ;;  %v3968_v2 = vmax.f32 %v3445_v54, 0.0  ;;  %v4015_v55 = vld [vmem:[#allocation8 + $0xc0] sm:$0xff] }
 0x24b   :  { %3948 = vmatprep.subr.bf16.mxu1 %v9009_v58  ;;  %v9099_v58 = vcombine.high %v4047_v43, %v4051_v45  ;;  %v9067_v12 = vcombine.high %v4015_v55, %v4019_v39  ;;  %v4139_v41 = vld [vmem:[#allocation8 + $0x4a0] sm:$0xff]  ;;  %v9194_v43 = vcombine.low %v4143_v15, %v4147_v60 }
 0x24c   :  { %3906 = vmatpush2.bf16.msra.mxu0 %v8880_v1  ;;  %v4171_v1 = vld [vmem:[#allocation8 + $0x5a0] sm:$0xff]  ;;  %v10199_v57 = vpack.c.bf16 %v3976_v24, %v3968_v2 }
 0x24d   :  { %3907 = vmatprep.subr.bf16.mxu0 %v8873_v5  ;;  %v9091_v5 = vcombine.high %v4039_v27, %v4043_v63  ;;  %v9219_v7 = vcombine.high %v4167_v62, %v4171_v1  ;;  %v9218_v11 = vcombine.low %v4167_v62, %v4171_v1  ;;  %v3999_v49 = vld [vmem:[#allocation8 + $0x40] sm:$0xff] }
 0x24e   :  { %3949 = vmatpush2.bf16.msra.mxu1 %v9008_v3  ;;  %v3970_v3 = vmax.f32 %v3617_v50, 0.0  ;;  %v4003_v51 = vld [vmem:[#allocation8 + $0x60] sm:$0xff] }
 0x24f   :  { %3950 = vmatprep.subr.bf16.mxu1 %v9001_v32  ;;  %v4035_v32 = vld [vmem:[#allocation8 + $0x160] sm:$0xff]  ;;  %v9050_v63 = vcombine.low %v3999_v49, %v4003_v51 }
 0x250   :  { %3908 = vmatpush2.bf16.msra.mxu0 %v8872_v17  ;;  %v10202_v33 = vpack.c.bf16 %v3978_v18, %v3970_v3  ;;  %v9083_v17 = vcombine.high %v4031_v6, %v4035_v32  ;;  %v9082_v30 = vcombine.low %v4031_v6, %v4035_v32  ;;  %v4127_v36 = vld [vmem:[#allocation8 + $0x440] sm:$0xff] }
 0x251   :  { %3909 = vmatprep.subr.bf16.mxu0 %v8865_v22  ;;  %v4155_v22 = vld [vmem:[#allocation8 + $0x520] sm:$0xff] }
 0x252   :  { %3951 = vmatpush2.bf16.msra.mxu1 %v9000_v20  ;;  %v4151_v20 = vld [vmem:[#allocation8 + $0x500] sm:$0xff] }
 0x253   :  { %3952 = vmatprep.subr.bf16.mxu1 %v8993_v26  ;;  %v9203_v29 = vcombine.high %v4151_v20, %v4155_v22  ;;  %v9202_v35 = vcombine.low %v4151_v20, %v4155_v22  ;;  %v4131_v56 = vld [vmem:[#allocation8 + $0x460] sm:$0xff] }
 0x254   :  { %3910 = vmatpush2.bf16.msra.mxu0 %v8864_v37  ;;  %v9195_v37 = vcombine.high %v4143_v15, %v4147_v60  ;;  %v3991_v50 = vld [vmem:[#allocation8] sm:$0xff]  ;;  %v9178_v18 = vcombine.low %v4127_v36, %v4131_v56 }
 0x255   :  { %3911 = vmatprep.subr.bf16.mxu0 %v8857_v40  ;;  %v4135_v40 = vld [vmem:[#allocation8 + $0x480] sm:$0xff] }
 0x256   :  { %3953 = vmatpush2.bf16.msra.mxu1 %v8992_v34  ;;  %v4011_v34 = vld [vmem:[#allocation8 + $0xa0] sm:$0xff]  ;;  %v9187_v14 = vcombine.high %v4135_v40, %v4139_v41  ;;  %v9186_v54 = vcombine.low %v4135_v40, %v4139_v41 }
 0x257   :  { %3954 = vmatprep.subr.bf16.mxu1 %v8985_v44  ;;  %v9066_v44 = vcombine.low %v4015_v55, %v4019_v39  ;;  %v9059_v45 = vcombine.high %v4007_v38, %v4011_v34  ;;  %v4119_v24 = vld [vmem:[#allocation8 + $0x400] sm:$0xff] }
 0x258   :  { %3912 = vmatpush2.bf16.msra.mxu0 %v8856_v21  ;;  %v9058_v21 = vcombine.low %v4007_v38, %v4011_v34  ;;  %v4123_v27 = vld [vmem:[#allocation8 + $0x420] sm:$0xff] }
 0x259   :  { %7105 = vmatprep.subr.bf16.mxu0 %v9099_v58  ;;  %v9179_v58 = vcombine.high %v4127_v36, %v4131_v56  ;;  %v9171_v62 = vcombine.high %v4119_v24, %v4123_v27  ;;  %v4111_v1 = vld [vmem:[#allocation8 + $0x3c0] sm:$0xff]  ;;  %v9170_v6 = vcombine.low %v4119_v24, %v4123_v27 }
 0x25a   :  { %3955 = vmatpush2.bf16.msra.mxu1 %v8984_v23  ;;  %v9051_v23 = vcombine.high %v3999_v49, %v4003_v51  ;;  %v4115_v2 = vld [vmem:[#allocation8 + $0x3e0] sm:$0xff] }
 0x25b   :  { %7148 = vmatprep.subr.bf16.mxu1 %v9227_v42  ;;  %3914 = vmatmul.mubr.bf16.vlgmr.msra.gmra.mxu0 %v10089_v46  ;;  %v4027_v46 = vld [vmem:[#allocation8 + $0x120] sm:$0xff]  ;;  %v9163_v32 = vcombine.high %v4111_v1, %v4115_v2 }
 0x25c   :  { %7106 = vmatpush1.bf16.msra.mxu0 %v9098_v61  ;;  %7137 = vmatprep.mubr.bf16.mxu0 %v10199_v57  ;;  %v9075_v26 = vcombine.high %v4023_v19, %v4027_v46  ;;  %v9074_v31 = vcombine.low %v4023_v19, %v4027_v46  ;;  %v3995_v42 = vld [vmem:[#allocation8 + $0x20] sm:$0xff] }
 0x25d   :  { %3957 = vmatmul.mubr.bf16.vlgmr.msra.gmra.mxu1 %v10093_v47  ;;  %7107 = vmatprep.subr.bf16.mxu0 %v9091_v5  ;;  %v9210_v47 = vcombine.low %v4159_v8, %v4163_v10  ;;  %v9043_v61 = vcombine.high %v3991_v50, %v3995_v42  ;;  %v4243_v3 = vld [vmem:[#allocation8 + $0x7e0] sm:$0xff]  ;;  %v9042_v5 = vcombine.low %v3991_v50, %v3995_v42 }
 0x25e   :  { %7149 = vmatpush1.bf16.msra.mxu1 %v9226_v59  ;;  %7180 = vmatprep.mubr.bf16.mxu1 %v10202_v33  ;;  %v4239_v59 = vld [vmem:[#allocation8 + $0x7c0] sm:$0xff] }
 0x25f   :  { %7150 = vmatprep.subr.bf16.mxu1 %v9219_v7  ;;  %v9291_v7 = vcombine.high %v4239_v59, %v4243_v3  ;;  %v4103_v8 = vld [vmem:[#allocation8 + $0x380] sm:$0xff] }
 0x260   :  { %7108 = vmatpush1.bf16.msra.mxu0 %v9090_v53  ;;  %v4107_v10 = vld [vmem:[#allocation8 + $0x3a0] sm:$0xff] }
 0x261   :  { %7109 = vmatprep.subr.bf16.mxu0 %v9083_v17  ;;  %v4231_v53 = vld [vmem:[#allocation8 + $0x780] sm:$0xff]  ;;  %v9162_v17 = vcombine.low %v4111_v1, %v4115_v2  ;;  %v9155_v19 = vcombine.high %v4103_v8, %v4107_v10 }
 0x262   :  { %7151 = vmatpush1.bf16.msra.mxu1 %v9218_v11  ;;  %v4235_v11 = vld [vmem:[#allocation8 + $0x7a0] sm:$0xff] }
 0x263   :  { %7152 = vmatprep.subr.bf16.mxu1 %v9211_v9  ;;  %v9290_v9 = vcombine.low %v4239_v59, %v4243_v3  ;;  %v9283_v46 = vcombine.high %v4231_v53, %v4235_v11  ;;  %v4095_v20 = vld [vmem:[#allocation8 + $0x340] sm:$0xff]  ;;  %v10209_v59 = vpop.f32.mrf.mxu1 }
 0x264   :  { %7110 = vmatpush1.bf16.msra.mxu0 %v9082_v30  ;;  %v4099_v22 = vld [vmem:[#allocation8 + $0x360] sm:$0xff] }
 0x265   :  { %7111 = vmatprep.subr.bf16.mxu0 %v9075_v26  ;;  %v4223_v30 = vld [vmem:[#allocation8 + $0x740] sm:$0xff]  ;;  %v9154_v26 = vcombine.low %v4103_v8, %v4107_v10  ;;  %v9147_v55 = vcombine.high %v4095_v20, %v4099_v22  ;;  %v661_v8 = vsub.s32 5, %v10103_v4 }
 0x266   :  { %7153 = vmatpush1.bf16.msra.mxu1 %v9210_v47  ;;  %v4227_v47 = vld [vmem:[#allocation8 + $0x760] sm:$0xff] }
 0x267   :  { %7154 = vmatprep.subr.bf16.mxu1 %v9203_v29  ;;  %v9282_v29 = vcombine.low %v4231_v53, %v4235_v11  ;;  %v9275_v39 = vcombine.high %v4223_v30, %v4227_v47  ;;  %v4087_v15 = vld [vmem:[#allocation8 + $0x300] sm:$0xff] }
 0x268   :  { %7112 = vmatpush1.bf16.msra.mxu0 %v9074_v31  ;;  %v4091_v60 = vld [vmem:[#allocation8 + $0x320] sm:$0xff] }
 0x269   :  { %7113 = vmatprep.subr.bf16.mxu0 %v9067_v12  ;;  %v4215_v31 = vld [vmem:[#allocation8 + $0x700] sm:$0xff]  ;;  %v9146_v12 = vcombine.low %v4095_v20, %v4099_v22  ;;  %v9139_v38 = vcombine.high %v4087_v15, %v4091_v60 }
 0x26a   :  { %7155 = vmatpush1.bf16.msra.mxu1 %v9202_v35  ;;  %v4219_v35 = vld [vmem:[#allocation8 + $0x720] sm:$0xff] }
 0x26b   :  { %7156 = vmatprep.subr.bf16.mxu1 %v9195_v37  ;;  %v9274_v37 = vcombine.low %v4223_v30, %v4227_v47  ;;  %v9267_v34 = vcombine.high %v4215_v31, %v4219_v35  ;;  %v4079_v40 = vld [vmem:[#allocation8 + $0x2c0] sm:$0xff]  ;;  %v662_v47 = vrot.slane %v10177_v25, %v661_v8 }
 0x26c   :  { %7114 = vmatpush1.bf16.msra.mxu0 %v9066_v44  ;;  %v4083_v41 = vld [vmem:[#allocation8 + $0x2e0] sm:$0xff] }
 0x26d   :  { %7115 = vmatprep.subr.bf16.mxu0 %v9059_v45  ;;  %v4207_v44 = vld [vmem:[#allocation8 + $0x6c0] sm:$0xff]  ;;  %v9138_v45 = vcombine.low %v4087_v15, %v4091_v60  ;;  %v9131_v49 = vcombine.high %v4079_v40, %v4083_v41 }
 0x26e   :  { %7157 = vmatpush1.bf16.msra.mxu1 %v9194_v43  ;;  %v4211_v43 = vld [vmem:[#allocation8 + $0x6e0] sm:$0xff] }
 0x26f   :  { %7158 = vmatprep.subr.bf16.mxu1 %v9187_v14  ;;  %v9266_v14 = vcombine.low %v4215_v31, %v4219_v35  ;;  %v9259_v51 = vcombine.high %v4207_v44, %v4211_v43  ;;  %v4071_v36 = vld [vmem:[#allocation8 + $0x280] sm:$0xff] }
 0x270   :  { %7116 = vmatpush1.bf16.msra.mxu0 %v9058_v21  ;;  %v4075_v56 = vld [vmem:[#allocation8 + $0x2a0] sm:$0xff] }
 0x271   :  { %7117 = vmatprep.subr.bf16.mxu0 %v9051_v23  ;;  %v4199_v21 = vld [vmem:[#allocation8 + $0x680] sm:$0xff]  ;;  %v9130_v23 = vcombine.low %v4079_v40, %v4083_v41  ;;  %v9123_v50 = vcombine.high %v4071_v36, %v4075_v56 }
 0x272   :  { %7159 = vmatpush1.bf16.msra.mxu1 %v9186_v54  ;;  %v4203_v54 = vld [vmem:[#allocation8 + $0x6a0] sm:$0xff] }
 0x273   :  { %7160 = vmatprep.subr.bf16.mxu1 %v9179_v58  ;;  %v9258_v58 = vcombine.low %v4207_v44, %v4211_v43  ;;  %v9251_v42 = vcombine.high %v4199_v21, %v4203_v54  ;;  %v4063_v24 = vld [vmem:[#allocation8 + $0x240] sm:$0xff]  ;;  %v9250_v1 = vcombine.low %v4199_v21, %v4203_v54 }
 0x274   :  { %7118 = vmatpush1.bf16.msra.mxu0 %v9050_v63  ;;  %v4067_v27 = vld [vmem:[#allocation8 + $0x260] sm:$0xff] }
 0x275   :  { %7119 = vmatprep.subr.bf16.mxu0 %v9043_v61  ;;  %v4191_v63 = vld [vmem:[#allocation8 + $0x640] sm:$0xff]  ;;  %v9122_v61 = vcombine.low %v4071_v36, %v4075_v56  ;;  %v9115_v2 = vcombine.high %v4063_v24, %v4067_v27  ;;  %v9114_v10 = vcombine.low %v4063_v24, %v4067_v27 }
 0x276   :  { %7161 = vmatpush1.bf16.msra.mxu1 %v9178_v18  ;;  %v4195_v18 = vld [vmem:[#allocation8 + $0x660] sm:$0xff] }
 0x277   :  { %7162 = vmatprep.subr.bf16.mxu1 %v9171_v62  ;;  %v10207_v62 = vpop.f32.mrf.mxu0  ;;  %v9243_v3 = vcombine.high %v4191_v63, %v4195_v18  ;;  %v9242_v11 = vcombine.low %v4191_v63, %v4195_v18  ;;  %v4307_v20 = vld [vmem:[#allocation8 + $0x9e0] sm:$0xff] }
 0x278   :  { %7120 = vmatpush1.bf16.msra.mxu0 %v9042_v5  ;;  %v4055_v5 = vld [vmem:[#allocation8 + $0x200] sm:$0xff] }
 0x279   :  { %7121 = vmatprep.subr.bf16.mxu0 %v9163_v32  ;;  %v4183_v32 = vld [vmem:[#allocation8 + $0x600] sm:$0xff]  ;;  %v3659_v53 = vpop.f32.mrf.mxu0 }
 0x27a   :  { %7163 = vmatpush1.bf16.msra.mxu1 %v9170_v6  ;;  %v4059_v6 = vld [vmem:[#allocation8 + $0x220] sm:$0xff] }
 0x27b   :  { %7164 = vmatprep.subr.bf16.mxu1 %v9291_v7  ;;  %v4187_v7 = vld [vmem:[#allocation8 + $0x620] sm:$0xff] }
 0x27c   :  { %7122 = vmatpush2.bf16.msra.mxu0 %v9162_v17  ;;  %v9107_v17 = vcombine.high %v4055_v5, %v4059_v6  ;;  %v4431_v22 = vld [vmem:[#allocation8 + $0xdc0] sm:$0xff] }
 0x27d   :  { %7123 = vmatprep.subr.bf16.mxu0 %v9155_v19  ;;  %v9235_v19 = vcombine.high %v4183_v32, %v4187_v7  ;;  %v4435_v30 = vld [vmem:[#allocation8 + $0xde0] sm:$0xff] }
 0x27e   :  { %7165 = vmatpush2.bf16.msra.mxu1 %v9290_v9  ;;  %v3702_v9 = vpop.f32.mrf.mxu1  ;;  %v4295_v60 = vld [vmem:[#allocation8 + $0x980] sm:$0xff]  ;;  %v9483_v35 = vcombine.high %v4431_v22, %v4435_v30  ;;  %v9482_v44 = vcombine.low %v4431_v22, %v4435_v30 }
 0x27f   :  { %7166 = vmatprep.subr.bf16.mxu1 %v9283_v46  ;;  %v4303_v46 = vld [vmem:[#allocation8 + $0x9c0] sm:$0xff] }
 0x280   :  { %7124 = vmatpush2.bf16.msra.mxu0 %v9154_v26  ;;  %v9106_v26 = vcombine.low %v4055_v5, %v4059_v6  ;;  %v10217_v15 = vpop.f32.mrf.mxu1  ;;  %v4299_v31 = vld [vmem:[#allocation8 + $0x9a0] sm:$0xff] }
 0x281   :  { %7125 = vmatprep.subr.bf16.mxu0 %v9147_v55  ;;  %v9234_v55 = vcombine.low %v4183_v32, %v4187_v7  ;;  %v9347_v41 = vcombine.high %v4295_v60, %v4299_v31  ;;  %v4415_v36 = vld [vmem:[#allocation8 + $0xd40] sm:$0xff] }
 0x282   :  { %7167 = vmatpush2.bf16.msra.mxu1 %v9282_v29  ;;  %v10215_v29 = vpop.f32.mrf.mxu0  ;;  %v3706_v43 = vpop.f32.mrf.mxu1  ;;  %v4419_v56 = vld [vmem:[#allocation8 + $0xd60] sm:$0xff] }
 0x283   :  { %7168 = vmatprep.subr.bf16.mxu1 %v9275_v39  ;;  %v9355_v39 = vcombine.high %v4303_v46, %v4307_v20  ;;  %v4279_v18 = vld [vmem:[#allocation8 + $0x900] sm:$0xff] }
 0x284   :  { %7126 = vmatpush2.bf16.msra.mxu0 %v9146_v12  ;;  %v4423_v12 = vld [vmem:[#allocation8 + $0xd80] sm:$0xff]  ;;  %v3663_v40 = vpop.f32.mrf.mxu0 }
 0x285   :  { %7127 = vmatprep.subr.bf16.mxu0 %v9139_v38  ;;  %v3660_v38 = vadd.f32 %v3659_v53, %v662_v47  ;;  %v3664_v54 = vadd.f32 %v3663_v40, %v662_v47  ;;  %v4411_v5 = vld [vmem:[#allocation8 + $0xd20] sm:$0xff] }
 0x286   :  { %7169 = vmatpush2.bf16.msra.mxu1 %v9274_v37  ;;  %v4427_v37 = vld [vmem:[#allocation8 + $0xda0] sm:$0xff] }
 0x287   :  { %7170 = vmatprep.subr.bf16.mxu1 %v9267_v34  ;;  %v9354_v34 = vcombine.low %v4303_v46, %v4307_v20  ;;  %v3703_v21 = vadd.f32 %v3702_v9, %v3660_v38  ;;  %v9474_v24 = vcombine.low %v4423_v12, %v4427_v37  ;;  %v3707_v6 = vadd.f32 %v3706_v43, %v3664_v54  ;;  %v4275_v46 = vld [vmem:[#allocation8 + $0x8e0] sm:$0xff] }
 0x288   :  { %7128 = vmatpush2.bf16.msra.mxu0 %v9138_v45  ;;  %v4287_v45 = vld [vmem:[#allocation8 + $0x940] sm:$0xff] }
 0x289   :  { %7129 = vmatprep.subr.bf16.mxu0 %v9131_v49  ;;  %v9475_v49 = vcombine.high %v4423_v12, %v4427_v37  ;;  %v4399_v30 = vld [vmem:[#allocation8 + $0xcc0] sm:$0xff] }
 0x28a   :  { %7171 = vmatpush2.bf16.msra.mxu1 %v9266_v14  ;;  %v4291_v14 = vld [vmem:[#allocation8 + $0x960] sm:$0xff] }
 0x28b   :  { %7172 = vmatprep.subr.bf16.mxu1 %v9259_v51  ;;  %v9338_v7 = vcombine.low %v4287_v45, %v4291_v14  ;;  %v4403_v47 = vld [vmem:[#allocation8 + $0xce0] sm:$0xff] }
 0x28c   :  { %7130 = vmatpush2.bf16.msra.mxu0 %v9130_v23  ;;  %v4263_v12 = vld [vmem:[#allocation8 + $0x880] sm:$0xff]  ;;  %v9451_v38 = vcombine.high %v4399_v30, %v4403_v47 }
 0x28d   :  { %7131 = vmatprep.subr.bf16.mxu0 %v9123_v50  ;;  %v4267_v37 = vld [vmem:[#allocation8 + $0x8a0] sm:$0xff] }
 0x28e   :  { %7173 = vmatpush2.bf16.msra.mxu1 %v9258_v58  ;;  %v9346_v58 = vcombine.low %v4295_v60, %v4299_v31  ;;  %v4395_v40 = vld [vmem:[#allocation8 + $0xca0] sm:$0xff]  ;;  %v9315_v43 = vcombine.high %v4263_v12, %v4267_v37 }
 0x28f   :  { %7174 = vmatprep.subr.bf16.mxu1 %v9251_v42  ;;  %v9339_v42 = vcombine.high %v4287_v45, %v4291_v14  ;;  %v9450_v45 = vcombine.low %v4399_v30, %v4403_v47  ;;  %v10231_v14 = vld [vmem:[#allocation8 + $0x5c8] sm:$0xff]  ;;  %v4363_v30 = vld [vmem:[#allocation8 + $0xba0] sm:$0xff] }
 0x290   :  { %7132 = vmatpush2.bf16.msra.mxu0 %v9122_v61  ;;  %v4283_v61 = vld [vmem:[#allocation8 + $0x920] sm:$0xff] }
 0x291   :  { %7133 = vmatprep.subr.bf16.mxu0 %v9115_v2  ;;  %v9331_v53 = vcombine.high %v4279_v18, %v4283_v61 }
 0x292   :  { %7175 = vmatpush2.bf16.msra.mxu1 %v9250_v1  ;;  %v9467_v1 = vcombine.high %v4415_v36, %v4419_v56 }
 0x293   :  { %7176 = vmatprep.subr.bf16.mxu1 %v9243_v3  ;;  %v4407_v3 = vld [vmem:[#allocation8 + $0xd00] sm:$0xff] }
 0x294   :  { %7134 = vmatpush2.bf16.msra.mxu0 %v9114_v10  ;;  %v9459_v20 = vcombine.high %v4407_v3, %v4411_v5  ;;  %v9458_v60 = vcombine.low %v4407_v3, %v4411_v5  ;;  %v4379_v3 = vld [vmem:[#allocation8 + $0xc20] sm:$0xff] }
 0x295   :  { %7135 = vmatprep.subr.bf16.mxu0 %v9107_v17 }
 0x296   :  { %7177 = vmatpush2.bf16.msra.mxu1 %v9242_v11  ;;  %v9466_v11 = vcombine.low %v4415_v36, %v4419_v56  ;;  %v4255_v36 = vld [vmem:[#allocation8 + $0x840] sm:$0xff] }
 0x297   :  { %7178 = vmatprep.subr.bf16.mxu1 %v9235_v19  ;;  %v4271_v19 = vld [vmem:[#allocation8 + $0x8c0] sm:$0xff] }
 0x298   :  { %7136 = vmatpush2.bf16.msra.mxu0 %v9106_v26  ;;  %v4259_v56 = vld [vmem:[#allocation8 + $0x860] sm:$0xff] }
 0x299   :  { %7191 = vmatprep.subr.bf16.mxu0 %v9355_v39  ;;  %v9323_v39 = vcombine.high %v4271_v19, %v4275_v46  ;;  %v9306_v5 = vcombine.low %v4255_v36, %v4259_v56 }
 0x29a   :  { %7179 = vmatpush2.bf16.msra.mxu1 %v9234_v55  ;;  %v9330_v55 = vcombine.low %v4279_v18, %v4283_v61  ;;  %v4251_v18 = vld [vmem:[#allocation8 + $0x820] sm:$0xff] }
 0x29b   :  { %7234 = vmatprep.subr.bf16.mxu1 %v9483_v35  ;;  %v10219_v51 = vpop.f32.mrf.mxu0  ;;  %7138 = vmatmul.mubr.bf16.vlgmr.msra.gmra.mxu0 %v10137_v28 }
 0x29c   :  { %7192 = vmatpush1.bf16.msra.mxu0 %v9354_v34  ;;  %v4391_v34 = vld [vmem:[#allocation8 + $0xc80] sm:$0xff] }
 0x29d   :  { %v10222_v23 = vpop.f32.mrf.mxu1  ;;  %7181 = vmatmul.mubr.bf16.vlgmr.msra.gmra.mxu1 %v10173_v16  ;;  %v3745_v50 = vpop.f32.mrf.mxu0  ;;  %7193 = vmatprep.subr.bf16.mxu0 %v9347_v41 }
 0x29e   :  { %7235 = vmatpush1.bf16.msra.mxu1 %v9482_v44  ;;  %v3746_v27 = vadd.f32 %v3745_v50, %v3703_v21  ;;  %v9322_v44 = vcombine.low %v4271_v19, %v4275_v46  ;;  %v9443_v21 = vcombine.high %v4391_v34, %v4395_v40  ;;  %v4387_v50 = vld [vmem:[#allocation8 + $0xc60] sm:$0xff] }
 0x29f   :  { %v3788_v63 = vpop.f32.mrf.mxu1  ;;  %7236 = vmatprep.subr.bf16.mxu1 %v9475_v49  ;;  %v10225_v2 = vpop.f32.mrf.mxu0  ;;  %v10233_v49 = vld [vmem:[#allocation8 + $0x5e8] sm:$0xff] }
 0x2a0   :  { %7194 = vmatpush1.bf16.msra.mxu0 %v9346_v58  ;;  %v3789_v17 = vadd.f32 %v3788_v63, %v3746_v27  ;;  %v9228_v54 = vcombine.low %v10231_v14, %v10233_v49  ;;  %v4383_v58 = vld [vmem:[#allocation8 + $0xc40] sm:$0xff]  ;;  %v9442_v27 = vcombine.low %v4391_v34, %v4395_v40 }
 0x2a1   :  { %v10227_v32 = vpop.f32.mrf.mxu1  ;;  %v3749_v10 = vpop.f32.mrf.mxu0  ;;  %7195 = vmatprep.subr.bf16.mxu0 %v9339_v42  ;;  %v9314_v42 = vcombine.low %v4263_v12, %v4267_v37  ;;  %v4247_v63 = vld [vmem:[#allocation8 + $0x800] sm:$0xff]  ;;  %v9435_v61 = vcombine.high %v4383_v58, %v4387_v50 }
 0x2a2   :  { %7237 = vmatpush1.bf16.msra.mxu1 %v9474_v24  ;;  %v3750_v9 = vadd.f32 %v3749_v10, %v3707_v6  ;;  %v3972_v31 = vmax.f32 %v3789_v17, 0.0  ;;  %v9307_v24 = vcombine.high %v4255_v36, %v4259_v56  ;;  %v9299_v6 = vcombine.high %v4247_v63, %v4251_v18  ;;  %v4367_v10 = vld [vmem:[#allocation8 + $0xbc0] sm:$0xff] }
 0x2a3   :  { %7238 = vmatprep.subr.bf16.mxu1 %v9467_v1  ;;  %v3792_v22 = vpop.f32.mrf.mxu1  ;;  %v4375_v1 = vld [vmem:[#allocation8 + $0xc00] sm:$0xff]  ;;  %v9298_v19 = vcombine.low %v4247_v63, %v4251_v18 }
 0x2a4   :  { %v3793_v26 = vadd.f32 %v3792_v22, %v3750_v9  ;;  %7196 = vmatpush1.bf16.msra.mxu0 %v9338_v7  ;;  %v9434_v7 = vcombine.low %v4383_v58, %v4387_v50  ;;  %v4495_v17 = vld [vmem:[#allocation8 + $0xfc0] sm:$0xff] }
 0x2a5   :  { %7197 = vmatprep.subr.bf16.mxu0 %v9331_v53  ;;  %v4371_v53 = vld [vmem:[#allocation8 + $0xbe0] sm:$0xff] }
 0x2a6   :  { %7239 = vmatpush1.bf16.msra.mxu1 %v9466_v11  ;;  %v3980_v35 = vmax.f32 %v3793_v26, 0.0  ;;  %v9427_v11 = vcombine.high %v4375_v1, %v4379_v3  ;;  %v4499_v9 = vld [vmem:[#allocation8 + $0xfe0] sm:$0xff]  ;;  %v9419_v46 = vcombine.high %v4367_v10, %v4371_v53 }
 0x2a7   :  { %7240 = vmatprep.subr.bf16.mxu1 %v9459_v20  ;;  %v9426_v20 = vcombine.low %v4375_v1, %v4379_v3  ;;  %v4359_v22 = vld [vmem:[#allocation8 + $0xb80] sm:$0xff]  ;;  %v9547_v47 = vcombine.high %v4495_v17, %v4499_v9 }
 0x2a8   :  { %v10229_v41 = vpack.c.bf16 %v3980_v35, %v3972_v31  ;;  %7198 = vmatpush1.bf16.msra.mxu0 %v9330_v55  ;;  %v4487_v26 = vld [vmem:[#allocation8 + $0xf80] sm:$0xff]  ;;  %v9546_v31 = vcombine.low %v4495_v17, %v4499_v9  ;;  %v9410_v40 = vcombine.low %v4359_v22, %v4363_v30 }
 0x2a9   :  { %7199 = vmatprep.subr.bf16.mxu0 %v9323_v39  ;;  %v4491_v55 = vld [vmem:[#allocation8 + $0xfa0] sm:$0xff]  ;;  %v9418_v39 = vcombine.low %v4367_v10, %v4371_v53 }
 0x2aa   :  { %7241 = vmatpush1.bf16.msra.mxu1 %v9458_v60  ;;  %7223 = vmatprep.mubr.bf16.mxu0 %v10229_v41  ;;  %v9411_v60 = vcombine.high %v4359_v22, %v4363_v30  ;;  %v4351_v35 = vld [vmem:[#allocation8 + $0xb40] sm:$0xff]  ;;  %v9539_v37 = vcombine.high %v4487_v26, %v4491_v55 }
 0x2ab   :  { %7242 = vmatprep.subr.bf16.mxu1 %v9451_v38  ;;  %v4355_v12 = vld [vmem:[#allocation8 + $0xb60] sm:$0xff] }
 0x2ac   :  { %7200 = vmatpush1.bf16.msra.mxu0 %v9322_v44  ;;  %v4479_v38 = vld [vmem:[#allocation8 + $0xf40] sm:$0xff]  ;;  %v9403_v44 = vcombine.high %v4351_v35, %v4355_v12  ;;  %v9402_v50 = vcombine.low %v4351_v35, %v4355_v12 }
 0x2ad   :  { %7201 = vmatprep.subr.bf16.mxu0 %v9315_v43  ;;  %v4483_v34 = vld [vmem:[#allocation8 + $0xf60] sm:$0xff]  ;;  %v9538_v43 = vcombine.low %v4487_v26, %v4491_v55 }
 0x2ae   :  { %7243 = vmatpush1.bf16.msra.mxu1 %v9450_v45  ;;  %v4343_v45 = vld [vmem:[#allocation8 + $0xb00] sm:$0xff]  ;;  %v9531_v56 = vcombine.high %v4479_v38, %v4483_v34 }
 0x2af   :  { %7244 = vmatprep.subr.bf16.mxu1 %v9443_v21  ;;  %v4347_v36 = vld [vmem:[#allocation8 + $0xb20] sm:$0xff] }
 0x2b0   :  { %7202 = vmatpush1.bf16.msra.mxu0 %v9314_v42  ;;  %v4471_v21 = vld [vmem:[#allocation8 + $0xf00] sm:$0xff]  ;;  %v657_v42 = vsub.s32 4, %v10103_v4 }
 0x2b1   :  { %7203 = vmatprep.subr.bf16.mxu0 %v9307_v24  ;;  %v4475_v58 = vld [vmem:[#allocation8 + $0xf20] sm:$0xff]  ;;  %v9395_v24 = vcombine.high %v4343_v45, %v4347_v36 }
 0x2b2   :  { %7245 = vmatpush1.bf16.msra.mxu1 %v9442_v27  ;;  %v9530_v27 = vcombine.low %v4479_v38, %v4483_v34  ;;  %v4335_v63 = vld [vmem:[#allocation8 + $0xac0] sm:$0xff]  ;;  %v9522_v10 = vcombine.low %v4471_v21, %v4475_v58 }
 0x2b3   :  { %7246 = vmatprep.subr.bf16.mxu1 %v9435_v61  ;;  %v4339_v18 = vld [vmem:[#allocation8 + $0xae0] sm:$0xff]  ;;  %v9523_v61 = vcombine.high %v4471_v21, %v4475_v58  ;;  %v4052_v21 = vld [vmem:[#allocation8 + $0x1e8] sm:$0xff] }
 0x2b4   :  { %7204 = vmatpush1.bf16.msra.mxu0 %v9306_v5  ;;  %v4463_v1 = vld [vmem:[#allocation8 + $0xec0] sm:$0xff]  ;;  %v9394_v5 = vcombine.low %v4343_v45, %v4347_v36 }
 0x2b5   :  { %7205 = vmatprep.subr.bf16.mxu0 %v9299_v6  ;;  %v4467_v3 = vld [vmem:[#allocation8 + $0xee0] sm:$0xff]  ;;  %v658_v6 = vrot.slane %v10177_v25, %v657_v42 }
 0x2b6   :  { %7247 = vmatpush1.bf16.msra.mxu1 %v9434_v7  ;;  %v9387_v7 = vcombine.high %v4335_v63, %v4339_v18  ;;  %v4327_v53 = vld [vmem:[#allocation8 + $0xa80] sm:$0xff]  ;;  %v9515_v17 = vcombine.high %v4463_v1, %v4467_v3  ;;  %v9514_v26 = vcombine.low %v4463_v1, %v4467_v3 }
 0x2b7   :  { %7248 = vmatprep.subr.bf16.mxu1 %v9427_v11  ;;  %v4331_v11 = vld [vmem:[#allocation8 + $0xaa0] sm:$0xff]  ;;  %v3662_v9 = vadd.f32 %v10215_v29, %v658_v6  ;;  %v3658_v22 = vadd.f32 %v10207_v62, %v658_v6  ;;  %v4032_v6 = vld [vmem:[#allocation8 + $0x148] sm:$0xff] }
 0x2b8   :  { %7206 = vmatpush1.bf16.msra.mxu0 %v9298_v19  ;;  %v4455_v19 = vld [vmem:[#allocation8 + $0xe80] sm:$0xff]  ;;  %v9379_v30 = vcombine.high %v4327_v53, %v4331_v11  ;;  %v9378_v29 = vcombine.low %v4327_v53, %v4331_v11  ;;  %v4024_v11 = vld [vmem:[#allocation8 + $0x108] sm:$0xff] }
 0x2b9   :  { %7207 = vmatprep.subr.bf16.mxu0 %v9419_v46  ;;  %v4459_v46 = vld [vmem:[#allocation8 + $0xea0] sm:$0xff]  ;;  %v3701_v12 = vadd.f32 %v10209_v59, %v3658_v22 }
 0x2ba   :  { %7249 = vmatpush1.bf16.msra.mxu1 %v9426_v20  ;;  %v9386_v20 = vcombine.low %v4335_v63, %v4339_v18  ;;  %v4323_v25 = vld [vmem:[#allocation8 + $0xa60] sm:$0xff]  ;;  %v9507_v55 = vcombine.high %v4455_v19, %v4459_v46  ;;  %v9506_v62 = vcombine.low %v4455_v19, %v4459_v46  ;;  %v4040_v18 = vld [vmem:[#allocation8 + $0x188] sm:$0xff] }
 0x2bb   :  { %7250 = vmatprep.subr.bf16.mxu1 %v9547_v47  ;;  %v4319_v47 = vld [vmem:[#allocation8 + $0xa40] sm:$0xff]  ;;  %v4016_v46 = vld [vmem:[#allocation8 + $0xc8] sm:$0xff] }
 0x2bc   :  { %7208 = vmatpush2.bf16.msra.mxu0 %v9418_v39  ;;  %v3705_v39 = vadd.f32 %v10217_v15, %v3662_v9  ;;  %v9371_v35 = vcombine.high %v4319_v47, %v4323_v25  ;;  %v4311_v38 = vld [vmem:[#allocation8 + $0xa00] sm:$0xff]  ;;  %v9370_v45 = vcombine.low %v4319_v47, %v4323_v25  ;;  %v4008_v47 = vld [vmem:[#allocation8 + $0x88] sm:$0xff] }
 0x2bd   :  { %7209 = vmatprep.subr.bf16.mxu0 %v9411_v60  ;;  %v4447_v60 = vld [vmem:[#allocation8 + $0xe40] sm:$0xff]  ;;  %v4012_v25 = vld [vmem:[#allocation8 + $0xa8] sm:$0xff] }
 0x2be   :  { %7251 = vmatpush2.bf16.msra.mxu1 %v9546_v31  ;;  %v4451_v31 = vld [vmem:[#allocation8 + $0xe60] sm:$0xff] }
 0x2bf   :  { %7252 = vmatprep.subr.bf16.mxu1 %v9539_v37  ;;  %v3748_v37 = vadd.f32 %v10225_v2, %v3705_v39  ;;  %v4315_v34 = vld [vmem:[#allocation8 + $0xa20] sm:$0xff]  ;;  %v9498_v59 = vcombine.low %v4447_v60, %v4451_v31  ;;  %v4048_v2 = vld [vmem:[#allocation8 + $0x1c8] sm:$0xff] }
 0x2c0   :  { %7210 = vmatpush2.bf16.msra.mxu0 %v9410_v40  ;;  %v9499_v40 = vcombine.high %v4447_v60, %v4451_v31  ;;  %v4443_v15 = vld [vmem:[#allocation8 + $0xe20] sm:$0xff]  ;;  %v9100_v3 = vcombine.low %v4048_v2, %v4052_v21  ;;  %v4000_v39 = vld [vmem:[#allocation8 + $0x48] sm:$0xff]  ;;  %v9060_v31 = vcombine.low %v4008_v47, %v4012_v25 }
 0x2c1   :  { %7211 = vmatprep.subr.bf16.mxu0 %v9403_v44  ;;  %v3744_v44 = vadd.f32 %v10219_v51, %v3701_v12  ;;  %v3791_v36 = vadd.f32 %v10227_v32, %v3748_v37  ;;  %v9101_v51 = vcombine.high %v4048_v2, %v4052_v21  ;;  %v9229_v32 = vcombine.high %v10231_v14, %v10233_v49  ;;  %v4004_v60 = vld [vmem:[#allocation8 + $0x68] sm:$0xff] }
 0x2c2   :  { %7253 = vmatpush2.bf16.msra.mxu1 %v9538_v43  ;;  %v4439_v43 = vld [vmem:[#allocation8 + $0xe00] sm:$0xff]  ;;  %v3996_v12 = vld [vmem:[#allocation8 + $0x28] sm:$0xff]  ;;  %v9052_v37 = vcombine.low %v4000_v39, %v4004_v60 }
 0x2c3   :  { %7254 = vmatprep.subr.bf16.mxu1 %v9531_v56  ;;  %v9363_v56 = vcombine.high %v4311_v38, %v4315_v34  ;;  %v9491_v58 = vcombine.high %v4439_v43, %v4443_v15  ;;  %v9490_v63 = vcombine.low %v4439_v43, %v4443_v15  ;;  %v4104_v43 = vld [vmem:[#allocation8 + $0x388] sm:$0xff] }
 0x2c4   :  { %7212 = vmatpush2.bf16.msra.mxu0 %v9402_v50  ;;  %v3787_v50 = vadd.f32 %v10222_v23, %v3744_v44  ;;  %v4108_v15 = vld [vmem:[#allocation8 + $0x3a8] sm:$0xff] }
 0x2c5   :  { %7213 = vmatprep.subr.bf16.mxu0 %v9395_v24  ;;  %v9362_v24 = vcombine.low %v4311_v38, %v4315_v34  ;;  %v4112_v38 = vld [vmem:[#allocation8 + $0x3c8] sm:$0xff]  ;;  %v9156_v2 = vcombine.low %v4104_v43, %v4108_v15 }
 0x2c6   :  { %7255 = vmatpush2.bf16.msra.mxu1 %v9530_v27  ;;  %v3979_v27 = vmax.f32 %v3791_v36, 0.0  ;;  %v3971_v1 = vmax.f32 %v3787_v50, 0.0  ;;  %v4116_v34 = vld [vmem:[#allocation8 + $0x3e8] sm:$0xff]  ;;  %v9157_v36 = vcombine.high %v4104_v43, %v4108_v15 }
 0x2c7   :  { %7256 = vmatprep.subr.bf16.mxu1 %v9523_v61  ;;  %v4044_v61 = vld [vmem:[#allocation8 + $0x1a8] sm:$0xff]  ;;  %v9165_v44 = vcombine.high %v4112_v38, %v4116_v34 }
 0x2c8   :  { %7214 = vmatpush2.bf16.msra.mxu0 %v9394_v5  ;;  %v10252_v5 = vpack.c.bf16 %v3979_v27, %v3971_v1  ;;  %v9093_v23 = vcombine.high %v4040_v18, %v4044_v61  ;;  %v4092_v50 = vld [vmem:[#allocation8 + $0x328] sm:$0xff] }
 0x2c9   :  { %7215 = vmatprep.subr.bf16.mxu0 %v9387_v7  ;;  %v4036_v7 = vld [vmem:[#allocation8 + $0x168] sm:$0xff] }
 0x2ca   :  { %7257 = vmatpush2.bf16.msra.mxu1 %v9522_v10  ;;  %v9092_v10 = vcombine.low %v4040_v18, %v4044_v61  ;;  %v9085_v53 = vcombine.high %v4032_v6, %v4036_v7  ;;  %v9084_v9 = vcombine.low %v4032_v6, %v4036_v7  ;;  %v4076_v1 = vld [vmem:[#allocation8 + $0x2a8] sm:$0xff] }
 0x2cb   :  { %7258 = vmatprep.subr.bf16.mxu1 %v9515_v17  ;;  %v4028_v17 = vld [vmem:[#allocation8 + $0x128] sm:$0xff] }
 0x2cc   :  { %7216 = vmatpush2.bf16.msra.mxu0 %v9386_v20  ;;  %v9077_v19 = vcombine.high %v4024_v11, %v4028_v17  ;;  %v4020_v20 = vld [vmem:[#allocation8 + $0xe8] sm:$0xff]  ;;  %v9076_v22 = vcombine.low %v4024_v11, %v4028_v17 }
 0x2cd   :  { %7217 = vmatprep.subr.bf16.mxu0 %v9379_v30  ;;  %v9069_v30 = vcombine.high %v4016_v46, %v4020_v20  ;;  %v4064_v6 = vld [vmem:[#allocation8 + $0x248] sm:$0xff] }
 0x2ce   :  { %7259 = vmatpush2.bf16.msra.mxu1 %v9514_v26  ;;  %v9068_v26 = vcombine.low %v4016_v46, %v4020_v20  ;;  %v4068_v7 = vld [vmem:[#allocation8 + $0x268] sm:$0xff]  ;;  %v669_v46 = vsub.s32 7, %v10103_v4 }
 0x2cf   :  { %7260 = vmatprep.subr.bf16.mxu1 %v9507_v55  ;;  %v9061_v55 = vcombine.high %v4008_v47, %v4012_v25  ;;  %v9117_v11 = vcombine.high %v4064_v6, %v4068_v7  ;;  %v9116_v20 = vcombine.low %v4064_v6, %v4068_v7 }
 0x2d0   :  { %7218 = vmatpush2.bf16.msra.mxu0 %v9378_v29  ;;  %v9053_v29 = vcombine.high %v4000_v39, %v4004_v60  ;;  %v9786_v39 = vld [vmem:[#allocation7] sm:$0xff] }
 0x2d1   :  { %7219 = vmatprep.subr.bf16.mxu0 %v9371_v35  ;;  %v3992_v35 = vld [vmem:[#allocation8 + $0x8] sm:$0xff]  ;;  %v670_v60 = vrot.slane %v9786_v39, %v669_v46 }
 0x2d2   :  { %7261 = vmatpush2.bf16.msra.mxu1 %v9506_v62  ;;  %v9045_v62 = vcombine.high %v3992_v35, %v3996_v12 }
 0x2d3   :  { %7262 = vmatprep.subr.bf16.mxu1 %v9499_v40  ;;  %v9044_v40 = vcombine.low %v3992_v35, %v3996_v12 }
 0x2d4   :  { %7220 = vmatpush2.bf16.msra.mxu0 %v9370_v45  ;;  %v9164_v45 = vcombine.low %v4112_v38, %v4116_v34  ;;  %v4300_v38 = vld [vmem:[#allocation8 + $0x9a8] sm:$0xff] }
 0x2d5   :  { %7221 = vmatprep.subr.bf16.mxu0 %v9363_v56  ;;  %v4096_v56 = vld [vmem:[#allocation8 + $0x348] sm:$0xff] }
 0x2d6   :  { %7263 = vmatpush2.bf16.msra.mxu1 %v9498_v59  ;;  %v4100_v59 = vld [vmem:[#allocation8 + $0x368] sm:$0xff] }
 0x2d7   :  { %7264 = vmatprep.subr.bf16.mxu1 %v9491_v58  ;;  %v9149_v21 = vcombine.high %v4096_v56, %v4100_v59  ;;  %v4088_v58 = vld [vmem:[#allocation8 + $0x308] sm:$0xff] }
 0x2d8   :  { %7222 = vmatpush2.bf16.msra.mxu0 %v9362_v24  ;;  %v9148_v24 = vcombine.low %v4096_v56, %v4100_v59  ;;  %v9141_v27 = vcombine.high %v4088_v58, %v4092_v50  ;;  %v9140_v18 = vcombine.low %v4088_v58, %v4092_v50  ;;  %v4288_v56 = vld [vmem:[#allocation8 + $0x948] sm:$0xff] }
 0x2d9   :  { %7277 = vmatprep.subr.bf16.mxu0 %v9101_v51  ;;  %v4080_v51 = vld [vmem:[#allocation8 + $0x2c8] sm:$0xff] }
 0x2da   :  { %7265 = vmatpush2.bf16.msra.mxu1 %v9490_v63  ;;  %v4084_v63 = vld [vmem:[#allocation8 + $0x2e8] sm:$0xff] }
 0x2db   :  { %7320 = vmatprep.subr.bf16.mxu1 %v9229_v32  ;;  %7224 = vmatmul.mubr.bf16.vlgmr.msra.gmra.mxu0 %v10252_v5  ;;  %v9133_v61 = vcombine.high %v4080_v51, %v4084_v63  ;;  %v4072_v32 = vld [vmem:[#allocation8 + $0x288] sm:$0xff] }
 0x2dc   :  { %7278 = vmatpush1.bf16.msra.mxu0 %v9100_v3  ;;  %7309 = vmatprep.mubr.bf16.mxu0 %v10199_v57  ;;  %v9132_v3 = vcombine.low %v4080_v51, %v4084_v63  ;;  %v4292_v59 = vld [vmem:[#allocation8 + $0x968] sm:$0xff] }
 0x2dd   :  { %7279 = vmatprep.subr.bf16.mxu0 %v9093_v23  ;;  %v9125_v23 = vcombine.high %v4072_v32, %v4076_v1  ;;  %v3872_v17 = vpop.f32.mrf.mxu1  ;;  %v9341_v63 = vcombine.high %v4288_v56, %v4292_v59 }
 0x2df   :  { %v3874_v25 = vpop.f32.mrf.mxu1 }
 0x2e0   :  { %7280 = vmatpush1.bf16.msra.mxu0 %v9092_v10  ;;  %v9124_v10 = vcombine.low %v4072_v32, %v4076_v1  ;;  %v4280_v1 = vld [vmem:[#allocation8 + $0x908] sm:$0xff] }
 0x2e1   :  { %7281 = vmatprep.subr.bf16.mxu0 %v9085_v53  ;;  %v3829_v53 = vpop.f32.mrf.mxu0 }
 0x2e4   :  { %7282 = vmatpush1.bf16.msra.mxu0 %v9084_v9  ;;  %v4056_v9 = vld [vmem:[#allocation8 + $0x208] sm:$0xff] }
 0x2e5   :  { %7283 = vmatprep.subr.bf16.mxu0 %v9077_v19  ;;  %v4060_v19 = vld [vmem:[#allocation8 + $0x228] sm:$0xff] }
 0x2e6   :  { %v9109_v47 = vcombine.high %v4056_v9, %v4060_v19 }
 0x2e8   :  { %7284 = vmatpush1.bf16.msra.mxu0 %v9076_v22  ;;  %v665_v22 = vsub.s32 6, %v10103_v4 }
 0x2e9   :  { %7285 = vmatprep.subr.bf16.mxu0 %v9069_v30  ;;  %v3831_v30 = vpop.f32.mrf.mxu0 }
 0x2ea   :  { %v3832_v34 = vadd.f32 %v3831_v30, %v670_v60 }
 0x2eb   :  { %v3833_v35 = vpop.f32.mrf.mxu0 }
 0x2ec   :  { %7286 = vmatpush1.bf16.msra.mxu0 %v9068_v26  ;;  %v4304_v26 = vld [vmem:[#allocation8 + $0x9c8] sm:$0xff] }
 0x2ed   :  { %7287 = vmatprep.subr.bf16.mxu0 %v9061_v55  ;;  %v4308_v55 = vld [vmem:[#allocation8 + $0x9e8] sm:$0xff]  ;;  %v3835_v43 = vpop.f32.mrf.mxu0 }
 0x2ee   :  { %v9357_v12 = vcombine.high %v4304_v26, %v4308_v55  ;;  %v3836_v58 = vadd.f32 %v3835_v43, %v670_v60 }
 0x2f0   :  { %7288 = vmatpush1.bf16.msra.mxu0 %v9060_v31  ;;  %v9108_v31 = vcombine.low %v4056_v9, %v4060_v19 }
 0x2f1   :  { %7289 = vmatprep.subr.bf16.mxu0 %v9053_v29  ;;  %v666_v29 = vrot.slane %v9786_v39, %v665_v22 }
 0x2f4   :  { %7290 = vmatpush1.bf16.msra.mxu0 %v9052_v37  ;;  %v3876_v37 = vpop.f32.mrf.mxu1 }
 0x2f5   :  { %7291 = vmatprep.subr.bf16.mxu0 %v9045_v62  ;;  %v4296_v62 = vld [vmem:[#allocation8 + $0x988] sm:$0xff] }
 0x2f6   :  { %v9349_v15 = vcombine.high %v4296_v62, %v4300_v38 }
 0x2f8   :  { %7292 = vmatpush1.bf16.msra.mxu0 %v9044_v40  ;;  %v9356_v40 = vcombine.low %v4304_v26, %v4308_v55 }
 0x2f9   :  { %7293 = vmatprep.subr.bf16.mxu0 %v9165_v44  ;;  %v3830_v44 = vadd.f32 %v3829_v53, %v666_v29 }
 0x2fc   :  { %7294 = vmatpush2.bf16.msra.mxu0 %v9164_v45  ;;  %v3834_v45 = vadd.f32 %v3833_v35, %v666_v29 }
 0x2fd   :  { %7295 = vmatprep.subr.bf16.mxu0 %v9157_v36  ;;  %v3878_v36 = vpop.f32.mrf.mxu1 }
 0x2fe   :  { %v3879_v7 = vadd.f32 %v3878_v36, %v3836_v58 }
 0x300   :  { %7296 = vmatpush2.bf16.msra.mxu0 %v9156_v2 }
 0x301   :  { %7297 = vmatprep.subr.bf16.mxu0 %v9149_v21  ;;  %v3875_v21 = vadd.f32 %v3874_v25, %v3832_v34  ;;  %v4276_v25 = vld [vmem:[#allocation8 + $0x8e8] sm:$0xff] }
 0x302   :  { %v4264_v34 = vld [vmem:[#allocation8 + $0x888] sm:$0xff] }
 0x304   :  { %7298 = vmatpush2.bf16.msra.mxu0 %v9148_v24  ;;  %v9348_v24 = vcombine.low %v4296_v62, %v4300_v38  ;;  %v4172_v62 = vld [vmem:[#allocation8 + $0x5a8] sm:$0xff] }
 0x305   :  { %7299 = vmatprep.subr.bf16.mxu0 %v9141_v27  ;;  %v3873_v27 = vadd.f32 %v3872_v17, %v3830_v44 }
 0x308   :  { %7300 = vmatpush2.bf16.msra.mxu0 %v9140_v18  ;;  %v3877_v18 = vadd.f32 %v3876_v37, %v3834_v45  ;;  %v4168_v37 = vld [vmem:[#allocation8 + $0x588] sm:$0xff] }
 0x309   :  { %7301 = vmatprep.subr.bf16.mxu0 %v9133_v61  ;;  %v9221_v45 = vcombine.high %v4168_v37, %v4172_v62  ;;  %v9220_v58 = vcombine.low %v4168_v37, %v4172_v62  ;;  %v4120_v62 = vld [vmem:[#allocation8 + $0x408] sm:$0xff] }
 0x30c   :  { %7302 = vmatpush2.bf16.msra.mxu0 %v9132_v3  ;;  %v4284_v3 = vld [vmem:[#allocation8 + $0x928] sm:$0xff] }
 0x30d   :  { %7303 = vmatprep.subr.bf16.mxu0 %v9125_v23  ;;  %v9333_v19 = vcombine.high %v4280_v1, %v4284_v3  ;;  %v9332_v60 = vcombine.low %v4280_v1, %v4284_v3  ;;  %v4148_v3 = vld [vmem:[#allocation8 + $0x4e8] sm:$0xff] }
 0x310   :  { %7304 = vmatpush2.bf16.msra.mxu0 %v9124_v10 }
 0x311   :  { %7305 = vmatprep.subr.bf16.mxu0 %v9117_v11  ;;  %v9340_v11 = vcombine.low %v4288_v56, %v4292_v59  ;;  %v4160_v56 = vld [vmem:[#allocation8 + $0x548] sm:$0xff] }
 0x312   :  { %v4164_v59 = vld [vmem:[#allocation8 + $0x568] sm:$0xff] }
 0x314   :  { %7306 = vmatpush2.bf16.msra.mxu0 %v9116_v20 }
 0x315   :  { %7307 = vmatprep.subr.bf16.mxu0 %v9109_v47  ;;  %v4272_v47 = vld [vmem:[#allocation8 + $0x8c8] sm:$0xff] }
 0x316   :  { %v9325_v29 = vcombine.high %v4272_v47, %v4276_v25 }
 0x318   :  { %7308 = vmatpush2.bf16.msra.mxu0 %v9108_v31 }
 0x319   :  { %7363 = vmatprep.subr.bf16.mxu0 %v9357_v12 }
 0x31b   :  { %v3915_v2 = vpop.f32.mrf.mxu0  ;;  %7310 = vmatmul.mubr.bf16.vlgmr.msra.gmra.mxu0 %v10137_v28 }
 0x31c   :  { %7364 = vmatpush1.bf16.msra.mxu0 %v9356_v40  ;;  %7395 = vmatprep.mubr.bf16.mxu0 %v10229_v41  ;;  %v3916_v23 = vadd.f32 %v3915_v2, %v3873_v27  ;;  %v4268_v40 = vld [vmem:[#allocation8 + $0x8a8] sm:$0xff] }
 0x31d   :  { %v3958_v50 = vpop.f32.mrf.mxu1  ;;  %v3917_v51 = vpop.f32.mrf.mxu0  ;;  %7365 = vmatprep.subr.bf16.mxu0 %v9349_v15  ;;  %v9324_v15 = vcombine.low %v4272_v47, %v4276_v25  ;;  %v9317_v36 = vcombine.high %v4264_v34, %v4268_v40  ;;  %v4256_v2 = vld [vmem:[#allocation8 + $0x848] sm:$0xff] }
 0x31e   :  { %v3918_v61 = vadd.f32 %v3917_v51, %v3875_v21  ;;  %v3959_v26 = vadd.f32 %v3958_v50, %v3916_v23  ;;  %v4260_v21 = vld [vmem:[#allocation8 + $0x868] sm:$0xff]  ;;  %v9316_v50 = vcombine.low %v4264_v34, %v4268_v40 }
 0x31f   :  { %v3960_v32 = vpop.f32.mrf.mxu1  ;;  %v3919_v6 = vpop.f32.mrf.mxu0  ;;  %v9309_v27 = vcombine.high %v4256_v2, %v4260_v21  ;;  %v4152_v51 = vld [vmem:[#allocation8 + $0x508] sm:$0xff]  ;;  %v9308_v1 = vcombine.low %v4256_v2, %v4260_v21 }
 0x320   :  { %v3920_v10 = vadd.f32 %v3919_v6, %v3877_v18  ;;  %7366 = vmatpush1.bf16.msra.mxu0 %v9348_v24  ;;  %v3961_v20 = vadd.f32 %v3960_v32, %v3918_v61  ;;  %v3973_v38 = vmax.f32 %v3959_v26, 0.0  ;;  %v9213_v24 = vcombine.high %v4160_v56, %v4164_v59  ;;  %v4248_v18 = vld [vmem:[#allocation8 + $0x808] sm:$0xff] }
 0x321   :  { %v3962_v53 = vpop.f32.mrf.mxu1  ;;  %v3921_v9 = vpop.f32.mrf.mxu0  ;;  %7367 = vmatprep.subr.bf16.mxu0 %v9341_v63  ;;  %v4156_v63 = vld [vmem:[#allocation8 + $0x528] sm:$0xff]  ;;  %v9212_v32 = vcombine.low %v4160_v56, %v4164_v59 }
 0x322   :  { %v3963_v17 = vadd.f32 %v3962_v53, %v3920_v10  ;;  %v3922_v30 = vadd.f32 %v3921_v9, %v3879_v7  ;;  %v3974_v35 = vmax.f32 %v3961_v20, 0.0  ;;  %v4252_v61 = vld [vmem:[#allocation8 + $0x828] sm:$0xff]  ;;  %v9205_v14 = vcombine.high %v4152_v51, %v4156_v63 }
 0x323   :  { %v3964_v55 = vpop.f32.mrf.mxu1  ;;  %v9301_v49 = vcombine.high %v4248_v18, %v4252_v61  ;;  %v4368_v23 = vld [vmem:[#allocation8 + $0xbc8] sm:$0xff]  ;;  %v9204_v7 = vcombine.low %v4152_v51, %v4156_v63  ;;  %v9300_v10 = vcombine.low %v4248_v18, %v4252_v61 }
 0x324   :  { %v3965_v39 = vadd.f32 %v3964_v55, %v3922_v30  ;;  %7368 = vmatpush1.bf16.msra.mxu0 %v9340_v11  ;;  %v3981_v31 = vmax.f32 %v3963_v17, 0.0  ;;  %v4372_v6 = vld [vmem:[#allocation8 + $0xbe8] sm:$0xff] }
 0x325   :  { %7369 = vmatprep.subr.bf16.mxu0 %v9333_v19  ;;  %v9421_v11 = vcombine.high %v4368_v23, %v4372_v6  ;;  %v4136_v9 = vld [vmem:[#allocation8 + $0x488] sm:$0xff]  ;;  %v9420_v47 = vcombine.low %v4368_v23, %v4372_v6 }
 0x326   :  { %v3982_v12 = vmax.f32 %v3965_v39, 0.0  ;;  %v10266_v43 = vpack.c.bf16 %v3981_v31, %v3973_v38  ;;  %v4140_v19 = vld [vmem:[#allocation8 + $0x4a8] sm:$0xff] }
 0x327   :  { %v4360_v20 = vld [vmem:[#allocation8 + $0xb88] sm:$0xff]  ;;  %v9189_v25 = vcombine.high %v4136_v9, %v4140_v19 }
 0x328   :  { %v10264_v44 = vpack.c.bf16 %v3982_v12, %v3974_v35  ;;  %7370 = vmatpush1.bf16.msra.mxu0 %v9332_v60  ;;  %v4364_v17 = vld [vmem:[#allocation8 + $0xba8] sm:$0xff] }
 0x329   :  { %7371 = vmatprep.subr.bf16.mxu0 %v9325_v29  ;;  %v9413_v26 = vcombine.high %v4360_v20, %v4364_v17  ;;  %v4128_v55 = vld [vmem:[#allocation8 + $0x448] sm:$0xff]  ;;  %v9188_v29 = vcombine.low %v4136_v9, %v4140_v19  ;;  %v9412_v35 = vcombine.low %v4360_v20, %v4364_v17 }
 0x32a   :  { %7266 = vmatprep.mubr.bf16.mxu1 %v10264_v44  ;;  %v4132_v39 = vld [vmem:[#allocation8 + $0x468] sm:$0xff] }
 0x32b   :  { %7267 = vmatmul.mubr.bf16.vlgmr.msra.gmra.mxu1 %v10266_v43  ;;  %v4352_v60 = vld [vmem:[#allocation8 + $0xb48] sm:$0xff]  ;;  %v9181_v12 = vcombine.high %v4128_v55, %v4132_v39 }
 0x32c   :  { %7321 = vmatpush1.bf16.msra.mxu1 %v9228_v54  ;;  %7352 = vmatprep.mubr.bf16.mxu1 %v10202_v33  ;;  %v4144_v54 = vld [vmem:[#allocation8 + $0x4c8] sm:$0xff] }
 0x32d   :  { %7372 = vmatpush1.bf16.msra.mxu0 %v9324_v15  ;;  %7322 = vmatprep.subr.bf16.mxu1 %v9221_v45  ;;  %v9197_v53 = vcombine.high %v4144_v54, %v4148_v3  ;;  %v9196_v30 = vcombine.low %v4144_v54, %v4148_v3  ;;  %v4356_v31 = vld [vmem:[#allocation8 + $0xb68] sm:$0xff]  ;;  %v9180_v15 = vcombine.low %v4128_v55, %v4132_v39 }
 0x32e   :  { %7373 = vmatprep.subr.bf16.mxu0 %v9317_v36  ;;  %v9405_v37 = vcombine.high %v4352_v60, %v4356_v31  ;;  %v4124_v38 = vld [vmem:[#allocation8 + $0x428] sm:$0xff]  ;;  %v9404_v45 = vcombine.low %v4352_v60, %v4356_v31  ;;  %v4049_v31 = vld [vmem:[#allocation8 + $0x1d0] sm:$0xff] }
 0x32f   :  { %v4344_v34 = vld [vmem:[#allocation8 + $0xb08] sm:$0xff]  ;;  %v9173_v36 = vcombine.high %v4120_v62, %v4124_v38 }
 0x330   :  { %7323 = vmatpush1.bf16.msra.mxu1 %v9220_v58  ;;  %v4348_v40 = vld [vmem:[#allocation8 + $0xb28] sm:$0xff] }
 0x331   :  { %7374 = vmatpush1.bf16.msra.mxu0 %v9316_v50  ;;  %7324 = vmatprep.subr.bf16.mxu1 %v9213_v24  ;;  %v9397_v56 = vcombine.high %v4344_v34, %v4348_v40  ;;  %v4240_v59 = vld [vmem:[#allocation8 + $0x7c8] sm:$0xff]  ;;  %v9172_v50 = vcombine.low %v4120_v62, %v4124_v38  ;;  %v9396_v24 = vcombine.low %v4344_v34, %v4348_v40  ;;  %v4041_v40 = vld [vmem:[#allocation8 + $0x190] sm:$0xff] }
 0x332   :  { %7375 = vmatprep.subr.bf16.mxu0 %v9309_v27  ;;  %v4244_v2 = vld [vmem:[#allocation8 + $0x7e8] sm:$0xff] }
 0x333   :  { %v4336_v21 = vld [vmem:[#allocation8 + $0xac8] sm:$0xff]  ;;  %v9293_v27 = vcombine.high %v4240_v59, %v4244_v2 }
 0x334   :  { %7325 = vmatpush1.bf16.msra.mxu1 %v9212_v32  ;;  %v4340_v58 = vld [vmem:[#allocation8 + $0xae8] sm:$0xff] }
 0x335   :  { %7376 = vmatpush1.bf16.msra.mxu0 %v9308_v1  ;;  %7326 = vmatprep.subr.bf16.mxu1 %v9205_v14  ;;  %v9389_v51 = vcombine.high %v4336_v21, %v4340_v58  ;;  %v4232_v63 = vld [vmem:[#allocation8 + $0x788] sm:$0xff]  ;;  %v9292_v1 = vcombine.low %v4240_v59, %v4244_v2  ;;  %v9388_v14 = vcombine.low %v4336_v21, %v4340_v58  ;;  %v4033_v58 = vld [vmem:[#allocation8 + $0x150] sm:$0xff] }
 0x336   :  { %7377 = vmatprep.subr.bf16.mxu0 %v9301_v49  ;;  %v4236_v18 = vld [vmem:[#allocation8 + $0x7a8] sm:$0xff] }
 0x337   :  { %v4328_v61 = vld [vmem:[#allocation8 + $0xa88] sm:$0xff]  ;;  %v9285_v49 = vcombine.high %v4232_v63, %v4236_v18 }
 0x338   :  { %7327 = vmatpush1.bf16.msra.mxu1 %v9204_v7  ;;  %v4332_v32 = vld [vmem:[#allocation8 + $0xaa8] sm:$0xff] }
 0x339   :  { %7378 = vmatpush1.bf16.msra.mxu0 %v9300_v10  ;;  %7328 = vmatprep.subr.bf16.mxu1 %v9197_v53  ;;  %v9381_v54 = vcombine.high %v4328_v61, %v4332_v32  ;;  %v4224_v3 = vld [vmem:[#allocation8 + $0x748] sm:$0xff]  ;;  %v9284_v10 = vcombine.low %v4232_v63, %v4236_v18  ;;  %v9380_v53 = vcombine.low %v4328_v61, %v4332_v32  ;;  %v4025_v32 = vld [vmem:[#allocation8 + $0x110] sm:$0xff] }
 0x33a   :  { %7379 = vmatprep.subr.bf16.mxu0 %v9421_v11  ;;  %v4228_v23 = vld [vmem:[#allocation8 + $0x768] sm:$0xff] }
 0x33b   :  { %v4320_v6 = vld [vmem:[#allocation8 + $0xa48] sm:$0xff]  ;;  %v9277_v11 = vcombine.high %v4224_v3, %v4228_v23 }
 0x33c   :  { %7329 = vmatpush1.bf16.msra.mxu1 %v9196_v30  ;;  %v4324_v7 = vld [vmem:[#allocation8 + $0xa68] sm:$0xff] }
 0x33d   :  { %7380 = vmatpush2.bf16.msra.mxu0 %v9420_v47  ;;  %7330 = vmatprep.subr.bf16.mxu1 %v9189_v25  ;;  %v9373_v9 = vcombine.high %v4320_v6, %v4324_v7  ;;  %v4216_v19 = vld [vmem:[#allocation8 + $0x708] sm:$0xff]  ;;  %v9276_v47 = vcombine.low %v4224_v3, %v4228_v23  ;;  %v9372_v25 = vcombine.low %v4320_v6, %v4324_v7  ;;  %v4017_v7 = vld [vmem:[#allocation8 + $0xd0] sm:$0xff] }
 0x33e   :  { %7381 = vmatprep.subr.bf16.mxu0 %v9413_v26  ;;  %v4220_v20 = vld [vmem:[#allocation8 + $0x728] sm:$0xff] }
 0x33f   :  { %v4312_v17 = vld [vmem:[#allocation8 + $0xa08] sm:$0xff]  ;;  %v9269_v26 = vcombine.high %v4216_v19, %v4220_v20 }
 0x340   :  { %7331 = vmatpush1.bf16.msra.mxu1 %v9188_v29  ;;  %v4316_v30 = vld [vmem:[#allocation8 + $0xa28] sm:$0xff]  ;;  %v4053_v29 = vld [vmem:[#allocation8 + $0x1f0] sm:$0xff] }
 0x341   :  { %7382 = vmatpush2.bf16.msra.mxu0 %v9412_v35  ;;  %7332 = vmatprep.subr.bf16.mxu1 %v9181_v12  ;;  %v9365_v55 = vcombine.high %v4312_v17, %v4316_v30  ;;  %v4208_v39 = vld [vmem:[#allocation8 + $0x6c8] sm:$0xff]  ;;  %v9268_v35 = vcombine.low %v4216_v19, %v4220_v20  ;;  %v9364_v12 = vcombine.low %v4312_v17, %v4316_v30  ;;  %v4009_v30 = vld [vmem:[#allocation8 + $0x90] sm:$0xff] }
 0x342   :  { %7383 = vmatprep.subr.bf16.mxu0 %v9405_v37  ;;  %v4212_v60 = vld [vmem:[#allocation8 + $0x6e8] sm:$0xff]  ;;  %v9103_v62 = vcombine.high %v4049_v31, %v4053_v29 }
 0x343   :  { %v9261_v37 = vcombine.high %v4208_v39, %v4212_v60  ;;  %v4200_v38 = vld [vmem:[#allocation8 + $0x688] sm:$0xff] }
 0x344   :  { %7333 = vmatpush1.bf16.msra.mxu1 %v9180_v15  ;;  %v4204_v34 = vld [vmem:[#allocation8 + $0x6a8] sm:$0xff]  ;;  %v4045_v15 = vld [vmem:[#allocation8 + $0x1b0] sm:$0xff] }
 0x345   :  { %7384 = vmatpush2.bf16.msra.mxu0 %v9404_v45  ;;  %7334 = vmatprep.subr.bf16.mxu1 %v9173_v36  ;;  %v9260_v45 = vcombine.low %v4208_v39, %v4212_v60  ;;  %v9102_v36 = vcombine.low %v4049_v31, %v4053_v29  ;;  %v9095_v59 = vcombine.high %v4041_v40, %v4045_v15  ;;  %v4192_v2 = vld [vmem:[#allocation8 + $0x648] sm:$0xff]  ;;  %v4001_v29 = vld [vmem:[#allocation8 + $0x50] sm:$0xff] }
 0x346   :  { %7385 = vmatprep.subr.bf16.mxu0 %v9397_v56  ;;  %v9253_v56 = vcombine.high %v4200_v38, %v4204_v34  ;;  %v4196_v21 = vld [vmem:[#allocation8 + $0x668] sm:$0xff] }
 0x347   :  { %v4184_v18 = vld [vmem:[#allocation8 + $0x608] sm:$0xff] }
 0x348   :  { %7335 = vmatpush1.bf16.msra.mxu1 %v9172_v50  ;;  %v4037_v50 = vld [vmem:[#allocation8 + $0x170] sm:$0xff]  ;;  %v4188_v61 = vld [vmem:[#allocation8 + $0x628] sm:$0xff] }
 0x349   :  { %7386 = vmatpush2.bf16.msra.mxu0 %v9396_v24  ;;  %7336 = vmatprep.subr.bf16.mxu1 %v9293_v27  ;;  %v9252_v24 = vcombine.low %v4200_v38, %v4204_v34  ;;  %v9094_v27 = vcombine.low %v4041_v40, %v4045_v15  ;;  %v9087_v63 = vcombine.high %v4033_v58, %v4037_v50  ;;  %v4432_v23 = vld [vmem:[#allocation8 + $0xdc8] sm:$0xff]  ;;  %v3993_v15 = vld [vmem:[#allocation8 + $0x10] sm:$0xff] }
 0x34a   :  { %7387 = vmatprep.subr.bf16.mxu0 %v9389_v51  ;;  %v9245_v51 = vcombine.high %v4192_v2, %v4196_v21  ;;  %v4436_v6 = vld [vmem:[#allocation8 + $0xde8] sm:$0xff] }
 0x34b   :  { %v4424_v20 = vld [vmem:[#allocation8 + $0xd88] sm:$0xff] }
 0x34c   :  { %7337 = vmatpush2.bf16.msra.mxu1 %v9292_v1  ;;  %v4029_v1 = vld [vmem:[#allocation8 + $0x130] sm:$0xff]  ;;  %v4428_v17 = vld [vmem:[#allocation8 + $0xda8] sm:$0xff] }
 0x34d   :  { %7388 = vmatpush2.bf16.msra.mxu0 %v9388_v14  ;;  %7338 = vmatprep.subr.bf16.mxu1 %v9285_v49  ;;  %v9244_v14 = vcombine.low %v4192_v2, %v4196_v21  ;;  %v9086_v49 = vcombine.low %v4033_v58, %v4037_v50  ;;  %v9079_v3 = vcombine.high %v4025_v32, %v4029_v1  ;;  %v4416_v60 = vld [vmem:[#allocation8 + $0xd48] sm:$0xff]  ;;  %v4113_v50 = vld [vmem:[#allocation8 + $0x3d0] sm:$0xff] }
 0x34e   :  { %7389 = vmatprep.subr.bf16.mxu0 %v9381_v54  ;;  %v9237_v54 = vcombine.high %v4184_v18, %v4188_v61  ;;  %v4420_v31 = vld [vmem:[#allocation8 + $0xd68] sm:$0xff] }
 0x34f   :  { %v4408_v34 = vld [vmem:[#allocation8 + $0xd08] sm:$0xff] }
 0x350   :  { %7339 = vmatpush2.bf16.msra.mxu1 %v9284_v10  ;;  %v4021_v10 = vld [vmem:[#allocation8 + $0xf0] sm:$0xff]  ;;  %v4412_v40 = vld [vmem:[#allocation8 + $0xd28] sm:$0xff] }
 0x351   :  { %7390 = vmatpush2.bf16.msra.mxu0 %v9380_v53  ;;  %7340 = vmatprep.subr.bf16.mxu1 %v9277_v11  ;;  %v9236_v53 = vcombine.low %v4184_v18, %v4188_v61  ;;  %v9078_v11 = vcombine.low %v4025_v32, %v4029_v1  ;;  %v9071_v19 = vcombine.high %v4017_v7, %v4021_v10  ;;  %v4400_v21 = vld [vmem:[#allocation8 + $0xcc8] sm:$0xff]  ;;  %v4105_v1 = vld [vmem:[#allocation8 + $0x390] sm:$0xff] }
 0x352   :  { %7391 = vmatprep.subr.bf16.mxu0 %v9373_v9  ;;  %v9485_v9 = vcombine.high %v4432_v23, %v4436_v6  ;;  %v4404_v58 = vld [vmem:[#allocation8 + $0xce8] sm:$0xff] }
 0x353   :  { %v4392_v61 = vld [vmem:[#allocation8 + $0xc88] sm:$0xff] }
 0x354   :  { %7341 = vmatpush2.bf16.msra.mxu1 %v9276_v47  ;;  %v4013_v47 = vld [vmem:[#allocation8 + $0xb0] sm:$0xff]  ;;  %v4396_v32 = vld [vmem:[#allocation8 + $0xca8] sm:$0xff] }
 0x355   :  { %7392 = vmatpush2.bf16.msra.mxu0 %v9372_v25  ;;  %7342 = vmatprep.subr.bf16.mxu1 %v9269_v26  ;;  %v9484_v25 = vcombine.low %v4432_v23, %v4436_v6  ;;  %v9070_v26 = vcombine.low %v4017_v7, %v4021_v10  ;;  %v9063_v39 = vcombine.high %v4009_v30, %v4013_v47  ;;  %v4384_v6 = vld [vmem:[#allocation8 + $0xc48] sm:$0xff]  ;;  %v4097_v10 = vld [vmem:[#allocation8 + $0x350] sm:$0xff] }
 0x356   :  { %7393 = vmatprep.subr.bf16.mxu0 %v9365_v55  ;;  %v9477_v55 = vcombine.high %v4424_v20, %v4428_v17  ;;  %v4388_v7 = vld [vmem:[#allocation8 + $0xc68] sm:$0xff] }
 0x358   :  { %7343 = vmatpush2.bf16.msra.mxu1 %v9268_v35  ;;  %v4005_v35 = vld [vmem:[#allocation8 + $0x70] sm:$0xff] }
 0x359   :  { %7394 = vmatpush2.bf16.msra.mxu0 %v9364_v12  ;;  %7344 = vmatprep.subr.bf16.mxu1 %v9261_v37  ;;  %v9476_v12 = vcombine.low %v4424_v20, %v4428_v17  ;;  %v9062_v37 = vcombine.low %v4009_v30, %v4013_v47  ;;  %v9055_v38 = vcombine.high %v4001_v29, %v4005_v35  ;;  %v4376_v17 = vld [vmem:[#allocation8 + $0xc08] sm:$0xff]  ;;  %v4089_v47 = vld [vmem:[#allocation8 + $0x310] sm:$0xff] }
 0x35a   :  { %7449 = vmatprep.subr.bf16.mxu0 %v9103_v62  ;;  %v9469_v62 = vcombine.high %v4416_v60, %v4420_v31  ;;  %v4380_v30 = vld [vmem:[#allocation8 + $0xc28] sm:$0xff] }
 0x35c   :  { %7345 = vmatpush2.bf16.msra.mxu1 %v9260_v45  ;;  %7396 = vmatmul.mubr.bf16.vlgmr.msra.gmra.mxu0 %v10252_v5  ;;  %v3997_v45 = vld [vmem:[#allocation8 + $0x30] sm:$0xff] }
 0x35d   :  { %7450 = vmatpush1.bf16.msra.mxu0 %v9102_v36  ;;  %7481 = vmatprep.mubr.bf16.mxu0 %v10199_v57  ;;  %v9468_v36 = vcombine.low %v4416_v60, %v4420_v31  ;;  %v9047_v2 = vcombine.high %v3993_v15, %v3997_v45  ;;  %v4496_v31 = vld [vmem:[#allocation8 + $0xfc8] sm:$0xff] }
 0x35e   :  { %7346 = vmatprep.subr.bf16.mxu1 %v9253_v56  ;;  %7451 = vmatprep.subr.bf16.mxu0 %v9095_v59  ;;  %v9054_v56 = vcombine.low %v4001_v29, %v4005_v35  ;;  %v9461_v59 = vcombine.high %v4408_v34, %v4412_v40  ;;  %v4500_v29 = vld [vmem:[#allocation8 + $0xfe8] sm:$0xff]  ;;  %v4081_v35 = vld [vmem:[#allocation8 + $0x2d0] sm:$0xff] }
 0x360   :  { %7347 = vmatpush2.bf16.msra.mxu1 %v9252_v24  ;;  %v4117_v24 = vld [vmem:[#allocation8 + $0x3f0] sm:$0xff] }
 0x361   :  { %7452 = vmatpush1.bf16.msra.mxu0 %v9094_v27  ;;  %7348 = vmatprep.subr.bf16.mxu1 %v9245_v51  ;;  %v9460_v27 = vcombine.low %v4408_v34, %v4412_v40  ;;  %v9046_v51 = vcombine.low %v3993_v15, %v3997_v45  ;;  %v9167_v18 = vcombine.high %v4113_v50, %v4117_v24  ;;  %v4488_v40 = vld [vmem:[#allocation8 + $0xf88] sm:$0xff]  ;;  %v4073_v45 = vld [vmem:[#allocation8 + $0x290] sm:$0xff] }
 0x362   :  { %7453 = vmatprep.subr.bf16.mxu0 %v9087_v63  ;;  %v9453_v63 = vcombine.high %v4400_v21, %v4404_v58  ;;  %v4492_v15 = vld [vmem:[#allocation8 + $0xfa8] sm:$0xff] }
 0x364   :  { %7349 = vmatpush2.bf16.msra.mxu1 %v9244_v14  ;;  %v4109_v14 = vld [vmem:[#allocation8 + $0x3b0] sm:$0xff] }
 0x365   :  { %7454 = vmatpush1.bf16.msra.mxu0 %v9086_v49  ;;  %7350 = vmatprep.subr.bf16.mxu1 %v9237_v54  ;;  %v9452_v49 = vcombine.low %v4400_v21, %v4404_v58  ;;  %v9166_v54 = vcombine.low %v4113_v50, %v4117_v24  ;;  %v9159_v23 = vcombine.high %v4105_v1, %v4109_v14  ;;  %v4480_v58 = vld [vmem:[#allocation8 + $0xf48] sm:$0xff]  ;;  %v4065_v24 = vld [vmem:[#allocation8 + $0x250] sm:$0xff] }
 0x366   :  { %7455 = vmatprep.subr.bf16.mxu0 %v9079_v3  ;;  %v9445_v3 = vcombine.high %v4392_v61, %v4396_v32  ;;  %v4484_v50 = vld [vmem:[#allocation8 + $0xf68] sm:$0xff] }
 0x368   :  { %7351 = vmatpush2.bf16.msra.mxu1 %v9236_v53  ;;  %v4101_v53 = vld [vmem:[#allocation8 + $0x370] sm:$0xff] }
 0x369   :  { %7456 = vmatpush1.bf16.msra.mxu0 %v9078_v11  ;;  %7406 = vmatprep.subr.bf16.mxu1 %v9485_v9  ;;  %v9444_v11 = vcombine.low %v4392_v61, %v4396_v32  ;;  %v9158_v9 = vcombine.low %v4105_v1, %v4109_v14  ;;  %v9151_v20 = vcombine.high %v4097_v10, %v4101_v53  ;;  %v4472_v32 = vld [vmem:[#allocation8 + $0xf08] sm:$0xff]  ;;  %v4057_v14 = vld [vmem:[#allocation8 + $0x210] sm:$0xff] }
 0x36a   :  { %7457 = vmatprep.subr.bf16.mxu0 %v9071_v19  ;;  %v9437_v19 = vcombine.high %v4384_v6, %v4388_v7  ;;  %v4476_v1 = vld [vmem:[#allocation8 + $0xf28] sm:$0xff] }
 0x36b   :  { %7353 = vmatmul.mubr.bf16.vlgmr.msra.gmra.mxu1 %v10173_v16 }
 0x36c   :  { %7407 = vmatpush1.bf16.msra.mxu1 %v9484_v25  ;;  %7438 = vmatprep.mubr.bf16.mxu1 %v10264_v44  ;;  %v4093_v25 = vld [vmem:[#allocation8 + $0x330] sm:$0xff] }
 0x36d   :  { %7458 = vmatpush1.bf16.msra.mxu0 %v9070_v26  ;;  %7408 = vmatprep.subr.bf16.mxu1 %v9477_v55  ;;  %v9436_v26 = vcombine.low %v4384_v6, %v4388_v7  ;;  %v9150_v55 = vcombine.low %v4097_v10, %v4101_v53  ;;  %v9143_v60 = vcombine.high %v4089_v47, %v4093_v25  ;;  %v4464_v7 = vld [vmem:[#allocation8 + $0xec8] sm:$0xff]  ;;  %v4305_v53 = vld [vmem:[#allocation8 + $0x9d0] sm:$0xff] }
 0x36e   :  { %7459 = vmatprep.subr.bf16.mxu0 %v9063_v39  ;;  %v9429_v39 = vcombine.high %v4376_v17, %v4380_v30  ;;  %v4468_v10 = vld [vmem:[#allocation8 + $0xee8] sm:$0xff] }
 0x370   :  { %7409 = vmatpush1.bf16.msra.mxu1 %v9476_v12  ;;  %v4085_v12 = vld [vmem:[#allocation8 + $0x2f0] sm:$0xff] }
 0x371   :  { %7460 = vmatpush1.bf16.msra.mxu0 %v9062_v37  ;;  %7410 = vmatprep.subr.bf16.mxu1 %v9469_v62  ;;  %v9428_v37 = vcombine.low %v4376_v17, %v4380_v30  ;;  %v9142_v62 = vcombine.low %v4089_v47, %v4093_v25  ;;  %v9135_v34 = vcombine.high %v4081_v35, %v4085_v12  ;;  %v4456_v30 = vld [vmem:[#allocation8 + $0xe88] sm:$0xff]  ;;  %v4297_v25 = vld [vmem:[#allocation8 + $0x990] sm:$0xff] }
 0x372   :  { %7461 = vmatprep.subr.bf16.mxu0 %v9055_v38  ;;  %v9549_v38 = vcombine.high %v4496_v31, %v4500_v29  ;;  %v4460_v47 = vld [vmem:[#allocation8 + $0xea8] sm:$0xff] }
 0x374   :  { %7411 = vmatpush1.bf16.msra.mxu1 %v9468_v36  ;;  %v4077_v36 = vld [vmem:[#allocation8 + $0x2b0] sm:$0xff] }
 0x375   :  { %7462 = vmatpush1.bf16.msra.mxu0 %v9054_v56  ;;  %7412 = vmatprep.subr.bf16.mxu1 %v9461_v59  ;;  %v9548_v56 = vcombine.low %v4496_v31, %v4500_v29  ;;  %v9134_v59 = vcombine.low %v4081_v35, %v4085_v12  ;;  %v9127_v21 = vcombine.high %v4073_v45, %v4077_v36  ;;  %v4448_v29 = vld [vmem:[#allocation8 + $0xe48] sm:$0xff]  ;;  %v4289_v12 = vld [vmem:[#allocation8 + $0x950] sm:$0xff] }
 0x376   :  { %7463 = vmatprep.subr.bf16.mxu0 %v9047_v2  ;;  %v9541_v2 = vcombine.high %v4488_v40, %v4492_v15  ;;  %v4452_v35 = vld [vmem:[#allocation8 + $0xe68] sm:$0xff] }
 0x378   :  { %7413 = vmatpush1.bf16.msra.mxu1 %v9460_v27  ;;  %v4069_v27 = vld [vmem:[#allocation8 + $0x270] sm:$0xff] }
 0x379   :  { %7464 = vmatpush1.bf16.msra.mxu0 %v9046_v51  ;;  %7414 = vmatprep.subr.bf16.mxu1 %v9453_v63  ;;  %v9540_v51 = vcombine.low %v4488_v40, %v4492_v15  ;;  %v9126_v63 = vcombine.low %v4073_v45, %v4077_v36  ;;  %v9119_v61 = vcombine.high %v4065_v24, %v4069_v27  ;;  %v4440_v15 = vld [vmem:[#allocation8 + $0xe08] sm:$0xff]  ;;  %v4281_v36 = vld [vmem:[#allocation8 + $0x910] sm:$0xff] }
 0x37a   :  { %7465 = vmatprep.subr.bf16.mxu0 %v9167_v18  ;;  %v9533_v18 = vcombine.high %v4480_v58, %v4484_v50  ;;  %v4444_v45 = vld [vmem:[#allocation8 + $0xe28] sm:$0xff] }
 0x37c   :  { %7415 = vmatpush1.bf16.msra.mxu1 %v9452_v49  ;;  %v4061_v49 = vld [vmem:[#allocation8 + $0x230] sm:$0xff] }
 0x37d   :  { %7466 = vmatpush2.bf16.msra.mxu0 %v9166_v54  ;;  %7416 = vmatprep.subr.bf16.mxu1 %v9445_v3  ;;  %v9532_v54 = vcombine.low %v4480_v58, %v4484_v50  ;;  %v9118_v3 = vcombine.low %v4065_v24, %v4069_v27  ;;  %v9111_v6 = vcombine.high %v4057_v14, %v4061_v49  ;;  %v4177_v50 = vld [vmem:[#allocation8 + $0x5d0] sm:$0xff] }
 0x37e   :  { %7467 = vmatprep.subr.bf16.mxu0 %v9159_v23  ;;  %v9525_v23 = vcombine.high %v4472_v32, %v4476_v1  ;;  %v4181_v24 = vld [vmem:[#allocation8 + $0x5f0] sm:$0xff] }
 0x37f   :  { %v4273_v27 = vld [vmem:[#allocation8 + $0x8d0] sm:$0xff] }
 0x380   :  { %7417 = vmatpush1.bf16.msra.mxu1 %v9444_v11  ;;  %v4309_v11 = vld [vmem:[#allocation8 + $0x9f0] sm:$0xff] }
 0x381   :  { %7468 = vmatpush2.bf16.msra.mxu0 %v9158_v9  ;;  %7418 = vmatprep.subr.bf16.mxu1 %v9437_v19  ;;  %v9524_v9 = vcombine.low %v4472_v32, %v4476_v1  ;;  %v9110_v19 = vcombine.low %v4057_v14, %v4061_v49  ;;  %v9359_v17 = vcombine.high %v4305_v53, %v4309_v11  ;;  %v4169_v1 = vld [vmem:[#allocation8 + $0x590] sm:$0xff] }
 0x382   :  { %7469 = vmatprep.subr.bf16.mxu0 %v9151_v20  ;;  %v9517_v20 = vcombine.high %v4464_v7, %v4468_v10  ;;  %v4173_v14 = vld [vmem:[#allocation8 + $0x5b0] sm:$0xff] }
 0x383   :  { %v4265_v49 = vld [vmem:[#allocation8 + $0x890] sm:$0xff] }
 0x384   :  { %7419 = vmatpush1.bf16.msra.mxu1 %v9436_v26  ;;  %v4301_v26 = vld [vmem:[#allocation8 + $0x9b0] sm:$0xff] }
 0x385   :  { %7470 = vmatpush2.bf16.msra.mxu0 %v9150_v55  ;;  %7420 = vmatprep.subr.bf16.mxu1 %v9429_v39  ;;  %v9516_v55 = vcombine.low %v4464_v7, %v4468_v10  ;;  %v9358_v39 = vcombine.low %v4305_v53, %v4309_v11  ;;  %v9351_v31 = vcombine.high %v4297_v25, %v4301_v26  ;;  %v4161_v10 = vld [vmem:[#allocation8 + $0x550] sm:$0xff] }
 0x386   :  { %7471 = vmatprep.subr.bf16.mxu0 %v9143_v60  ;;  %v9509_v60 = vcombine.high %v4456_v30, %v4460_v47  ;;  %v4165_v53 = vld [vmem:[#allocation8 + $0x570] sm:$0xff] }
 0x387   :  { %v4257_v11 = vld [vmem:[#allocation8 + $0x850] sm:$0xff] }
 0x388   :  { %7421 = vmatpush1.bf16.msra.mxu1 %v9428_v37  ;;  %v4293_v37 = vld [vmem:[#allocation8 + $0x970] sm:$0xff] }
 0x389   :  { %7472 = vmatpush2.bf16.msra.mxu0 %v9142_v62  ;;  %7422 = vmatprep.subr.bf16.mxu1 %v9549_v38  ;;  %v9508_v62 = vcombine.low %v4456_v30, %v4460_v47  ;;  %v9350_v38 = vcombine.low %v4297_v25, %v4301_v26  ;;  %v9343_v40 = vcombine.high %v4289_v12, %v4293_v37  ;;  %v4153_v47 = vld [vmem:[#allocation8 + $0x510] sm:$0xff] }
 0x38a   :  { %7473 = vmatprep.subr.bf16.mxu0 %v9135_v34  ;;  %v9501_v34 = vcombine.high %v4448_v29, %v4452_v35  ;;  %v4157_v25 = vld [vmem:[#allocation8 + $0x530] sm:$0xff] }
 0x38b   :  { %v4249_v26 = vld [vmem:[#allocation8 + $0x810] sm:$0xff] }
 0x38c   :  { %7423 = vmatpush2.bf16.msra.mxu1 %v9548_v56  ;;  %v4285_v56 = vld [vmem:[#allocation8 + $0x930] sm:$0xff] }
 0x38d   :  { %7474 = vmatpush2.bf16.msra.mxu0 %v9134_v59  ;;  %7424 = vmatprep.subr.bf16.mxu1 %v9541_v2  ;;  %v9500_v59 = vcombine.low %v4448_v29, %v4452_v35  ;;  %v9342_v2 = vcombine.low %v4289_v12, %v4293_v37  ;;  %v9335_v58 = vcombine.high %v4281_v36, %v4285_v56  ;;  %v4145_v35 = vld [vmem:[#allocation8 + $0x4d0] sm:$0xff] }
 0x38e   :  { %7475 = vmatprep.subr.bf16.mxu0 %v9127_v21  ;;  %v9493_v21 = vcombine.high %v4440_v15, %v4444_v45  ;;  %v4149_v12 = vld [vmem:[#allocation8 + $0x4f0] sm:$0xff] }
 0x38f   :  { %v4369_v37 = vld [vmem:[#allocation8 + $0xbd0] sm:$0xff] }
 0x390   :  { %7425 = vmatpush2.bf16.msra.mxu1 %v9540_v51  ;;  %v4277_v51 = vld [vmem:[#allocation8 + $0x8f0] sm:$0xff] }
 0x391   :  { %7476 = vmatpush2.bf16.msra.mxu0 %v9126_v63  ;;  %7426 = vmatprep.subr.bf16.mxu1 %v9533_v18  ;;  %v9492_v63 = vcombine.low %v4440_v15, %v4444_v45  ;;  %v9334_v18 = vcombine.low %v4281_v36, %v4285_v56  ;;  %v9327_v32 = vcombine.high %v4273_v27, %v4277_v51  ;;  %v4137_v45 = vld [vmem:[#allocation8 + $0x490] sm:$0xff] }
 0x392   :  { %7477 = vmatprep.subr.bf16.mxu0 %v9119_v61  ;;  %v9231_v61 = vcombine.high %v4177_v50, %v4181_v24  ;;  %v4141_v36 = vld [vmem:[#allocation8 + $0x4b0] sm:$0xff] }
 0x393   :  { %v4361_v56 = vld [vmem:[#allocation8 + $0xb90] sm:$0xff] }
 0x394   :  { %7427 = vmatpush2.bf16.msra.mxu1 %v9532_v54  ;;  %v4269_v54 = vld [vmem:[#allocation8 + $0x8b0] sm:$0xff] }
 0x395   :  { %7478 = vmatpush2.bf16.msra.mxu0 %v9118_v3  ;;  %7428 = vmatprep.subr.bf16.mxu1 %v9525_v23  ;;  %v9230_v3 = vcombine.low %v4177_v50, %v4181_v24  ;;  %v9326_v23 = vcombine.low %v4273_v27, %v4277_v51  ;;  %v9319_v7 = vcombine.high %v4265_v49, %v4269_v54  ;;  %v4129_v24 = vld [vmem:[#allocation8 + $0x450] sm:$0xff] }
 0x396   :  { %7479 = vmatprep.subr.bf16.mxu0 %v9111_v6  ;;  %v9223_v6 = vcombine.high %v4169_v1, %v4173_v14  ;;  %v4133_v27 = vld [vmem:[#allocation8 + $0x470] sm:$0xff] }
 0x397   :  { %v4353_v51 = vld [vmem:[#allocation8 + $0xb50] sm:$0xff] }
 0x398   :  { %7429 = vmatpush2.bf16.msra.mxu1 %v9524_v9  ;;  %v4261_v9 = vld [vmem:[#allocation8 + $0x870] sm:$0xff] }
 0x399   :  { %7480 = vmatpush2.bf16.msra.mxu0 %v9110_v19  ;;  %7430 = vmatprep.subr.bf16.mxu1 %v9517_v20  ;;  %v9222_v19 = vcombine.low %v4169_v1, %v4173_v14  ;;  %v9318_v20 = vcombine.low %v4265_v49, %v4269_v54  ;;  %v9311_v30 = vcombine.high %v4257_v11, %v4261_v9  ;;  %v4121_v14 = vld [vmem:[#allocation8 + $0x410] sm:$0xff] }
 0x39a   :  { %7535 = vmatprep.subr.bf16.mxu0 %v9359_v17  ;;  %v9215_v17 = vcombine.high %v4161_v10, %v4165_v53  ;;  %v4125_v49 = vld [vmem:[#allocation8 + $0x430] sm:$0xff] }
 0x39b   :  { %v4345_v54 = vld [vmem:[#allocation8 + $0xb10] sm:$0xff] }
 0x39c   :  { %7431 = vmatpush2.bf16.msra.mxu1 %v9516_v55  ;;  %7482 = vmatmul.mubr.bf16.vlgmr.msra.gmra.mxu0 %v10137_v28  ;;  %v4253_v55 = vld [vmem:[#allocation8 + $0x830] sm:$0xff] }
 0x39d   :  { %7536 = vmatpush1.bf16.msra.mxu0 %v9358_v39  ;;  %7567 = vmatprep.mubr.bf16.mxu0 %v10229_v41  ;;  %v9214_v39 = vcombine.low %v4161_v10, %v4165_v53  ;;  %v9303_v29 = vcombine.high %v4249_v26, %v4253_v55  ;;  %v4241_v53 = vld [vmem:[#allocation8 + $0x7d0] sm:$0xff] }
 0x39e   :  { %7432 = vmatprep.subr.bf16.mxu1 %v9509_v60  ;;  %7537 = vmatprep.subr.bf16.mxu0 %v9351_v31  ;;  %v9310_v60 = vcombine.low %v4257_v11, %v4261_v9  ;;  %v9207_v31 = vcombine.high %v4153_v47, %v4157_v25  ;;  %v4245_v11 = vld [vmem:[#allocation8 + $0x7f0] sm:$0xff] }
 0x39f   :  { %v4337_v9 = vld [vmem:[#allocation8 + $0xad0] sm:$0xff] }
 0x3a0   :  { %7433 = vmatpush2.bf16.msra.mxu1 %v9508_v62  ;;  %v4373_v62 = vld [vmem:[#allocation8 + $0xbf0] sm:$0xff] }
 0x3a1   :  { %7538 = vmatpush1.bf16.msra.mxu0 %v9350_v38  ;;  %7434 = vmatprep.subr.bf16.mxu1 %v9501_v34  ;;  %v9206_v38 = vcombine.low %v4153_v47, %v4157_v25  ;;  %v9302_v34 = vcombine.low %v4249_v26, %v4253_v55  ;;  %v9423_v15 = vcombine.high %v4369_v37, %v4373_v62  ;;  %v4233_v25 = vld [vmem:[#allocation8 + $0x790] sm:$0xff] }
 0x3a2   :  { %7539 = vmatprep.subr.bf16.mxu0 %v9343_v40  ;;  %v9199_v40 = vcombine.high %v4145_v35, %v4149_v12  ;;  %v4237_v26 = vld [vmem:[#allocation8 + $0x7b0] sm:$0xff] }
 0x3a3   :  { %v4329_v55 = vld [vmem:[#allocation8 + $0xa90] sm:$0xff] }
 0x3a4   :  { %7435 = vmatpush2.bf16.msra.mxu1 %v9500_v59  ;;  %v4365_v59 = vld [vmem:[#allocation8 + $0xbb0] sm:$0xff] }
 0x3a5   :  { %7540 = vmatpush1.bf16.msra.mxu0 %v9342_v2  ;;  %7436 = vmatprep.subr.bf16.mxu1 %v9493_v21  ;;  %v9198_v2 = vcombine.low %v4145_v35, %v4149_v12  ;;  %v9422_v21 = vcombine.low %v4369_v37, %v4373_v62  ;;  %v9415_v50 = vcombine.high %v4361_v56, %v4365_v59  ;;  %v4225_v12 = vld [vmem:[#allocation8 + $0x750] sm:$0xff] }
 0x3a6   :  { %7541 = vmatprep.subr.bf16.mxu0 %v9335_v58  ;;  %v9191_v58 = vcombine.high %v4137_v45, %v4141_v36  ;;  %v4229_v37 = vld [vmem:[#allocation8 + $0x770] sm:$0xff] }
 0x3a7   :  { %v4321_v62 = vld [vmem:[#allocation8 + $0xa50] sm:$0xff] }
 0x3a8   :  { %7437 = vmatpush2.bf16.msra.mxu1 %v9492_v63  ;;  %v4357_v63 = vld [vmem:[#allocation8 + $0xb70] sm:$0xff] }
 0x3a9   :  { %7542 = vmatpush1.bf16.msra.mxu0 %v9334_v18  ;;  %7492 = vmatprep.subr.bf16.mxu1 %v9231_v61  ;;  %v9190_v18 = vcombine.low %v4137_v45, %v4141_v36  ;;  %v9414_v61 = vcombine.low %v4361_v56, %v4365_v59  ;;  %v9407_v1 = vcombine.high %v4353_v51, %v4357_v63  ;;  %v4217_v36 = vld [vmem:[#allocation8 + $0x710] sm:$0xff] }
 0x3aa   :  { %7543 = vmatprep.subr.bf16.mxu0 %v9327_v32  ;;  %v9183_v32 = vcombine.high %v4129_v24, %v4133_v27  ;;  %v4221_v56 = vld [vmem:[#allocation8 + $0x730] sm:$0xff] }
 0x3ab   :  { %7439 = vmatmul.mubr.bf16.vlgmr.msra.gmra.mxu1 %v10266_v43  ;;  %v4313_v59 = vld [vmem:[#allocation8 + $0xa10] sm:$0xff] }
 0x3ac   :  { %7493 = vmatpush1.bf16.msra.mxu1 %v9230_v3  ;;  %7524 = vmatprep.mubr.bf16.mxu1 %v10202_v33  ;;  %v4349_v3 = vld [vmem:[#allocation8 + $0xb30] sm:$0xff] }
 0x3ad   :  { %7544 = vmatpush1.bf16.msra.mxu0 %v9326_v23  ;;  %7494 = vmatprep.subr.bf16.mxu1 %v9223_v6  ;;  %v9182_v23 = vcombine.low %v4129_v24, %v4133_v27  ;;  %v9406_v6 = vcombine.low %v4353_v51, %v4357_v63  ;;  %v9399_v10 = vcombine.high %v4345_v54, %v4349_v3  ;;  %v4209_v27 = vld [vmem:[#allocation8 + $0x6d0] sm:$0xff]  ;;  %v4050_v63 = vld [vmem:[#allocation8 + $0x1d8] sm:$0xff] }
 0x3ae   :  { %7545 = vmatprep.subr.bf16.mxu0 %v9319_v7  ;;  %v9175_v7 = vcombine.high %v4121_v14, %v4125_v49  ;;  %v4213_v51 = vld [vmem:[#allocation8 + $0x6f0] sm:$0xff] }
 0x3b0   :  { %7495 = vmatpush1.bf16.msra.mxu1 %v9222_v19  ;;  %v4341_v19 = vld [vmem:[#allocation8 + $0xaf0] sm:$0xff] }
 0x3b1   :  { %7546 = vmatpush1.bf16.msra.mxu0 %v9318_v20  ;;  %7496 = vmatprep.subr.bf16.mxu1 %v9215_v17  ;;  %v9174_v20 = vcombine.low %v4121_v14, %v4125_v49  ;;  %v9398_v17 = vcombine.low %v4345_v54, %v4349_v3  ;;  %v9391_v47 = vcombine.high %v4337_v9, %v4341_v19  ;;  %v4201_v49 = vld [vmem:[#allocation8 + $0x690] sm:$0xff]  ;;  %v4042_v3 = vld [vmem:[#allocation8 + $0x198] sm:$0xff] }
 0x3b2   :  { %7547 = vmatprep.subr.bf16.mxu0 %v9311_v30  ;;  %v9295_v30 = vcombine.high %v4241_v53, %v4245_v11  ;;  %v4205_v54 = vld [vmem:[#allocation8 + $0x6b0] sm:$0xff] }
 0x3b4   :  { %7497 = vmatpush1.bf16.msra.mxu1 %v9214_v39  ;;  %v4333_v39 = vld [vmem:[#allocation8 + $0xab0] sm:$0xff] }
 0x3b5   :  { %7548 = vmatpush1.bf16.msra.mxu0 %v9310_v60  ;;  %7498 = vmatprep.subr.bf16.mxu1 %v9207_v31  ;;  %v9294_v60 = vcombine.low %v4241_v53, %v4245_v11  ;;  %v9390_v31 = vcombine.low %v4337_v9, %v4341_v19  ;;  %v9383_v35 = vcombine.high %v4329_v55, %v4333_v39  ;;  %v4193_v11 = vld [vmem:[#allocation8 + $0x650] sm:$0xff]  ;;  %v4034_v19 = vld [vmem:[#allocation8 + $0x158] sm:$0xff] }
 0x3b6   :  { %7549 = vmatprep.subr.bf16.mxu0 %v9303_v29  ;;  %v9287_v29 = vcombine.high %v4233_v25, %v4237_v26  ;;  %v4197_v9 = vld [vmem:[#allocation8 + $0x670] sm:$0xff] }
 0x3b8   :  { %7499 = vmatpush1.bf16.msra.mxu1 %v9206_v38  ;;  %v4325_v38 = vld [vmem:[#allocation8 + $0xa70] sm:$0xff] }
 0x3b9   :  { %7550 = vmatpush1.bf16.msra.mxu0 %v9302_v34  ;;  %7500 = vmatprep.subr.bf16.mxu1 %v9199_v40  ;;  %v9286_v34 = vcombine.low %v4233_v25, %v4237_v26  ;;  %v9382_v40 = vcombine.low %v4329_v55, %v4333_v39  ;;  %v9375_v45 = vcombine.high %v4321_v62, %v4325_v38  ;;  %v4185_v26 = vld [vmem:[#allocation8 + $0x610] sm:$0xff]  ;;  %v4026_v39 = vld [vmem:[#allocation8 + $0x118] sm:$0xff] }
 0x3ba   :  { %7551 = vmatprep.subr.bf16.mxu0 %v9423_v15  ;;  %v9279_v15 = vcombine.high %v4225_v12, %v4229_v37  ;;  %v4189_v55 = vld [vmem:[#allocation8 + $0x630] sm:$0xff] }
 0x3bc   :  { %7501 = vmatpush1.bf16.msra.mxu1 %v9198_v2  ;;  %v4317_v2 = vld [vmem:[#allocation8 + $0xa30] sm:$0xff] }
 0x3bd   :  { %7552 = vmatpush2.bf16.msra.mxu0 %v9422_v21  ;;  %7502 = vmatprep.subr.bf16.mxu1 %v9191_v58  ;;  %v9278_v21 = vcombine.low %v4225_v12, %v4229_v37  ;;  %v9374_v58 = vcombine.low %v4321_v62, %v4325_v38  ;;  %v9367_v24 = vcombine.high %v4313_v59, %v4317_v2  ;;  %v4433_v37 = vld [vmem:[#allocation8 + $0xdd0] sm:$0xff]  ;;  %v4022_v38 = vld [vmem:[#allocation8 + $0xf8] sm:$0xff] }
 0x3be   :  { %7553 = vmatprep.subr.bf16.mxu0 %v9415_v50  ;;  %v9271_v50 = vcombine.high %v4217_v36, %v4221_v56  ;;  %v4437_v62 = vld [vmem:[#allocation8 + $0xdf0] sm:$0xff] }
 0x3c0   :  { %7503 = vmatpush1.bf16.msra.mxu1 %v9190_v18  ;;  %v4054_v18 = vld [vmem:[#allocation8 + $0x1f8] sm:$0xff] }
 0x3c1   :  { %7554 = vmatpush2.bf16.msra.mxu0 %v9414_v61  ;;  %7504 = vmatprep.subr.bf16.mxu1 %v9183_v32  ;;  %v9270_v61 = vcombine.low %v4217_v36, %v4221_v56  ;;  %v9366_v32 = vcombine.low %v4313_v59, %v4317_v2  ;;  %v9105_v14 = vcombine.high %v4050_v63, %v4054_v18  ;;  %v4425_v36 = vld [vmem:[#allocation8 + $0xd90] sm:$0xff]  ;;  %v4010_v59 = vld [vmem:[#allocation8 + $0x98] sm:$0xff] }
 0x3c2   :  { %7555 = vmatprep.subr.bf16.mxu0 %v9407_v1  ;;  %v9263_v1 = vcombine.high %v4209_v27, %v4213_v51  ;;  %v4429_v56 = vld [vmem:[#allocation8 + $0xdb0] sm:$0xff]  ;;  %v4014_v2 = vld [vmem:[#allocation8 + $0xb8] sm:$0xff] }
 0x3c4   :  { %7505 = vmatpush1.bf16.msra.mxu1 %v9182_v23  ;;  %v4046_v23 = vld [vmem:[#allocation8 + $0x1b8] sm:$0xff] }
 0x3c5   :  { %7556 = vmatpush2.bf16.msra.mxu0 %v9406_v6  ;;  %7506 = vmatprep.subr.bf16.mxu1 %v9175_v7  ;;  %v9262_v6 = vcombine.low %v4209_v27, %v4213_v51  ;;  %v9104_v7 = vcombine.low %v4050_v63, %v4054_v18  ;;  %v9097_v53 = vcombine.high %v4042_v3, %v4046_v23  ;;  %v4417_v27 = vld [vmem:[#allocation8 + $0xd50] sm:$0xff]  ;;  %v4002_v63 = vld [vmem:[#allocation8 + $0x58] sm:$0xff] }
 0x3c6   :  { %7557 = vmatprep.subr.bf16.mxu0 %v9399_v10  ;;  %v9255_v10 = vcombine.high %v4201_v49, %v4205_v54  ;;  %v4421_v51 = vld [vmem:[#allocation8 + $0xd70] sm:$0xff]  ;;  %v4006_v18 = vld [vmem:[#allocation8 + $0x78] sm:$0xff] }
 0x3c8   :  { %7507 = vmatpush1.bf16.msra.mxu1 %v9174_v20  ;;  %v4038_v20 = vld [vmem:[#allocation8 + $0x178] sm:$0xff] }
 0x3c9   :  { %7558 = vmatpush2.bf16.msra.mxu0 %v9398_v17  ;;  %7508 = vmatprep.subr.bf16.mxu1 %v9295_v30  ;;  %v9254_v17 = vcombine.low %v4201_v49, %v4205_v54  ;;  %v9096_v30 = vcombine.low %v4042_v3, %v4046_v23  ;;  %v9089_v25 = vcombine.high %v4034_v19, %v4038_v20  ;;  %v4409_v49 = vld [vmem:[#allocation8 + $0xd10] sm:$0xff]  ;;  %v3994_v3 = vld [vmem:[#allocation8 + $0x18] sm:$0xff] }
 0x3ca   :  { %7559 = vmatprep.subr.bf16.mxu0 %v9391_v47  ;;  %v9247_v47 = vcombine.high %v4193_v11, %v4197_v9  ;;  %v4413_v54 = vld [vmem:[#allocation8 + $0xd30] sm:$0xff]  ;;  %v3998_v23 = vld [vmem:[#allocation8 + $0x38] sm:$0xff] }
 0x3cc   :  { %7509 = vmatpush2.bf16.msra.mxu1 %v9294_v60  ;;  %v4030_v60 = vld [vmem:[#allocation8 + $0x138] sm:$0xff] }
 0x3cd   :  { %7560 = vmatpush2.bf16.msra.mxu0 %v9390_v31  ;;  %7510 = vmatprep.subr.bf16.mxu1 %v9287_v29  ;;  %v9246_v31 = vcombine.low %v4193_v11, %v4197_v9  ;;  %v9088_v29 = vcombine.low %v4034_v19, %v4038_v20  ;;  %v9081_v12 = vcombine.high %v4026_v39, %v4030_v60  ;;  %v4401_v11 = vld [vmem:[#allocation8 + $0xcd0] sm:$0xff]  ;;  %v4114_v19 = vld [vmem:[#allocation8 + $0x3d8] sm:$0xff] }
 0x3ce   :  { %7561 = vmatprep.subr.bf16.mxu0 %v9383_v35  ;;  %v9239_v35 = vcombine.high %v4185_v26, %v4189_v55  ;;  %v4405_v9 = vld [vmem:[#allocation8 + $0xcf0] sm:$0xff]  ;;  %v4118_v20 = vld [vmem:[#allocation8 + $0x3f8] sm:$0xff] }
 0x3d0   :  { %7511 = vmatpush2.bf16.msra.mxu1 %v9286_v34  ;;  %v9238_v34 = vcombine.low %v4185_v26, %v4189_v55  ;;  %v4393_v26 = vld [vmem:[#allocation8 + $0xc90] sm:$0xff] }
 0x3d1   :  { %7562 = vmatpush2.bf16.msra.mxu0 %v9382_v40  ;;  %7512 = vmatprep.subr.bf16.mxu1 %v9279_v15  ;;  %v9080_v40 = vcombine.low %v4026_v39, %v4030_v60  ;;  %v9487_v15 = vcombine.high %v4433_v37, %v4437_v62  ;;  %v4397_v55 = vld [vmem:[#allocation8 + $0xcb0] sm:$0xff]  ;;  %v4106_v39 = vld [vmem:[#allocation8 + $0x398] sm:$0xff] }
 0x3d2   :  { %7563 = vmatprep.subr.bf16.mxu0 %v9375_v45  ;;  %v4110_v60 = vld [vmem:[#allocation8 + $0x3b8] sm:$0xff] }
 0x3d4   :  { %7513 = vmatpush2.bf16.msra.mxu1 %v9278_v21  ;;  %v9486_v21 = vcombine.low %v4433_v37, %v4437_v62  ;;  %v4385_v37 = vld [vmem:[#allocation8 + $0xc50] sm:$0xff] }
 0x3d5   :  { %7564 = vmatpush2.bf16.msra.mxu0 %v9374_v58  ;;  %7514 = vmatprep.subr.bf16.mxu1 %v9271_v50  ;;  %v9479_v50 = vcombine.high %v4425_v36, %v4429_v56  ;;  %v4389_v62 = vld [vmem:[#allocation8 + $0xc70] sm:$0xff] }
 0x3d6   :  { %7565 = vmatprep.subr.bf16.mxu0 %v9367_v24  ;;  %v9065_v24 = vcombine.high %v4010_v59, %v4014_v2 }
 0x3d8   :  { %7515 = vmatpush2.bf16.msra.mxu1 %v9270_v61  ;;  %v9478_v61 = vcombine.low %v4425_v36, %v4429_v56  ;;  %v4377_v36 = vld [vmem:[#allocation8 + $0xc10] sm:$0xff] }
 0x3d9   :  { %7566 = vmatpush2.bf16.msra.mxu0 %v9366_v32  ;;  %7516 = vmatprep.subr.bf16.mxu1 %v9263_v1  ;;  %v9064_v32 = vcombine.low %v4010_v59, %v4014_v2  ;;  %v9471_v1 = vcombine.high %v4417_v27, %v4421_v51  ;;  %v4381_v56 = vld [vmem:[#allocation8 + $0xc30] sm:$0xff]  ;;  %v4090_v59 = vld [vmem:[#allocation8 + $0x318] sm:$0xff] }
 0x3da   :  { %7621 = vmatprep.subr.bf16.mxu0 %v9105_v14  ;;  %v9057_v14 = vcombine.high %v4002_v63, %v4006_v18  ;;  %v4094_v2 = vld [vmem:[#allocation8 + $0x338] sm:$0xff] }
 0x3dc   :  { %7517 = vmatpush2.bf16.msra.mxu1 %v9262_v6  ;;  %7568 = vmatmul.mubr.bf16.vlgmr.msra.gmra.mxu0 %v10252_v5  ;;  %v9470_v6 = vcombine.low %v4417_v27, %v4421_v51  ;;  %v4497_v27 = vld [vmem:[#allocation8 + $0xfd0] sm:$0xff] }
 0x3dd   :  { %7622 = vmatpush1.bf16.msra.mxu0 %v9104_v7  ;;  %7653 = vmatprep.mubr.bf16.mxu0 %v10199_v57  ;;  %v4018_v57 = vld [vmem:[#allocation8 + $0xd8] sm:$0xff]  ;;  %v9056_v7 = vcombine.low %v4002_v63, %v4006_v18  ;;  %v4501_v51 = vld [vmem:[#allocation8 + $0xff0] sm:$0xff] }
 0x3de   :  { %7518 = vmatprep.subr.bf16.mxu1 %v9255_v10  ;;  %7623 = vmatprep.subr.bf16.mxu0 %v9097_v53  ;;  %v9073_v45 = vcombine.high %v4018_v57, %v4022_v38  ;;  %v9072_v58 = vcombine.low %v4018_v57, %v4022_v38  ;;  %v9463_v10 = vcombine.high %v4409_v49, %v4413_v54  ;;  %v4098_v57 = vld [vmem:[#allocation8 + $0x358] sm:$0xff] }
 0x3df   :  { %v9049_v53 = vcombine.high %v3994_v3, %v3998_v23  ;;  %v4102_v38 = vld [vmem:[#allocation8 + $0x378] sm:$0xff] }
 0x3e0   :  { %7519 = vmatpush2.bf16.msra.mxu1 %v9254_v17  ;;  %v9462_v17 = vcombine.low %v4409_v49, %v4413_v54  ;;  %v4082_v63 = vld [vmem:[#allocation8 + $0x2d8] sm:$0xff]  ;;  %v4489_v49 = vld [vmem:[#allocation8 + $0xf90] sm:$0xff] }
 0x3e1   :  { %7624 = vmatpush1.bf16.msra.mxu0 %v9096_v30  ;;  %7520 = vmatprep.subr.bf16.mxu1 %v9247_v47  ;;  %v9048_v30 = vcombine.low %v3994_v3, %v3998_v23  ;;  %v9455_v47 = vcombine.high %v4401_v11, %v4405_v9  ;;  %v4086_v18 = vld [vmem:[#allocation8 + $0x2f8] sm:$0xff]  ;;  %v4493_v54 = vld [vmem:[#allocation8 + $0xfb0] sm:$0xff] }
 0x3e2   :  { %7625 = vmatprep.subr.bf16.mxu0 %v9089_v25  ;;  %v9169_v25 = vcombine.high %v4114_v19, %v4118_v20  ;;  %v4074_v3 = vld [vmem:[#allocation8 + $0x298] sm:$0xff] }
 0x3e3   :  { %v4078_v23 = vld [vmem:[#allocation8 + $0x2b8] sm:$0xff] }
 0x3e4   :  { %7521 = vmatpush2.bf16.msra.mxu1 %v9246_v31  ;;  %v9454_v31 = vcombine.low %v4401_v11, %v4405_v9  ;;  %v4481_v11 = vld [vmem:[#allocation8 + $0xf50] sm:$0xff] }
 0x3e5   :  { %7626 = vmatpush1.bf16.msra.mxu0 %v9088_v29  ;;  %7522 = vmatprep.subr.bf16.mxu1 %v9239_v35  ;;  %v9168_v29 = vcombine.low %v4114_v19, %v4118_v20  ;;  %v9447_v35 = vcombine.high %v4393_v26, %v4397_v55  ;;  %v4485_v9 = vld [vmem:[#allocation8 + $0xf70] sm:$0xff]  ;;  %v4066_v19 = vld [vmem:[#allocation8 + $0x258] sm:$0xff] }
 0x3e6   :  { %7627 = vmatprep.subr.bf16.mxu0 %v9081_v12  ;;  %v9161_v12 = vcombine.high %v4106_v39, %v4110_v60  ;;  %v4070_v20 = vld [vmem:[#allocation8 + $0x278] sm:$0xff] }
 0x3e8   :  { %7523 = vmatpush2.bf16.msra.mxu1 %v9238_v34  ;;  %v9446_v34 = vcombine.low %v4393_v26, %v4397_v55  ;;  %v4473_v26 = vld [vmem:[#allocation8 + $0xf10] sm:$0xff] }
 0x3e9   :  { %7628 = vmatpush1.bf16.msra.mxu0 %v9080_v40  ;;  %7578 = vmatprep.subr.bf16.mxu1 %v9487_v15  ;;  %v9160_v40 = vcombine.low %v4106_v39, %v4110_v60  ;;  %v9439_v15 = vcombine.high %v4385_v37, %v4389_v62  ;;  %v4477_v55 = vld [vmem:[#allocation8 + $0xf30] sm:$0xff]  ;;  %v4058_v39 = vld [vmem:[#allocation8 + $0x218] sm:$0xff] }
 0x3ea   :  { %7629 = vmatprep.subr.bf16.mxu0 %v9073_v45  ;;  %v9153_v45 = vcombine.high %v4098_v57, %v4102_v38  ;;  %v4062_v60 = vld [vmem:[#allocation8 + $0x238] sm:$0xff] }
 0x3eb   :  { %7525 = vmatmul.mubr.bf16.vlgmr.msra.gmra.mxu1 %v10173_v16 }
 0x3ec   :  { %7579 = vmatpush1.bf16.msra.mxu1 %v9486_v21  ;;  %7610 = vmatprep.mubr.bf16.mxu1 %v10264_v44  ;;  %v9438_v21 = vcombine.low %v4385_v37, %v4389_v62  ;;  %v4465_v37 = vld [vmem:[#allocation8 + $0xed0] sm:$0xff] }
 0x3ed   :  { %7630 = vmatpush1.bf16.msra.mxu0 %v9072_v58  ;;  %7580 = vmatprep.subr.bf16.mxu1 %v9479_v50  ;;  %v9152_v58 = vcombine.low %v4098_v57, %v4102_v38  ;;  %v9431_v50 = vcombine.high %v4377_v36, %v4381_v56  ;;  %v4469_v62 = vld [vmem:[#allocation8 + $0xef0] sm:$0xff]  ;;  %v4306_v57 = vld [vmem:[#allocation8 + $0x9d8] sm:$0xff] }
 0x3ee   :  { %7631 = vmatprep.subr.bf16.mxu0 %v9065_v24  ;;  %v9145_v24 = vcombine.high %v4090_v59, %v4094_v2  ;;  %v4310_v38 = vld [vmem:[#allocation8 + $0x9f8] sm:$0xff] }
 0x3f0   :  { %7581 = vmatpush1.bf16.msra.mxu1 %v9478_v61  ;;  %v9430_v61 = vcombine.low %v4377_v36, %v4381_v56  ;;  %v4457_v36 = vld [vmem:[#allocation8 + $0xe90] sm:$0xff] }
 0x3f1   :  { %7632 = vmatpush1.bf16.msra.mxu0 %v9064_v32  ;;  %7582 = vmatprep.subr.bf16.mxu1 %v9471_v1  ;;  %v9144_v32 = vcombine.low %v4090_v59, %v4094_v2  ;;  %v9551_v1 = vcombine.high %v4497_v27, %v4501_v51  ;;  %v4461_v56 = vld [vmem:[#allocation8 + $0xeb0] sm:$0xff]  ;;  %v4298_v59 = vld [vmem:[#allocation8 + $0x998] sm:$0xff] }
 0x3f2   :  { %7633 = vmatprep.subr.bf16.mxu0 %v9057_v14  ;;  %v9137_v14 = vcombine.high %v4082_v63, %v4086_v18  ;;  %v4302_v2 = vld [vmem:[#allocation8 + $0x9b8] sm:$0xff] }
 0x3f4   :  { %7583 = vmatpush1.bf16.msra.mxu1 %v9470_v6  ;;  %v9550_v6 = vcombine.low %v4497_v27, %v4501_v51  ;;  %v4449_v27 = vld [vmem:[#allocation8 + $0xe50] sm:$0xff] }
 0x3f5   :  { %7634 = vmatpush1.bf16.msra.mxu0 %v9056_v7  ;;  %7584 = vmatprep.subr.bf16.mxu1 %v9463_v10  ;;  %v9136_v7 = vcombine.low %v4082_v63, %v4086_v18  ;;  %v9543_v10 = vcombine.high %v4489_v49, %v4493_v54  ;;  %v4453_v51 = vld [vmem:[#allocation8 + $0xe70] sm:$0xff]  ;;  %v4290_v63 = vld [vmem:[#allocation8 + $0x958] sm:$0xff] }
 0x3f6   :  { %7635 = vmatprep.subr.bf16.mxu0 %v9049_v53  ;;  %v9129_v53 = vcombine.high %v4074_v3, %v4078_v23  ;;  %v4294_v18 = vld [vmem:[#allocation8 + $0x978] sm:$0xff] }
 0x3f8   :  { %7585 = vmatpush1.bf16.msra.mxu1 %v9462_v17  ;;  %v9542_v17 = vcombine.low %v4489_v49, %v4493_v54  ;;  %v4441_v49 = vld [vmem:[#allocation8 + $0xe10] sm:$0xff] }
 0x3f9   :  { %7636 = vmatpush1.bf16.msra.mxu0 %v9048_v30  ;;  %7586 = vmatprep.subr.bf16.mxu1 %v9455_v47  ;;  %v9128_v30 = vcombine.low %v4074_v3, %v4078_v23  ;;  %v9535_v47 = vcombine.high %v4481_v11, %v4485_v9  ;;  %v4445_v54 = vld [vmem:[#allocation8 + $0xe30] sm:$0xff]  ;;  %v4282_v3 = vld [vmem:[#allocation8 + $0x918] sm:$0xff] }
 0x3fa   :  { %7637 = vmatprep.subr.bf16.mxu0 %v9169_v25  ;;  %v9121_v25 = vcombine.high %v4066_v19, %v4070_v20  ;;  %v4286_v23 = vld [vmem:[#allocation8 + $0x938] sm:$0xff] }
 0x3fc   :  { %7587 = vmatpush1.bf16.msra.mxu1 %v9454_v31  ;;  %v9534_v31 = vcombine.low %v4481_v11, %v4485_v9  ;;  %v4182_v11 = vld [vmem:[#allocation8 + $0x5f8] sm:$0xff] }
 0x3fd   :  { %7638 = vmatpush2.bf16.msra.mxu0 %v9168_v29  ;;  %7588 = vmatprep.subr.bf16.mxu1 %v9447_v35  ;;  %v9120_v29 = vcombine.low %v4066_v19, %v4070_v20  ;;  %v9527_v35 = vcombine.high %v4473_v26, %v4477_v55  ;;  %v4278_v9 = vld [vmem:[#allocation8 + $0x8f8] sm:$0xff]  ;;  %v9494_v19 = vcombine.low %v4441_v49, %v4445_v54 }
 0x3fe   :  { %7639 = vmatprep.subr.bf16.mxu0 %v9161_v12  ;;  %v9113_v12 = vcombine.high %v4058_v39, %v4062_v60  ;;  %v9336_v20 = vcombine.low %v4282_v3, %v4286_v23 }
 0x400   :  { %7589 = vmatpush1.bf16.msra.mxu1 %v9446_v34  ;;  %v9526_v34 = vcombine.low %v4473_v26, %v4477_v55  ;;  %v4266_v26 = vld [vmem:[#allocation8 + $0x898] sm:$0xff] }
 0x401   :  { %7640 = vmatpush2.bf16.msra.mxu0 %v9160_v40  ;;  %7590 = vmatprep.subr.bf16.mxu1 %v9439_v15  ;;  %v9112_v40 = vcombine.low %v4058_v39, %v4062_v60  ;;  %v9519_v15 = vcombine.high %v4465_v37, %v4469_v62  ;;  %v4270_v55 = vld [vmem:[#allocation8 + $0x8b8] sm:$0xff] }
 0x402   :  { %7641 = vmatprep.subr.bf16.mxu0 %v9153_v45  ;;  %v9361_v45 = vcombine.high %v4306_v57, %v4310_v38 }
 0x404   :  { %7591 = vmatpush1.bf16.msra.mxu1 %v9438_v21  ;;  %v9518_v21 = vcombine.low %v4465_v37, %v4469_v62  ;;  %v4258_v37 = vld [vmem:[#allocation8 + $0x858] sm:$0xff] }
 0x405   :  { %7642 = vmatpush2.bf16.msra.mxu0 %v9152_v58  ;;  %7592 = vmatprep.subr.bf16.mxu1 %v9431_v50  ;;  %v9360_v58 = vcombine.low %v4306_v57, %v4310_v38  ;;  %v9511_v50 = vcombine.high %v4457_v36, %v4461_v56  ;;  %v4262_v62 = vld [vmem:[#allocation8 + $0x878] sm:$0xff]  ;;  %v9320_v38 = vcombine.low %v4266_v26, %v4270_v55 }
 0x406   :  { %7643 = vmatprep.subr.bf16.mxu0 %v9145_v24  ;;  %v9353_v24 = vcombine.high %v4298_v59, %v4302_v2 }
 0x408   :  { %7593 = vmatpush1.bf16.msra.mxu1 %v9430_v61  ;;  %v9510_v61 = vcombine.low %v4457_v36, %v4461_v56  ;;  %v4250_v36 = vld [vmem:[#allocation8 + $0x818] sm:$0xff] }
 0x409   :  { %7644 = vmatpush2.bf16.msra.mxu0 %v9144_v32  ;;  %7594 = vmatprep.subr.bf16.mxu1 %v9551_v1  ;;  %v9352_v32 = vcombine.low %v4298_v59, %v4302_v2  ;;  %v9503_v1 = vcombine.high %v4449_v27, %v4453_v51  ;;  %v4254_v56 = vld [vmem:[#allocation8 + $0x838] sm:$0xff]  ;;  %v9312_v2 = vcombine.low %v4258_v37, %v4262_v62 }
 0x40a   :  { %7645 = vmatprep.subr.bf16.mxu0 %v9137_v14  ;;  %v9345_v14 = vcombine.high %v4290_v63, %v4294_v18 }
 0x40c   :  { %7595 = vmatpush2.bf16.msra.mxu1 %v9550_v6  ;;  %v9502_v6 = vcombine.low %v4449_v27, %v4453_v51  ;;  %v4374_v27 = vld [vmem:[#allocation8 + $0xbf8] sm:$0xff]  ;;  %v10290_v51 = vpop.f32.mrf.mxu0 }
 0x40d   :  { %7646 = vmatpush2.bf16.msra.mxu0 %v9136_v7  ;;  %7596 = vmatprep.subr.bf16.mxu1 %v9543_v10  ;;  %v9344_v7 = vcombine.low %v4290_v63, %v4294_v18  ;;  %v9495_v10 = vcombine.high %v4441_v49, %v4445_v54  ;;  %v9304_v18 = vcombine.low %v4250_v36, %v4254_v56  ;;  %v4142_v49 = vld [vmem:[#allocation8 + $0x4b8] sm:$0xff] }
 0x40e   :  { %7647 = vmatprep.subr.bf16.mxu0 %v9129_v53  ;;  %v4178_v53 = vld [vmem:[#allocation8 + $0x5d8] sm:$0xff] }
 0x40f   :  { %v9232_v39 = vcombine.low %v4178_v53, %v4182_v11  ;;  %v4362_v54 = vld [vmem:[#allocation8 + $0xb98] sm:$0xff] }
 0x410   :  { %7597 = vmatpush2.bf16.msra.mxu1 %v9542_v17  ;;  %v9233_v17 = vcombine.high %v4178_v53, %v4182_v11  ;;  %v4130_v11 = vld [vmem:[#allocation8 + $0x458] sm:$0xff] }
 0x411   :  { %7648 = vmatpush2.bf16.msra.mxu0 %v9128_v30  ;;  %7598 = vmatprep.subr.bf16.mxu1 %v9535_v47  ;;  %v4170_v47 = vld [vmem:[#allocation8 + $0x598] sm:$0xff] }
 0x412   :  { %7649 = vmatprep.subr.bf16.mxu0 %v9121_v25  ;;  %v4174_v25 = vld [vmem:[#allocation8 + $0x5b8] sm:$0xff] }
 0x413   :  { %v9224_v57 = vcombine.low %v4170_v47, %v4174_v25 }
 0x414   :  { %7599 = vmatpush2.bf16.msra.mxu1 %v9534_v31  ;;  %v9225_v31 = vcombine.high %v4170_v47, %v4174_v25 }
 0x415   :  { %7650 = vmatpush2.bf16.msra.mxu0 %v9120_v29  ;;  %7600 = vmatprep.subr.bf16.mxu1 %v9527_v35  ;;  %v9321_v29 = vcombine.high %v4266_v26, %v4270_v55  ;;  %v4162_v35 = vld [vmem:[#allocation8 + $0x558] sm:$0xff] }
 0x416   :  { %7651 = vmatprep.subr.bf16.mxu0 %v9113_v12  ;;  %v4166_v12 = vld [vmem:[#allocation8 + $0x578] sm:$0xff] }
 0x417   :  { %v9216_v59 = vcombine.low %v4162_v35, %v4166_v12  ;;  %v4122_v55 = vld [vmem:[#allocation8 + $0x418] sm:$0xff] }
 0x418   :  { %7601 = vmatpush2.bf16.msra.mxu1 %v9526_v34  ;;  %v9217_v34 = vcombine.high %v4162_v35, %v4166_v12 }
 0x419   :  { %7652 = vmatpush2.bf16.msra.mxu0 %v9112_v40  ;;  %7602 = vmatprep.subr.bf16.mxu1 %v9519_v15  ;;  %v9313_v40 = vcombine.high %v4258_v37, %v4262_v62  ;;  %v4154_v15 = vld [vmem:[#allocation8 + $0x518] sm:$0xff] }
 0x41a   :  { %7707 = vmatprep.subr.bf16.mxu0 %v9361_v45  ;;  %v4158_v45 = vld [vmem:[#allocation8 + $0x538] sm:$0xff] }
 0x41b   :  { %v9208_v63 = vcombine.low %v4154_v15, %v4158_v45 }
 0x41c   :  { %7603 = vmatpush2.bf16.msra.mxu1 %v9518_v21  ;;  %7654 = vmatmul.mubr.bf16.vlgmr.msra.gmra.mxu0 %v10137_v28  ;;  %v9337_v28 = vcombine.high %v4282_v3, %v4286_v23  ;;  %v9209_v21 = vcombine.high %v4154_v15, %v4158_v45  ;;  %v4366_v3 = vld [vmem:[#allocation8 + $0xbb8] sm:$0xff]  ;;  %v10294_v23 = vpop.f32.mrf.mxu0 }
 0x41d   :  { %7708 = vmatpush1.bf16.msra.mxu0 %v9360_v58  ;;  %7739 = vmatprep.mubr.bf16.mxu0 %v10229_v41  ;;  %v4274_v41 = vld [vmem:[#allocation8 + $0x8d8] sm:$0xff]  ;;  %v9305_v58 = vcombine.high %v4250_v36, %v4254_v56  ;;  %v9417_v53 = vcombine.high %v4362_v54, %v4366_v3 }
 0x41e   :  { %7604 = vmatprep.subr.bf16.mxu1 %v9511_v50  ;;  %7709 = vmatprep.subr.bf16.mxu0 %v9353_v24  ;;  %v9329_v30 = vcombine.high %v4274_v41, %v4278_v9  ;;  %v9328_v60 = vcombine.low %v4274_v41, %v4278_v9  ;;  %v4150_v50 = vld [vmem:[#allocation8 + $0x4f8] sm:$0xff] }
 0x41f   :  { %v4370_v24 = vld [vmem:[#allocation8 + $0xbd8] sm:$0xff] }
 0x420   :  { %7605 = vmatpush2.bf16.msra.mxu1 %v9510_v61  ;;  %v4134_v41 = vld [vmem:[#allocation8 + $0x478] sm:$0xff] }
 0x421   :  { %7710 = vmatpush1.bf16.msra.mxu0 %v9352_v32  ;;  %7606 = vmatprep.subr.bf16.mxu1 %v9503_v1  ;;  %v10292_v32 = vpop.f32.mrf.mxu1  ;;  %v9425_v1 = vcombine.high %v4370_v24, %v4374_v27  ;;  %v4354_v9 = vld [vmem:[#allocation8 + $0xb58] sm:$0xff]  ;;  %v9185_v47 = vcombine.high %v4130_v11, %v4134_v41  ;;  %v9184_v35 = vcombine.low %v4130_v11, %v4134_v41 }
 0x422   :  { %7711 = vmatprep.subr.bf16.mxu0 %v9345_v14  ;;  %v4138_v14 = vld [vmem:[#allocation8 + $0x498] sm:$0xff] }
 0x423   :  { %v4338_v15 = vld [vmem:[#allocation8 + $0xad8] sm:$0xff] }
 0x424   :  { %7607 = vmatpush2.bf16.msra.mxu1 %v9502_v6  ;;  %v4342_v45 = vld [vmem:[#allocation8 + $0xaf8] sm:$0xff] }
 0x425   :  { %7712 = vmatpush1.bf16.msra.mxu0 %v9344_v7  ;;  %7608 = vmatprep.subr.bf16.mxu1 %v9495_v10  ;;  %v9424_v7 = vcombine.low %v4370_v24, %v4374_v27  ;;  %v9193_v10 = vcombine.high %v4138_v14, %v4142_v49  ;;  %v10306_v24 = vld [vmem:[#allocation10] sm:$0xff]  ;;  %v4330_v27 = vld [vmem:[#allocation8 + $0xa98] sm:$0xff] }
 0x426   :  { %7713 = vmatprep.subr.bf16.mxu0 %v9337_v28  ;;  %v10296_v28 = vpop.f32.mrf.mxu1  ;;  %v4326_v11 = vld [vmem:[#allocation8 + $0xa78] sm:$0xff] }
 0x428   :  { %7609 = vmatpush2.bf16.msra.mxu1 %v9494_v19  ;;  %v4358_v19 = vld [vmem:[#allocation8 + $0xb78] sm:$0xff]  ;;  %v10300_v25 = vpop.f32.mrf.mxu1 }
 0x429   :  { %7714 = vmatpush1.bf16.msra.mxu0 %v9336_v20  ;;  %7664 = vmatprep.subr.bf16.mxu1 %v9233_v17  ;;  %v10298_v20 = vpop.f32.mrf.mxu0  ;;  %v9192_v17 = vcombine.low %v4138_v14, %v4142_v49  ;;  %v9409_v26 = vcombine.high %v4354_v9, %v4358_v19  ;;  %v9408_v12 = vcombine.low %v4354_v9, %v4358_v19 }
 0x42a   :  { %7715 = vmatprep.subr.bf16.mxu0 %v9329_v30  ;;  %v9416_v30 = vcombine.low %v4362_v54, %v4366_v3  ;;  %v7188_v62 = vpop.f32.mrf.mxu1  ;;  %v9392_v14 = vcombine.low %v4338_v15, %v4342_v45 }
 0x42b   :  { %7611 = vmatmul.mubr.bf16.vlgmr.msra.gmra.mxu1 %v10266_v43 }
 0x42c   :  { %7665 = vmatpush1.bf16.msra.mxu1 %v9232_v39  ;;  %7696 = vmatprep.mubr.bf16.mxu1 %v10202_v33  ;;  %v4146_v33 = vld [vmem:[#allocation8 + $0x4d8] sm:$0xff]  ;;  %v10304_v36 = vpop.f32.mrf.mxu1 }
 0x42d   :  { %7716 = vmatpush1.bf16.msra.mxu0 %v9328_v60  ;;  %7666 = vmatprep.subr.bf16.mxu1 %v9225_v31  ;;  %v9201_v61 = vcombine.high %v4146_v33, %v4150_v50  ;;  %v9200_v6 = vcombine.low %v4146_v33, %v4150_v50  ;;  %v4126_v39 = vld [vmem:[#allocation8 + $0x438] sm:$0xff] }
 0x42e   :  { %7717 = vmatprep.subr.bf16.mxu0 %v9321_v29  ;;  %v4346_v60 = vld [vmem:[#allocation8 + $0xb18] sm:$0xff]  ;;  %v7145_v29 = vpop.f32.mrf.mxu0  ;;  %v9177_v37 = vcombine.high %v4122_v55, %v4126_v39  ;;  %v9176_v56 = vcombine.low %v4122_v55, %v4126_v39 }
 0x42f   :  { %v4350_v31 = vld [vmem:[#allocation8 + $0xb38] sm:$0xff] }
 0x430   :  { %7667 = vmatpush1.bf16.msra.mxu1 %v9224_v57  ;;  %v10302_v57 = vpop.f32.mrf.mxu0  ;;  %v4234_v33 = vld [vmem:[#allocation8 + $0x798] sm:$0xff] }
 0x431   :  { %7718 = vmatpush1.bf16.msra.mxu0 %v9320_v38  ;;  %7668 = vmatprep.subr.bf16.mxu1 %v9217_v34  ;;  %v9401_v38 = vcombine.high %v4346_v60, %v4350_v31  ;;  %v4242_v34 = vld [vmem:[#allocation8 + $0x7d8] sm:$0xff] }
 0x432   :  { %7719 = vmatprep.subr.bf16.mxu0 %v9313_v40  ;;  %v4246_v40 = vld [vmem:[#allocation8 + $0x7f8] sm:$0xff] }
 0x433   :  { %v4238_v50 = vld [vmem:[#allocation8 + $0x7b8] sm:$0xff] }
 0x434   :  { %7669 = vmatpush1.bf16.msra.mxu1 %v9216_v59  ;;  %v9400_v59 = vcombine.low %v4346_v60, %v4350_v31  ;;  %v9289_v49 = vcombine.high %v4234_v33, %v4238_v50  ;;  %v4222_v55 = vld [vmem:[#allocation8 + $0x738] sm:$0xff] }
 0x435   :  { %7720 = vmatpush1.bf16.msra.mxu0 %v9312_v2  ;;  %7670 = vmatprep.subr.bf16.mxu1 %v9209_v21  ;;  %v9297_v2 = vcombine.high %v4242_v34, %v4246_v40  ;;  %v7227_v21 = vpop.f32.mrf.mxu0  ;;  %v4314_v60 = vld [vmem:[#allocation8 + $0xa18] sm:$0xff] }
 0x436   :  { %7721 = vmatprep.subr.bf16.mxu0 %v9305_v58  ;;  %v9393_v58 = vcombine.high %v4338_v15, %v4342_v45  ;;  %v4318_v31 = vld [vmem:[#allocation8 + $0xa38] sm:$0xff] }
 0x437   :  { %v10311_v54 = vpop.f32.mrf.mxu0  ;;  %v4214_v15 = vld [vmem:[#allocation8 + $0x6f8] sm:$0xff] }
 0x438   :  { %7671 = vmatpush1.bf16.msra.mxu1 %v9208_v63  ;;  %v4334_v63 = vld [vmem:[#allocation8 + $0xab8] sm:$0xff] }
 0x439   :  { %7722 = vmatpush1.bf16.msra.mxu0 %v9304_v18  ;;  %7672 = vmatprep.subr.bf16.mxu1 %v9201_v61  ;;  %v4512_v18 = vrot.slane %v10306_v24, %v645_v48  ;;  %v7270_v61 = vpop.f32.mrf.mxu1  ;;  %v9385_v3 = vcombine.high %v4330_v27, %v4334_v63  ;;  %v9288_v48 = vcombine.low %v4234_v33, %v4238_v50  ;;  %v4202_v50 = vld [vmem:[#allocation8 + $0x698] sm:$0xff] }
 0x43a   :  { %7723 = vmatprep.subr.bf16.mxu0 %v9425_v1  ;;  %v9296_v1 = vcombine.low %v4242_v34, %v4246_v40  ;;  %v9384_v19 = vcombine.low %v4330_v27, %v4334_v63  ;;  %v9369_v34 = vcombine.high %v4314_v60, %v4318_v31  ;;  %v4210_v40 = vld [vmem:[#allocation8 + $0x6d8] sm:$0xff] }
 0x43b   :  { %v7142_v41 = vadd.f32 %v10294_v23, %v4512_v18  ;;  %v10314_v9 = vpop.f32.mrf.mxu1  ;;  %v4206_v27 = vld [vmem:[#allocation8 + $0x6b8] sm:$0xff]  ;;  %v9264_v63 = vcombine.low %v4210_v40, %v4214_v15 }
 0x43c   :  { %7673 = vmatpush1.bf16.msra.mxu1 %v9200_v6  ;;  %v4226_v6 = vld [vmem:[#allocation8 + $0x758] sm:$0xff] }
 0x43d   :  { %7724 = vmatpush2.bf16.msra.mxu0 %v9424_v7  ;;  %7674 = vmatprep.subr.bf16.mxu1 %v9193_v10  ;;  %v4230_v7 = vld [vmem:[#allocation8 + $0x778] sm:$0xff]  ;;  %v7146_v10 = vadd.f32 %v7145_v29, %v4512_v18  ;;  %v7185_v29 = vadd.f32 %v10296_v28, %v7142_v41  ;;  %v9368_v28 = vcombine.low %v4314_v60, %v4318_v31  ;;  %v9729_v60 = vld [vmem:[#allocation11 + $0x58] sm:$0xff]  }
 0x43e   :  { %7725 = vmatprep.subr.bf16.mxu0 %v9417_v53  ;;  %v4322_v53 = vld [vmem:[#allocation8 + $0xa58] sm:$0xff]  ;;  %v9280_v23 = vcombine.low %v4226_v6, %v4230_v7 }
 0x43f   :  { %v7189_v39 = vadd.f32 %v7188_v62, %v7146_v10  ;;  %v7228_v45 = vadd.f32 %v7227_v21, %v7185_v29  ;;  %v9257_v21 = vcombine.high %v4202_v50, %v4206_v27  ;;  %v4190_v41 = vld [vmem:[#allocation8 + $0x638] sm:$0xff] }
 0x440   :  { %7675 = vmatpush1.bf16.msra.mxu1 %v9192_v17  ;;  %v9281_v17 = vcombine.high %v4226_v6, %v4230_v7  ;;  %v9256_v6 = vcombine.low %v4202_v50, %v4206_v27  ;;  %v9724_v7 = vld [vmem:[#allocation11 + $0x30] sm:$0xff]  }
 0x441   :  { %7726 = vmatpush2.bf16.msra.mxu0 %v9416_v30  ;;  %7676 = vmatprep.subr.bf16.mxu1 %v9185_v47  ;;  %v7231_v30 = vpop.f32.mrf.mxu0  ;;  %v9377_v47 = vcombine.high %v4322_v53, %v4326_v11  ;;  %v4426_v31 = vld [vmem:[#allocation8 + $0xd98] sm:$0xff] }
 0x442   :  { %7727 = vmatprep.subr.bf16.mxu0 %v9409_v26  ;;  %v4218_v26 = vld [vmem:[#allocation8 + $0x718] sm:$0xff] }
 0x443   :  { %v9272_v62 = vcombine.low %v4218_v26, %v4222_v55  ;;  %v4430_v29 = vld [vmem:[#allocation8 + $0xdb8] sm:$0xff] }
 0x444   :  { %7677 = vmatpush1.bf16.msra.mxu1 %v9184_v35  ;;  %v7274_v35 = vpop.f32.mrf.mxu1 }
 0x445   :  { %7728 = vmatpush2.bf16.msra.mxu0 %v9408_v12  ;;  %7678 = vmatprep.subr.bf16.mxu1 %v9177_v37  ;;  %v7232_v12 = vadd.f32 %v7231_v30, %v7189_v39  ;;  %v9376_v37 = vcombine.low %v4322_v53, %v4326_v11  ;;  %v9725_v53 = vld [vmem:[#allocation11 + $0x68] sm:$0xff]   ;;  %v4186_v11 = vld [vmem:[#allocation8 + $0x618] sm:$0xff]  ;;  %v9727_v30 = vld [vmem:[#allocation11 + $0x60] sm:$0xff]  }
 0x446   :  { %7729 = vmatprep.subr.bf16.mxu0 %v9401_v38  ;;  %v9273_v38 = vcombine.high %v4218_v26, %v4222_v55  ;;  %v9240_v26 = vcombine.low %v4186_v11, %v4190_v41  ;;  %v9728_v55 = vld [vmem:[#allocation11 + $0x20] sm:$0xff]  }
 0x448   :  { %7679 = vmatpush1.bf16.msra.mxu1 %v9176_v56  ;;  %v7275_v56 = vadd.f32 %v7274_v35, %v7232_v12  ;;  %v4508_v35 = vrot.slane %v10306_v24, %v641_v13  ;;  %v9730_v12 = vld [vmem:[#allocation11 + $0x18] sm:$0xff]   ;;  %v9480_v13 = vcombine.low %v4426_v31, %v4430_v29 }
 0x449   :  { %7730 = vmatpush2.bf16.msra.mxu0 %v9400_v59  ;;  %7680 = vmatprep.subr.bf16.mxu1 %v9297_v2  ;;  %v7271_v59 = vadd.f32 %v7270_v61, %v7228_v45  ;;  %v9265_v2 = vcombine.high %v4210_v40, %v4214_v15  ;;  %v4198_v61 = vld [vmem:[#allocation8 + $0x678] sm:$0xff] }
 0x44a   :  { %7731 = vmatprep.subr.bf16.mxu0 %v9393_v58  ;;  %v9721_v58 = vld [vmem:[#allocation11 + $0x78] sm:$0xff]   ;;  %v7802_v33 = vmax.f32 %v7275_v56, 0.0  ;;  %v4418_v40 = vld [vmem:[#allocation8 + $0xd58] sm:$0xff]  ;;  %v7140_v45 = vadd.f32 %v10290_v51, %v4508_v35 }
 0x44b   :  { %v7794_v18 = vmax.f32 %v7271_v59, 0.0  ;;  %v4422_v15 = vld [vmem:[#allocation8 + $0xd78] sm:$0xff] }
 0x44c   :  { %7681 = vmatpush2.bf16.msra.mxu1 %v9296_v1  ;;  %v9722_v1 = vld [vmem:[#allocation11 + $0x38] sm:$0xff]   ;;  %v9732_v56 = vld [vmem:[#allocation11 + $0x10] sm:$0xff]   ;;  %v9472_v51 = vcombine.low %v4418_v40, %v4422_v15 }
 0x44d   :  { %7732 = vmatpush2.bf16.msra.mxu0 %v9392_v14  ;;  %7682 = vmatprep.subr.bf16.mxu1 %v9289_v49  ;;  %v9723_v14 = vld [vmem:[#allocation11 + $0x70] sm:$0xff]  }
 0x44e   :  { %7733 = vmatprep.subr.bf16.mxu0 %v9385_v3  ;;  %v4194_v49 = vld [vmem:[#allocation8 + $0x658] sm:$0xff]  ;;  %v7810_v3 = vpack.c.bf16 %v7802_v33, %v7794_v18 }
 0x44f   :  { %v9249_v10 = vcombine.high %v4194_v49, %v4198_v61  ;;  %v4406_v18 = vld [vmem:[#allocation8 + $0xcf8] sm:$0xff] }
 0x450   :  { %7683 = vmatpush2.bf16.msra.mxu1 %v9288_v48  ;;  %v9248_v48 = vcombine.low %v4194_v49, %v4198_v61  ;;  %v4394_v49 = vld [vmem:[#allocation8 + $0xc98] sm:$0xff] }
 0x451   :  { %7734 = vmatpush2.bf16.msra.mxu0 %v9384_v19  ;;  %7684 = vmatprep.subr.bf16.mxu1 %v9281_v17  ;;  %v9726_v19 = vld [vmem:[#allocation11 + $0x28] sm:$0xff]   ;;  %v9241_v17 = vcombine.high %v4186_v11, %v4190_v41  ;;  %v4398_v61 = vld [vmem:[#allocation8 + $0xcb8] sm:$0xff] }
 0x452   :  { %7735 = vmatprep.subr.bf16.mxu0 %v9377_v47  ;;  %v4434_v47 = vld [vmem:[#allocation8 + $0xdd8] sm:$0xff]  ;;  %v9448_v41 = vcombine.low %v4394_v49, %v4398_v61 }
 0x453   :  { %v9755_v11 = vld [vmem:[#allocation11 + $0x170] sm:$0xff]  }
 0x454   :  { %7685 = vmatpush2.bf16.msra.mxu1 %v9280_v23 }
 0x455   :  { %7736 = vmatpush2.bf16.msra.mxu0 %v9376_v37  ;;  %7686 = vmatprep.subr.bf16.mxu1 %v9273_v38  ;;  %v9481_v37 = vcombine.high %v4426_v31, %v4430_v29  ;;  %v7144_v38 = vadd.f32 %v10298_v20, %v4508_v35  ;;  %v9733_v20 = vld [vmem:[#allocation11 + $0x48] sm:$0xff]   ;;  %v9759_v31 = vld [vmem:[#allocation11 + $0x160] sm:$0xff]   ;;  %v10331_v35 = vpop.f32.mrf.mxu0 }
 0x456   :  { %7737 = vmatprep.subr.bf16.mxu0 %v9369_v34  ;;  %v9731_v34 = vld [vmem:[#allocation11 + $0x50] sm:$0xff]  }
 0x457   :  { %v7187_v59 = vadd.f32 %v10300_v25, %v7144_v38  ;;  %v9735_v25 = vld [vmem:[#allocation11 + $0x40] sm:$0xff]   ;;  %v4490_v38 = vld [vmem:[#allocation8 + $0xf98] sm:$0xff] }
 0x458   :  { %7687 = vmatpush2.bf16.msra.mxu1 %v9272_v62  ;;  %v9473_v62 = vcombine.high %v4418_v40, %v4422_v15  ;;  %v9761_v40 = vld [vmem:[#allocation11 + $0x158] sm:$0xff]  }
 0x459   :  { %7738 = vmatpush2.bf16.msra.mxu0 %v9368_v28  ;;  %7688 = vmatprep.subr.bf16.mxu1 %v9265_v2  ;;  %v4410_v28 = vld [vmem:[#allocation8 + $0xd18] sm:$0xff] }
 0x45a   :  { %9619 = vmatprep.subr.bf16.mxu0 %v9721_v58  ;;  %v4414_v2 = vld [vmem:[#allocation8 + $0xd38] sm:$0xff]  ;;  %v7183_v58 = vadd.f32 %v10292_v32, %v7140_v45  ;;  %v7313_v45 = vpop.f32.mrf.mxu0 }
 0x45b   :  { %v9465_v33 = vcombine.high %v4410_v28, %v4414_v2  ;;  %v9464_v32 = vcombine.low %v4410_v28, %v4414_v2  ;;  %v9763_v28 = vld [vmem:[#allocation11 + $0x150] sm:$0xff]  }
 0x45c   :  { %7689 = vmatpush2.bf16.msra.mxu1 %v9264_v63  ;;  %7740 = vmatmul.mubr.bf16.vlgmr.msra.gmra.mxu0 %v10252_v5  ;;  %v4438_v5 = vld [vmem:[#allocation8 + $0xdf8] sm:$0xff]  ;;  %v7226_v50 = vadd.f32 %v10302_v57, %v7183_v58  ;;  %v10337_v58 = vpop.f32.mrf.mxu0 }
 0x45d   :  { %9620 = vmatpush3.bf16.msra.mxu0 %v9722_v1  ;;  %8368 = vmatprep.mubr.bf16.mxu0 %v7810_v3  ;;  %v9489_v39 = vcombine.high %v4434_v47, %v4438_v5  ;;  %v9488_v23 = vcombine.low %v4434_v47, %v4438_v5  ;;  %v4402_v63 = vld [vmem:[#allocation8 + $0xcd8] sm:$0xff]  ;;  %v9753_v3 = vld [vmem:[#allocation11 + $0x178] sm:$0xff]   ;;  %v9757_v47 = vld [vmem:[#allocation11 + $0x168] sm:$0xff]  }
 0x45e   :  { %7690 = vmatprep.subr.bf16.mxu1 %v9257_v21  ;;  %9621 = vmatprep.subr.bf16.mxu0 %v9723_v14  ;;  %v7269_v1 = vadd.f32 %v10304_v36, %v7226_v50  ;;  %v9457_v21 = vcombine.high %v4402_v63, %v4406_v18  ;;  %v4386_v36 = vld [vmem:[#allocation8 + $0xc58] sm:$0xff] }
 0x45f   :  { %v4478_v50 = vld [vmem:[#allocation8 + $0xf38] sm:$0xff] }
 0x460   :  { %7691 = vmatpush2.bf16.msra.mxu1 %v9256_v6  ;;  %v7793_v57 = vmax.f32 %v7269_v1, 0.0  ;;  %v9449_v6 = vcombine.high %v4394_v49, %v4398_v61 }
 0x461   :  { %9622 = vmatpush3.bf16.msra.mxu0 %v9724_v7  ;;  %7692 = vmatprep.subr.bf16.mxu1 %v9249_v10  ;;  %v9754_v7 = vld [vmem:[#allocation11 + $0x138] sm:$0xff]  }
 0x462   :  { %9623 = vmatprep.subr.bf16.mxu0 %v9725_v53  ;;  %v4390_v53 = vld [vmem:[#allocation8 + $0xc78] sm:$0xff] }
 0x463   :  { %v9440_v5 = vcombine.low %v4386_v36, %v4390_v53 }
 0x464   :  { %7693 = vmatpush2.bf16.msra.mxu1 %v9248_v48  ;;  %v9441_v48 = vcombine.high %v4386_v36, %v4390_v53  ;;  %v4520_v53 = vrot.slane %v10306_v24, %v653_v52  ;;  %v4446_v52 = vld [vmem:[#allocation8 + $0xe38] sm:$0xff] }
 0x465   :  { %9624 = vmatpush3.bf16.msra.mxu0 %v9726_v19  ;;  %7694 = vmatprep.subr.bf16.mxu1 %v9241_v17  ;;  %v9756_v19 = vld [vmem:[#allocation11 + $0x130] sm:$0xff]  }
 0x466   :  { %9625 = vmatprep.subr.bf16.mxu0 %v9727_v30  ;;  %v4378_v17 = vld [vmem:[#allocation8 + $0xc18] sm:$0xff] }
 0x467   :  { %v4382_v30 = vld [vmem:[#allocation8 + $0xc38] sm:$0xff] }
 0x468   :  { %7695 = vmatpush2.bf16.msra.mxu1 %v9240_v26  ;;  %v9433_v26 = vcombine.high %v4378_v17, %v4382_v30  ;;  %v9432_v29 = vcombine.low %v4378_v17, %v4382_v30  ;;  %v4454_v17 = vld [vmem:[#allocation8 + $0xe78] sm:$0xff] }
 0x469   :  { %9626 = vmatpush3.bf16.msra.mxu0 %v9728_v55  ;;  %7750 = vmatprep.subr.bf16.mxu1 %v9489_v39  ;;  %v9758_v55 = vld [vmem:[#allocation11 + $0x128] sm:$0xff]   ;;  %v4498_v39 = vld [vmem:[#allocation8 + $0xfd8] sm:$0xff] }
 0x46a   :  { %9627 = vmatprep.subr.bf16.mxu0 %v9729_v60  ;;  %v4502_v60 = vld [vmem:[#allocation8 + $0xff8] sm:$0xff] }
 0x46b   :  { %7697 = vmatmul.mubr.bf16.vlgmr.msra.gmra.mxu1 %v10173_v16  ;;  %v7230_v16 = vadd.f32 %v10311_v54, %v7187_v59  ;;  %v9736_v54 = vld [vmem:[#allocation11] sm:$0xff]   ;;  %v9552_v15 = vcombine.low %v4498_v39, %v4502_v60  ;;  %v4482_v59 = vld [vmem:[#allocation8 + $0xf58] sm:$0xff] }
 0x46c   :  { %7751 = vmatpush1.bf16.msra.mxu1 %v9488_v23  ;;  %7782 = vmatprep.mubr.bf16.mxu1 %v10264_v44  ;;  %v9734_v44 = vld [vmem:[#allocation11 + $0x8] sm:$0xff]   ;;  %v10333_v23 = vpop.f32.mrf.mxu1 }
 0x46d   :  { %9628 = vmatpush3.bf16.msra.mxu0 %v9730_v12  ;;  %7752 = vmatprep.subr.bf16.mxu1 %v9481_v37  ;;  %v7273_v27 = vadd.f32 %v10314_v9, %v7230_v16  ;;  %v9456_v9 = vcombine.low %v4402_v63, %v4406_v18  ;;  %v9553_v12 = vcombine.high %v4498_v39, %v4502_v60  ;;  %v9760_v37 = vld [vmem:[#allocation11 + $0x120] sm:$0xff]   ;;  %v7317_v63 = vpop.f32.mrf.mxu0 }
 0x46e   :  { %9629 = vmatprep.subr.bf16.mxu0 %v9731_v34  ;;  %v4494_v34 = vld [vmem:[#allocation8 + $0xfb8] sm:$0xff] }
 0x46f   :  { %v7801_v14 = vmax.f32 %v7273_v27, 0.0  ;;  %v9544_v2 = vcombine.low %v4490_v38, %v4494_v34  ;;  %v9765_v27 = vld [vmem:[#allocation11 + $0x148] sm:$0xff]   ;;  %v10341_v49 = vpop.f32.mrf.mxu0 }
 0x470   :  { %7753 = vmatpush1.bf16.msra.mxu1 %v9480_v13  ;;  %v10335_v13 = vpop.f32.mrf.mxu1 }
 0x471   :  { %9630 = vmatpush3.bf16.msra.mxu0 %v9732_v56  ;;  %7754 = vmatprep.subr.bf16.mxu1 %v9473_v62  ;;  %v7809_v10 = vpack.c.bf16 %v7801_v14, %v7793_v57  ;;  %v9545_v56 = vcombine.high %v4490_v38, %v4494_v34  ;;  %v9762_v62 = vld [vmem:[#allocation11 + $0x118] sm:$0xff]   ;;  %v9767_v14 = vld [vmem:[#allocation11 + $0x140] sm:$0xff]  }
 0x472   :  { %9631 = vmatprep.subr.bf16.mxu0 %v9733_v20  ;;  %v4486_v20 = vld [vmem:[#allocation8 + $0xf78] sm:$0xff]  ;;  %v10339_v16 = vpop.f32.mrf.mxu1 }
 0x474   :  { %7755 = vmatpush1.bf16.msra.mxu1 %v9472_v51  ;;  %v9537_v51 = vcombine.high %v4482_v59, %v4486_v20  ;;  %v7360_v18 = vpop.f32.mrf.mxu1 }
 0x475   :  { %9632 = vmatpush3.bf16.msra.mxu0 %v9734_v44  ;;  %7756 = vmatprep.subr.bf16.mxu1 %v9465_v33  ;;  %v9764_v44 = vld [vmem:[#allocation11 + $0x110] sm:$0xff]  }
 0x476   :  { %9633 = vmatprep.subr.bf16.mxu0 %v9735_v25  ;;  %v4474_v33 = vld [vmem:[#allocation8 + $0xf18] sm:$0xff]  ;;  %v9536_v25 = vcombine.low %v4482_v59, %v4486_v20  ;;  %v10343_v61 = vpop.f32.mrf.mxu1 }
 0x477   :  { %v9529_v1 = vcombine.high %v4474_v33, %v4478_v50 }
 0x478   :  { %7757 = vmatpush1.bf16.msra.mxu1 %v9464_v32  ;;  %v9766_v32 = vld [vmem:[#allocation11 + $0x108] sm:$0xff]   ;;  %v7442_v36 = vpop.f32.mrf.mxu1 }
 0x479   :  { %9634 = vmatpush3.bf16.msra.mxu0 %v9736_v54  ;;  %7758 = vmatprep.subr.bf16.mxu1 %v9457_v21  ;;  %v4466_v54 = vld [vmem:[#allocation8 + $0xed8] sm:$0xff] }
 0x47a   :  { %9663 = vmatprep.subr.bf16.mxu0 %v9753_v3  ;;  %v4470_v21 = vld [vmem:[#allocation8 + $0xef8] sm:$0xff]  ;;  %v9528_v3 = vcombine.low %v4474_v33, %v4478_v50  ;;  %v9742_v33 = vld [vmem:[#allocation11 + $0xa8] sm:$0xff]   ;;  %v9743_v50 = vld [vmem:[#allocation11 + $0xe0] sm:$0xff]  }
 0x47b   :  { %v9521_v57 = vcombine.high %v4466_v54, %v4470_v21 }
 0x47c   :  { %7759 = vmatpush1.bf16.msra.mxu1 %v9456_v9  ;;  %8369 = vmatmul.mubr.bf16.vlgmr.msra.gmra.mxu0 %v7809_v10  ;;  %v9768_v9 = vld [vmem:[#allocation11 + $0x100] sm:$0xff]   ;;  %v7399_v10 = vpop.f32.mrf.mxu0 }
 0x47d   :  { %7760 = vmatprep.subr.bf16.mxu1 %v9449_v6  ;;  %9664 = vmatpush3.bf16.msra.mxu0 %v9754_v7  ;;  %v4458_v6 = vld [vmem:[#allocation8 + $0xe98] sm:$0xff] }
 0x47e   :  { %9665 = vmatprep.subr.bf16.mxu0 %v9755_v11  ;;  %v4462_v7 = vld [vmem:[#allocation8 + $0xeb8] sm:$0xff]  ;;  %v9520_v11 = vcombine.low %v4466_v54, %v4470_v21  ;;  %v7401_v30 = vpop.f32.mrf.mxu0 }
 0x47f   :  { %v9748_v21 = vld [vmem:[#allocation11 + $0x90] sm:$0xff]  }
 0x480   :  { %7761 = vmatpush1.bf16.msra.mxu1 %v9448_v41  ;;  %v9513_v41 = vcombine.high %v4458_v6, %v4462_v7 }
 0x481   :  { %7762 = vmatprep.subr.bf16.mxu1 %v9441_v48  ;;  %9666 = vmatpush3.bf16.msra.mxu0 %v9756_v19  ;;  %v7318_v48 = vadd.f32 %v7317_v63, %v4520_v53  ;;  %v4450_v19 = vld [vmem:[#allocation8 + $0xe58] sm:$0xff]  ;;  %v4516_v63 = vrot.slane %v10306_v24, %v649_v0 }
 0x482   :  { %9667 = vmatprep.subr.bf16.mxu0 %v9757_v47  ;;  %v7444_v47 = vpop.f32.mrf.mxu1  ;;  %v9505_v39 = vcombine.high %v4450_v19, %v4454_v17  ;;  %v9504_v38 = vcombine.low %v4450_v19, %v4454_v17  ;;  %v9776_v19 = vld [vmem:[#allocation11 + $0x1a0] sm:$0xff]  }
 0x484   :  { %7763 = vmatpush1.bf16.msra.mxu1 %v9440_v5  ;;  %v7314_v5 = vadd.f32 %v7313_v45, %v4520_v53 }
 0x485   :  { %7764 = vmatprep.subr.bf16.mxu1 %v9433_v26  ;;  %9668 = vmatpush3.bf16.msra.mxu0 %v9758_v55  ;;  %v7361_v26 = vadd.f32 %v7360_v18, %v7318_v48  ;;  %v9512_v55 = vcombine.low %v4458_v6, %v4462_v7  ;;  %v9746_v18 = vld [vmem:[#allocation11 + $0x98] sm:$0xff]   ;;  %v9774_v48 = vld [vmem:[#allocation11 + $0x1a8] sm:$0xff]  }
 0x486   :  { %9669 = vmatprep.subr.bf16.mxu0 %v9759_v31  ;;  %v7357_v60 = vadd.f32 %v10335_v13, %v7314_v5  ;;  %v4442_v31 = vld [vmem:[#allocation8 + $0xe18] sm:$0xff]  ;;  %v9738_v13 = vld [vmem:[#allocation11 + $0xb8] sm:$0xff]  }
 0x487   :  { %v9497_v34 = vcombine.high %v4442_v31, %v4446_v52  ;;  %v9496_v45 = vcombine.low %v4442_v31, %v4446_v52  ;;  %v4528_v52 = vrot.slane %v10306_v24, %v661_v8  ;;  %v9780_v8 = vld [vmem:[#allocation11 + $0x190] sm:$0xff]  }
 0x488   :  { %7765 = vmatpush1.bf16.msra.mxu1 %v9432_v29  ;;  %v7403_v29 = vpop.f32.mrf.mxu0 }
 0x489   :  { %7766 = vmatprep.subr.bf16.mxu1 %v9553_v12  ;;  %9670 = vmatpush3.bf16.msra.mxu0 %v9760_v37  ;;  %v7446_v12 = vpop.f32.mrf.mxu1  ;;  %v7404_v37 = vadd.f32 %v7403_v29, %v7361_v26  ;;  %v4524_v29 = vrot.slane %v10306_v24, %v657_v42 }
 0x48a   :  { %9671 = vmatprep.subr.bf16.mxu0 %v9761_v40  ;;  %v7400_v40 = vadd.f32 %v7399_v10, %v7357_v60  ;;  %v7483_v17 = vpop.f32.mrf.mxu0 }
 0x48c   :  { %7767 = vmatpush2.bf16.msra.mxu1 %v9552_v15  ;;  %v7447_v15 = vadd.f32 %v7446_v12, %v7404_v37  ;;  %v7485_v5 = vpop.f32.mrf.mxu0 }
 0x48d   :  { %7768 = vmatprep.subr.bf16.mxu1 %v9545_v56  ;;  %9672 = vmatpush3.bf16.msra.mxu0 %v9762_v62  ;;  %v7443_v56 = vadd.f32 %v7442_v36, %v7400_v40  ;;  %v9737_v62 = vld [vmem:[#allocation11 + $0xf8] sm:$0xff]   ;;  %v7484_v40 = vadd.f32 %v7483_v17, %v4524_v29 }
 0x48e   :  { %9673 = vmatprep.subr.bf16.mxu0 %v9763_v28  ;;  %v7804_v59 = vmax.f32 %v7447_v15, 0.0  ;;  %v9739_v28 = vld [vmem:[#allocation11 + $0xf0] sm:$0xff]   ;;  %v7487_v26 = vpop.f32.mrf.mxu0 }
 0x48f   :  { %v7796_v20 = vmax.f32 %v7443_v56, 0.0 }
 0x490   :  { %7769 = vmatpush2.bf16.msra.mxu1 %v9544_v2 }
 0x491   :  { %7770 = vmatprep.subr.bf16.mxu1 %v9537_v51  ;;  %9674 = vmatpush3.bf16.msra.mxu0 %v9764_v44  ;;  %v7812_v2 = vpack.c.bf16 %v7804_v59, %v7796_v20  ;;  %v9740_v51 = vld [vmem:[#allocation11 + $0xb0] sm:$0xff]   ;;  %v9741_v44 = vld [vmem:[#allocation11 + $0xe8] sm:$0xff]  }
 0x492   :  { %9675 = vmatprep.subr.bf16.mxu0 %v9765_v27  ;;  %v9744_v27 = vld [vmem:[#allocation11 + $0xa0] sm:$0xff]  }
 0x494   :  { %7771 = vmatpush2.bf16.msra.mxu1 %v9536_v25  ;;  %v9745_v25 = vld [vmem:[#allocation11 + $0xd8] sm:$0xff]  }
 0x495   :  { %7772 = vmatprep.subr.bf16.mxu1 %v9529_v1  ;;  %9676 = vmatpush3.bf16.msra.mxu0 %v9766_v32  ;;  %v9747_v1 = vld [vmem:[#allocation11 + $0xd0] sm:$0xff]   ;;  %v7312_v32 = vadd.f32 %v10331_v35, %v4516_v63  ;;  %v9752_v35 = vld [vmem:[#allocation11 + $0x80] sm:$0xff]  }
 0x496   :  { %9677 = vmatprep.subr.bf16.mxu0 %v9767_v14 }
 0x497   :  { %v7355_v14 = vadd.f32 %v10333_v23, %v7312_v32  ;;  %v9770_v23 = vld [vmem:[#allocation11 + $0x1b8] sm:$0xff]  }
 0x498   :  { %7773 = vmatpush2.bf16.msra.mxu1 %v9528_v3  ;;  %v9749_v3 = vld [vmem:[#allocation11 + $0xc8] sm:$0xff]  }
 0x499   :  { %7774 = vmatprep.subr.bf16.mxu1 %v9521_v57  ;;  %9678 = vmatpush3.bf16.msra.mxu0 %v9768_v9  ;;  %v9750_v9 = vld [vmem:[#allocation11 + $0x88] sm:$0xff]   ;;  %v7398_v0 = vadd.f32 %v10341_v49, %v7355_v14 }
 0x49a   :  { %v9773_v49 = vld [vmem:[#allocation11 + $0x1e8] sm:$0xff]  }
 0x49b   :  { %v7441_v7 = vadd.f32 %v10343_v61, %v7398_v0  ;;  %v9775_v61 = vld [vmem:[#allocation11 + $0x1e0] sm:$0xff]  }
 0x49c   :  { %7775 = vmatpush2.bf16.msra.mxu1 %v9520_v11  ;;  %v9771_v11 = vld [vmem:[#allocation11 + $0x1f0] sm:$0xff]  }
 0x49d   :  { %7776 = vmatprep.subr.bf16.mxu1 %v9513_v41  ;;  %v7795_v36 = vmax.f32 %v7441_v7, 0.0  ;;  %v9772_v41 = vld [vmem:[#allocation11 + $0x1b0] sm:$0xff]  }
 0x4a0   :  { %7777 = vmatpush2.bf16.msra.mxu1 %v9512_v55 }
 0x4a1   :  { %7778 = vmatprep.subr.bf16.mxu1 %v9505_v39  ;;  %v7489_v39 = vpop.f32.mrf.mxu0 }
 0x4a2   :  { %v7490_v56 = vadd.f32 %v7489_v39, %v4528_v52 }
 0x4a3   :  { %v7569_v31 = vpop.f32.mrf.mxu0 }
 0x4a4   :  { %7779 = vmatpush2.bf16.msra.mxu1 %v9504_v38  ;;  %v7486_v38 = vadd.f32 %v7485_v5, %v4528_v52 }
 0x4a5   :  { %7780 = vmatprep.subr.bf16.mxu1 %v9497_v34  ;;  %v7571_v37 = vpop.f32.mrf.mxu0  ;;  %v7488_v34 = vadd.f32 %v7487_v26, %v4524_v29 }
 0x4a7   :  { %v7573_v59 = vpop.f32.mrf.mxu0 }
 0x4a8   :  { %7781 = vmatpush2.bf16.msra.mxu1 %v9496_v45 }
 0x4a9   :  { %9641 = vmatprep.subr.bf16.mxu1 %v9737_v62  ;;  %v7575_v42 = vpop.f32.mrf.mxu0 }
 0x4ab   :  { %7783 = vmatmul.mubr.bf16.vlgmr.msra.gmra.mxu1 %v10266_v43  ;;  %v7316_v43 = vadd.f32 %v10337_v58, %v4516_v63  ;;  %v9751_v58 = vld [vmem:[#allocation11 + $0xc0] sm:$0xff]   ;;  %v7526_v55 = vpop.f32.mrf.mxu1 }
 0x4ac   :  { %9642 = vmatpush3.bf16.msra.mxu1 %v9738_v13  ;;  %8409 = vmatprep.mubr.bf16.mxu1 %v7812_v2  ;;  %v7527_v20 = vadd.f32 %v7526_v55, %v7484_v40  ;;  %v9779_v2 = vld [vmem:[#allocation11 + $0x1d0] sm:$0xff]  }
 0x4ad   :  { %9643 = vmatprep.subr.bf16.mxu1 %v9739_v28  ;;  %v7359_v54 = vadd.f32 %v10339_v16, %v7316_v43  ;;  %v9769_v16 = vld [vmem:[#allocation11 + $0x1f8] sm:$0xff]   ;;  %v7528_v60 = vpop.f32.mrf.mxu1  ;;  %v9781_v43 = vld [vmem:[#allocation11 + $0x1c8] sm:$0xff]  }
 0x4ae   :  { %v7529_v45 = vadd.f32 %v7528_v60, %v7486_v38 }
 0x4af   :  { %v7402_v57 = vadd.f32 %v7401_v30, %v7359_v54  ;;  %v9777_v30 = vld [vmem:[#allocation11 + $0x1d8] sm:$0xff]   ;;  %v7530_v12 = vpop.f32.mrf.mxu1  ;;  %v9782_v54 = vld [vmem:[#allocation11 + $0x188] sm:$0xff]  }
 0x4b0   :  { %9644 = vmatpush3.bf16.msra.mxu1 %v9740_v51  ;;  %v7531_v62 = vadd.f32 %v7530_v12, %v7488_v34 }
 0x4b1   :  { %9645 = vmatprep.subr.bf16.mxu1 %v9741_v44  ;;  %v7445_v6 = vadd.f32 %v7444_v47, %v7402_v57  ;;  %v9778_v47 = vld [vmem:[#allocation11 + $0x198] sm:$0xff]   ;;  %v7532_v15 = vpop.f32.mrf.mxu1  ;;  %v7572_v44 = vadd.f32 %v7571_v37, %v7529_v45 }
 0x4b2   :  { %v7533_v28 = vadd.f32 %v7532_v15, %v7490_v56 }
 0x4b3   :  { %v7803_v10 = vmax.f32 %v7445_v6, 0.0  ;;  %v9784_v6 = vld [vmem:[#allocation11 + $0x180] sm:$0xff]  }
 0x4b4   :  { %9646 = vmatpush3.bf16.msra.mxu1 %v9742_v33  ;;  %v7574_v33 = vadd.f32 %v7573_v59, %v7531_v62 }
 0x4b5   :  { %9647 = vmatprep.subr.bf16.mxu1 %v9743_v50  ;;  %v7811_v53 = vpack.c.bf16 %v7803_v10, %v7795_v36  ;;  %v7570_v50 = vadd.f32 %v7569_v31, %v7527_v20 }
 0x4b8   :  { %9648 = vmatpush3.bf16.msra.mxu1 %v9744_v27 }
 0x4b9   :  { %9649 = vmatprep.subr.bf16.mxu1 %v9745_v25 }
 0x4bc   :  { %9650 = vmatpush3.bf16.msra.mxu1 %v9746_v18  ;;  %v7576_v18 = vadd.f32 %v7575_v42, %v7533_v28 }
 0x4bd   :  { %9651 = vmatprep.subr.bf16.mxu1 %v9747_v1 }
 0x4c0   :  { %9652 = vmatpush3.bf16.msra.mxu1 %v9748_v21 }
 0x4c1   :  { %9653 = vmatprep.subr.bf16.mxu1 %v9749_v3 }
 0x4c4   :  { %9654 = vmatpush3.bf16.msra.mxu1 %v9750_v9  ;;  %v9783_v9 = vld [vmem:[#allocation11 + $0x1c0] sm:$0xff]  }
 0x4c5   :  { %9655 = vmatprep.subr.bf16.mxu1 %v9751_v58 }
 0x4c8   :  { %9656 = vmatpush3.bf16.msra.mxu1 %v9752_v35 }
 0x4c9   :  { %9685 = vmatprep.subr.bf16.mxu1 %v9769_v16 }
 0x4cb   :  { %8410 = vmatmul.mubr.bf16.vlgmr.msra.gmra.mxu1 %v7811_v53 }
 0x4cc   :  { %9686 = vmatpush3.bf16.msra.mxu1 %v9770_v23 }
 0x4cd   :  { %9687 = vmatprep.subr.bf16.mxu1 %v9771_v11 }
 0x4d0   :  { %9688 = vmatpush3.bf16.msra.mxu1 %v9772_v41  ;;  %v4536_v41 = vrot.slane %v10306_v24, %v669_v46 }
 0x4d1   :  { %9689 = vmatprep.subr.bf16.mxu1 %v9773_v49  ;;  %v4532_v49 = vrot.slane %v10306_v24, %v665_v22 }
 0x4d4   :  { %9690 = vmatpush3.bf16.msra.mxu1 %v9774_v48 }
 0x4d5   :  { %9691 = vmatprep.subr.bf16.mxu1 %v9775_v61 }
 0x4d8   :  { %9692 = vmatpush3.bf16.msra.mxu1 %v9776_v19 }
 0x4d9   :  { %9693 = vmatprep.subr.bf16.mxu1 %v9777_v30 }
 0x4dc   :  { %9694 = vmatpush3.bf16.msra.mxu1 %v9778_v47  ;;  %v7655_v35 = vpop.f32.mrf.mxu0 }
 0x4dd   :  { %9695 = vmatprep.subr.bf16.mxu1 %v9779_v2  ;;  %v7656_v30 = vadd.f32 %v7655_v35, %v4532_v49 }
 0x4de   :  { %v7657_v10 = vpop.f32.mrf.mxu0 }
 0x4df   :  { %v7658_v19 = vadd.f32 %v7657_v10, %v4536_v41 }
 0x4e0   :  { %9696 = vmatpush3.bf16.msra.mxu1 %v9780_v8  ;;  %v7659_v16 = vpop.f32.mrf.mxu0 }
 0x4e1   :  { %9697 = vmatprep.subr.bf16.mxu1 %v9781_v43  ;;  %v7660_v17 = vadd.f32 %v7659_v16, %v4532_v49 }
 0x4e2   :  { %v7661_v23 = vpop.f32.mrf.mxu0 }
 0x4e3   :  { %v7662_v5 = vadd.f32 %v7661_v23, %v4536_v41 }
 0x4e4   :  { %9698 = vmatpush3.bf16.msra.mxu1 %v9782_v54 }
 0x4e5   :  { %9699 = vmatprep.subr.bf16.mxu1 %v9783_v9 }
 0x4e8   :  { %9700 = vmatpush3.bf16.msra.mxu1 %v9784_v6 }
 0x4eb   :  { %v7612_v13 = vpop.f32.mrf.mxu1 }
 0x4ec   :  { %v7613_v1 = vadd.f32 %v7612_v13, %v7570_v50 }
 0x4ed   :  { %v7614_v51 = vpop.f32.mrf.mxu1 }
 0x4ee   :  { %v7615_v25 = vadd.f32 %v7614_v51, %v7572_v44  ;;  %v7797_v0 = vmax.f32 %v7613_v1, 0.0 }
 0x4ef   :  { %v7616_v27 = vpop.f32.mrf.mxu1 }
 0x4f0   :  { %v7617_v63 = vadd.f32 %v7616_v27, %v7574_v33  ;;  %v7798_v3 = vmax.f32 %v7615_v25, 0.0 }
 0x4f1   :  { %v7618_v32 = vpop.f32.mrf.mxu1 }
 0x4f2   :  { %v7619_v21 = vadd.f32 %v7618_v32, %v7576_v18  ;;  %v7805_v14 = vmax.f32 %v7617_v63, 0.0  ;;  %v9554_v18 = vld [vmem:[#allocation13] ss:$0 sm:$0xff] }
 0x4f4   :  { %v7806_v57 = vmax.f32 %v7619_v21, 0.0  ;;  %v7813_v7 = vpack.c.bf16 %v7805_v14, %v7797_v0 }
 0x4f6   :  { %v7814_v58 = vpack.c.bf16 %v7806_v57, %v7798_v3 }
 0x4f8   :  { %8450 = vmatprep.mubr.bf16.mxu0 %v7814_v58 }
 0x4f9   :  { %8451 = vmatmul.mubr.bf16.vlgmr.msra.gmra.mxu0 %v7813_v7 }
 0x51c   :  { %v7741_v11 = vpop.f32.mrf.mxu0 }
 0x51e   :  { %v7743_v61 = vpop.f32.mrf.mxu0 }
 0x520   :  { %v7745_v39 = vpop.f32.mrf.mxu0 }
 0x522   :  { %v7747_v37 = vpop.f32.mrf.mxu0 }
 0x52b   :  { %v7698_v36 = vpop.f32.mrf.mxu1 }
 0x52c   :  { %v7699_v60 = vadd.f32 %v7698_v36, %v7656_v30 }
 0x52d   :  { %v7700_v53 = vpop.f32.mrf.mxu1 }
 0x52e   :  { %v7701_v26 = vadd.f32 %v7700_v53, %v7658_v19  ;;  %v7742_v4 = vadd.f32 %v7741_v11, %v7699_v60 }
 0x52f   :  { %v7702_v48 = vpop.f32.mrf.mxu1 }
 0x530   :  { %v7703_v55 = vadd.f32 %v7702_v48, %v7660_v17  ;;  %v7744_v12 = vadd.f32 %v7743_v61, %v7701_v26 }
 0x531   :  { %v7704_v47 = vpop.f32.mrf.mxu1 }
 0x532   :  { %v7705_v52 = vadd.f32 %v7704_v47, %v7662_v5  ;;  %v7746_v46 = vadd.f32 %v7745_v39, %v7703_v55 }
 0x534   :  { %v7748_v34 = vadd.f32 %v7747_v37, %v7705_v52 }
 0x53c   :  { %v9635_v2 = vpop.f32.mrf.mxu0 }
 0x53e   :  { %v9636_v51 = vpop.f32.mrf.mxu0 }
 0x53f   :  { %v9637_v63 = vadd.f32 %v9636_v51, %v9635_v2 }
 0x540   :  { %v9638_v8 = vpop.f32.mrf.mxu0 }
 0x541   :  { %v8371_v54 = vadd.f32 %v9637_v63, %v9554_v18 }
 0x542   :  { %v9639_v44 = vpop.f32.mrf.mxu0 }
 0x543   :  { %v9640_v21 = vadd.f32 %v9639_v44, %v9638_v8 }
 0x545   :  { %v8374_v58 = vadd.f32 %v9640_v21, %v9554_v18 }
 0x56b   :  { %v7784_v31 = vpop.f32.mrf.mxu1 }
 0x56c   :  { %v7785_v40 = vadd.f32 %v7784_v31, %v7742_v4 }
 0x56d   :  { %v7786_v29 = vpop.f32.mrf.mxu1 }
 0x56e   :  { %v7787_v22 = vadd.f32 %v7786_v29, %v7744_v12  ;;  %v7799_v20 = vmax.f32 %v7785_v40, 0.0 }
 0x56f   :  { %v7788_v38 = vpop.f32.mrf.mxu1 }
 0x570   :  { %v7789_v24 = vadd.f32 %v7788_v38, %v7746_v46  ;;  %v7800_v62 = vmax.f32 %v7787_v22, 0.0 }
 0x571   :  { %v7790_v15 = vpop.f32.mrf.mxu1 }
 0x572   :  { %v7791_v56 = vadd.f32 %v7790_v15, %v7748_v34  ;;  %v7807_v45 = vmax.f32 %v7789_v24, 0.0 }
 0x574   :  { %v7808_v59 = vmax.f32 %v7791_v56, 0.0  ;;  %v7815_v28 = vpack.c.bf16 %v7807_v45, %v7799_v20 }
 0x576   :  { %v7816_v13 = vpack.c.bf16 %v7808_v59, %v7800_v62 }
 0x578   :  { %8491 = vmatprep.mubr.bf16.mxu1 %v7816_v13 }
 0x579   :  { %8492 = vmatmul.mubr.bf16.vlgmr.msra.gmra.mxu1 %v7815_v28 }
 0x58b   :  { %v9657_v33 = vpop.f32.mrf.mxu1 }
 0x58d   :  { %v9658_v50 = vpop.f32.mrf.mxu1 }
 0x58e   :  { %v9659_v1 = vadd.f32 %v9658_v50, %v9657_v33 }
 0x58f   :  { %v9660_v25 = vpop.f32.mrf.mxu1 }
 0x590   :  { %v8412_v9 = vadd.f32 %v9659_v1, %v8371_v54 }
 0x591   :  { %v9661_v32 = vpop.f32.mrf.mxu1 }
 0x592   :  { %v9662_v0 = vadd.f32 %v9661_v32, %v9660_v25 }
 0x594   :  { %v8415_v36 = vadd.f32 %v9662_v0, %v8374_v58 }
 0x5b9   :  { %v9679_v42 = vpop.f32.mrf.mxu0 }
 0x5bb   :  { %v9680_v27 = vpop.f32.mrf.mxu0 }
 0x5bc   :  { %v9681_v14 = vadd.f32 %v9680_v27, %v9679_v42 }
 0x5bd   :  { %v9682_v43 = vpop.f32.mrf.mxu0 }
 0x5be   :  { %v8453_v7 = vadd.f32 %v9681_v14, %v8412_v9 }
 0x5bf   :  { %v9683_v3 = vpop.f32.mrf.mxu0 }
 0x5c0   :  { %v9684_v35 = vadd.f32 %v9683_v3, %v9682_v43 }
 0x5c2   :  { %v8456_v11 = vadd.f32 %v9684_v35, %v8415_v36 }
 0x639   :  { %v9701_v57 = vpop.f32.mrf.mxu1 }
 0x63b   :  { %v9702_v6 = vpop.f32.mrf.mxu1 }
 0x63c   :  { %v9703_v10 = vadd.f32 %v9702_v6, %v9701_v57 }
 0x63d   :  { %v9704_v16 = vpop.f32.mrf.mxu1 }
 0x63e   :  { %v8494_v23 = vadd.f32 %v9703_v10, %v8453_v7 }
 0x63f   :  { %v9705_v53 = vpop.f32.mrf.mxu1 }
 0x640   :  { %8500 = vst [vmem:[#allocation14] sm:$0xff] %v8494_v23  ;;  %v9706_v41 = vadd.f32 %v9705_v53, %v9704_v16 }
 0x642   :  { %v8497_v49 = vadd.f32 %v9706_v41, %v8456_v11 }
 0x644   :  { %8501 = vst [vmem:[#allocation14 + $0x8] sm:$0xff] %v8497_v49 }
 0x645   :  { %9938 = shalt.err (!%p9935_p11)
}
 0x646   :  { %s9969_s14 = smov 128   ;;  %s9970_s15 = smov 8  }
 0x647   :  { %8513 = dma.vmem_to_hbm [thread:$0]  %s8508_s6, 256, %s10381_s7, [#allocation4], %s9969_s14, %s9969_s14, %s9970_s15  }
 0x648   :  { %9955 = dma.done.wait [#allocation4], 256  }
 0x649   :  { %9956 = vsyncadd [#allocation4], 4294967040 }
 0x64a   :  { %8517 = vsyncpa [#allocation3], 1 }
 0x64b   :  { %8518 = vsyncpa [#allocation6], 1 }
 0x64c   :  { %8519 = vsyncpa [#allocation9], 1 }
 0x64d   :  { %8520 = vsyncpa [#allocation12], 1 }
 0x64e   :  { %8521 = vsyncpa [#allocation4], 1 }

</bundles_post_ra>
